<compile_context>
chip_gen: v6e
topology: v6e:2x2x1
jax: 0.10.0
libtpu: 0.0.40
codegen_flags: <defaults>
</compile_context>

<pallas_src>
import functools

import numpy as np
import jax
import jax.numpy as jnp
from jax.experimental import pallas as pl
from jax.experimental.pallas import tpu as pltpu

H = W = 50            # input spatial size implied by fc1 = Linear(16*25*25, 8)
HP = H // 2           # 25  (after MaxPool2d(2,2))
C_OUT = 16
NTAPS = 16            # 4x4 shifted windows: covers every 3x3 tap for both pool offsets
SPAD = 640            # 25*25 = 625 flattened spatial positions, lane-padded to 5*128
K64 = 4 * C_OUT       # 64 conv-matmul rows = (pool offset a,b) x channel
BN_EPS = 1e-5


# ---------------------------------------------------------------------------
# Kernel A: fused conv3x3('same') + ReLU + BatchNorm(eval) + MaxPool(2,2)
#           one (64,16)@(16,640) MXU matmul per image + a tiny vector epilogue.
# ---------------------------------------------------------------------------
def conv_bn_pool_kernel(bsz, x_ref, w_ref, bias_ref, scale_ref, shift_ref, o_ref):
    # x_ref     : (bsz, 16, 640) f32   x_cols[b, p*4+q, i*25+j] = xpad[b, 2i+p, 2j+q]
    # w_ref     : (64, 16)  f32        row k=(a*2+b)*16+c holds w[c, p-a, q-b] at col p*4+q
    # bias_ref  : (64, 1)   f32        conv bias per row
    # scale_ref : (64, 1)   f32        BN gamma/sqrt(var+eps) per row
    # shift_ref : (64, 1)   f32        BN beta - mean*scale per row
    # o_ref     : (bsz, 16, 640) bf16  pooled features, channels on sublanes, flat spatial on lanes
    w = w_ref[...]
    bias = bias_ref[...]
    scale = scale_ref[...]
    shift = shift_ref[...]
    for b in range(bsz):                                   # static, unrolled
        conv = jnp.dot(w, x_ref[b], preferred_element_type=jnp.float32)   # (64, 640)
        y = jnp.maximum(conv + bias, 0.0) * scale + shift                  # ReLU -> BN(eval)
        pooled = jnp.maximum(                                              # MaxPool 2x2
            jnp.maximum(y[0 * C_OUT:1 * C_OUT], y[1 * C_OUT:2 * C_OUT]),
            jnp.maximum(y[2 * C_OUT:3 * C_OUT], y[3 * C_OUT:4 * C_OUT]))
        o_ref[b] = pooled.astype(o_ref.dtype)


def conv_bn_pool(x_cols, pp, bsz):
    n_pad = x_cols.shape[0]
    return pl.pallas_call(
        functools.partial(conv_bn_pool_kernel, bsz),
        out_shape=jax.ShapeDtypeStruct((n_pad, C_OUT, SPAD), jnp.bfloat16),
        grid=(n_pad // bsz,),
        in_specs=[
            pl.BlockSpec((bsz, NTAPS, SPAD), lambda i: (i, 0, 0)),
            pl.BlockSpec((K64, NTAPS), lambda i: (0, 0)),   # resident across grid steps
            pl.BlockSpec((K64, 1), lambda i: (0, 0)),
            pl.BlockSpec((K64, 1), lambda i: (0, 0)),
            pl.BlockSpec((K64, 1), lambda i: (0, 0)),
        ],
        out_specs=pl.BlockSpec((bsz, C_OUT, SPAD), lambda i: (i, 0, 0)),
        compiler_params=pltpu.CompilerParams(dimension_semantics=("parallel",)),
    )(x_cols, pp["wall"], pp["bias64"], pp["scale64"], pp["shift64"])


# ---------------------------------------------------------------------------
# Kernel B: fc1(bf16 in, f32 accum) + ReLU (+ Dropout eval = identity) + fc2
# ---------------------------------------------------------------------------
def mlp_kernel(x_ref, w1_ref, b1_ref, w2_ref, b2_ref, o_ref):
    h = jnp.dot(x_ref[...], w1_ref[...], preferred_element_type=jnp.float32)   # (Bt, 8)
    h = jnp.maximum(h + b1_ref[...], 0.0)
    # Dropout(p=0.5) is the identity in eval mode.
    # TODO(synk): training-mode dropout would use pltpu.prng_seed / pltpu.stateful_bernoulli.
    o_ref[...] = jnp.dot(h, w2_ref[...], preferred_element_type=jnp.float32) + b2_ref[...]


def mlp(x_flat, pp, bsz):
    n_pad, kdim = x_flat.shape
    return pl.pallas_call(
        mlp_kernel,
        out_shape=jax.ShapeDtypeStruct((n_pad, 2), jnp.float32),
        grid=(n_pad // bsz,),
        in_specs=[
            pl.BlockSpec((bsz, kdim), lambda i: (i, 0)),
            pl.BlockSpec((kdim, 8), lambda i: (0, 0)),      # bf16 weights stay resident
            pl.BlockSpec((1, 8), lambda i: (0, 0)),
            pl.BlockSpec((8, 2), lambda i: (0, 0)),
            pl.BlockSpec((1, 2), lambda i: (0, 0)),
        ],
        out_specs=pl.BlockSpec((bsz, 2), lambda i: (i, 0)),
        compiler_params=pltpu.CompilerParams(dimension_semantics=("parallel",)),
    )(x_flat, pp["w1"], pp["b1"], pp["w2"], pp["b2"])


# ---------------------------------------------------------------------------
# One-time (host side) parameter repacking
# ---------------------------------------------------------------------------
def prepare_params(params):
    w = np.asarray(params["conv_w"], np.float32).reshape(C_OUT, 3, 3)
    cb = np.asarray(params["conv_b"], np.float32)
    gamma = np.asarray(params["bn_gamma"], np.float32)
    beta = np.asarray(params["bn_beta"], np.float32)
    mean = np.asarray(params["bn_mean"], np.float32)
    var = np.asarray(params["bn_var"], np.float32)
    scale = gamma / np.sqrt(var + BN_EPS)
    shift = beta - mean * scale

    wall = np.zeros((K64, NTAPS), np.float32)
    bias64 = np.zeros((K64, 1), np.float32)
    scale64 = np.zeros((K64, 1), np.float32)
    shift64 = np.zeros((K64, 1), np.float32)
    for a in range(2):
        for b in range(2):
            for c in range(C_OUT):
                k = (a * 2 + b) * C_OUT + c
                bias64[k, 0] = cb[c]
                scale64[k, 0] = scale[c]
                shift64[k, 0] = shift[c]
                for dy in range(3):
                    for dx in range(3):
                        wall[k, (a + dy) * 4 + (b + dx)] = w[c, dy, dx]

    # fc1 weight stored as (in, out) = (10000, 8); re-index to the lane-padded flat
    # feature order c*640 + s (zeros over the 15 padded spatial lanes).
    w1 = np.asarray(params["fc1_w"], np.float32).reshape(C_OUT, HP * HP, 8)
    w1p = np.zeros((C_OUT, SPAD, 8), np.float32)
    w1p[:, :HP * HP, :] = w1
    w1p = w1p.reshape(C_OUT * SPAD, 8)

    return {
        "wall": jnp.asarray(wall),
        "bias64": jnp.asarray(bias64),
        "scale64": jnp.asarray(scale64),
        "shift64": jnp.asarray(shift64),
        "w1": jnp.asarray(w1p, dtype=jnp.bfloat16),
        "b1": jnp.asarray(params["fc1_b"], jnp.float32).reshape(1, 8),
        "w2": jnp.asarray(params["fc2_w"], jnp.float32).reshape(8, 2),
        "b2": jnp.asarray(params["fc2_b"], jnp.float32).reshape(1, 2),
    }


# ---------------------------------------------------------------------------
# Forward pass wrapper (XLA glue: pad + 16 shifted windows, done once per call)
# ---------------------------------------------------------------------------
def cnn_forward(x, pp):
    # x: (N, 1, 50, 50) float32, NCHW (PyTorch convention)
    n = x.shape[0]
    bsz = min(16, n)
    n_pad = ((n + bsz - 1) // bsz) * bsz
    if n_pad != n:
        x = jnp.pad(x, ((0, n_pad - n), (0, 0), (0, 0), (0, 0)))

    xpad = jnp.pad(x[:, 0], ((0, 0), (1, 1), (1, 1)))                 # (n_pad, 52, 52)
    # im2col-lite: 16 shifted strided windows, flattened spatial last (lane axis).
    cols = [xpad[:, p:p + 2 * HP:2, q:q + 2 * HP:2].reshape(n_pad, HP * HP)
            for p in range(4) for q in range(4)]
    x_cols = jnp.stack(cols, axis=1)                                  # (n_pad, 16, 625)
    x_cols = jnp.pad(x_cols, ((0, 0), (0, 0), (0, SPAD - HP * HP)))   # lane-pad -> (n_pad, 16, 640)

    feat = conv_bn_pool(x_cols, pp, bsz)                              # (n_pad, 16, 640) bf16
    flat = feat.reshape(n_pad, C_OUT * SPAD)                          # contiguous -> free reshape
    out = mlp(flat, pp, bsz)                                          # (n_pad, 2) f32
    return out[:n]


# ---------------------------------------------------------------------------
# Pure-numpy float64 reference (for a correctness check)
# ---------------------------------------------------------------------------
def reference_forward(x, params):
    x = np.asarray(x, np.float64)
    w = np.asarray(params["conv_w"], np.float64)[:, 0]          # (16,3,3)
    cb = np.asarray(params["conv_b"], np.float64)
    gamma = np.asarray(params["bn_gamma"], np.float64)
    beta = np.asarray(params["bn_beta"], np.float64)
    mean = np.asarray(params["bn_mean"], np.float64)
    var = np.asarray(params["bn_var"], np.float64)
    w1 = np.asarray(params["fc1_w"], np.float64)
    b1 = np.asarray(params["fc1_b"], np.float64)
    w2 = np.asarray(params["fc2_w"], np.float64)
    b2 = np.asarray(params["fc2_b"], np.float64)

    n = x.shape[0]
    xp = np.pad(x[:, 0], ((0, 0), (1, 1), (1, 1)))
    conv = np.zeros((n, C_OUT, H, W))
    for c in range(C_OUT):
        for dy in range(3):
            for dx in range(3):
                conv[:, c] += w[c, dy, dx] * xp[:, dy:dy + H, dx:dx + W]
    conv += cb[None, :, None, None]
    r = np.maximum(conv, 0.0)
    scale = gamma / np.sqrt(var + BN_EPS)
    shift = beta - mean * scale
    bn = r * scale[None, :, None, None] + shift[None, :, None, None]
    pooled = bn.reshape(n, C_OUT, HP, 2, HP, 2).max(axis=(3, 5))
    flat = pooled.reshape(n, -1)
    h = np.maximum(flat @ w1 + b1, 0.0)
    return h @ w2 + b2


# ---------------------------------------------------------------------------
if __name__ == "__main__":
    key = jax.random.PRNGKey(0)
    ks = jax.random.split(key, 11)

    params = {
        "conv_w":  (jax.random.normal(ks[0], (C_OUT, 1, 3, 3)) * 0.3).astype(jnp.float32),
        "conv_b":  (jax.random.normal(ks[1], (C_OUT,)) * 0.1).astype(jnp.float32),
        "bn_gamma": (1.0 + 0.1 * jax.random.normal(ks[2], (C_OUT,))).astype(jnp.float32),
        "bn_beta":  (0.1 * jax.random.normal(ks[3], (C_OUT,))).astype(jnp.float32),
        "bn_mean":  (0.1 * jax.random.normal(ks[4], (C_OUT,))).astype(jnp.float32),
        "bn_var":   (0.5 + jnp.abs(jax.random.normal(ks[5], (C_OUT,))) * 0.5).astype(jnp.float32),
        # Linear weights stored pre-transposed: (in, out), so y = x @ W + b.
        "fc1_w": (jax.random.normal(ks[6], (C_OUT * HP * HP, 8)) * 0.01).astype(jnp.float32),
        "fc1_b": (jax.random.normal(ks[7], (1, 8)) * 0.1).astype(jnp.float32),
        "fc2_w": (jax.random.normal(ks[8], (8, 2)) * 0.1).astype(jnp.float32),
        "fc2_b": (jax.random.normal(ks[9], (1, 2)) * 0.1).astype(jnp.float32),
    }

    x = jax.random.normal(ks[10], (2, 1, H, W), dtype=jnp.float32)

    pp = prepare_params(params)
    fwd = jax.jit(cnn_forward)
    out = jax.block_until_ready(fwd(x, pp))
    assert out.shape == (2, 2) and out.dtype == jnp.float32

    ref = reference_forward(np.asarray(x), params)
    np.testing.assert_allclose(np.asarray(out), ref, rtol=2e-2, atol=2e-2)

    print("KERNEL_OK")
</pallas_src>

<mosaic_0001>
module attributes {stable_mosaic.version = 11 : i64} {
  func.func @conv_bn_pool_kernel(%arg0: i32, %arg1: memref<2x16x640xf32, #tpu.memory_space<vmem>>, %arg2: memref<64x16xf32, #tpu.memory_space<vmem>>, %arg3: memref<64x1xf32, #tpu.memory_space<vmem>>, %arg4: memref<64x1xf32, #tpu.memory_space<vmem>>, %arg5: memref<64x1xf32, #tpu.memory_space<vmem>>, %arg6: memref<2x16x640xbf16, #tpu.memory_space<vmem>>) attributes {dimension_semantics = [#tpu.dimension_semantics<parallel>], iteration_bounds = array<i64: 1>, scalar_prefetch = 0 : i64, scratch_operands = 0 : i64, tpu.core_type = #tpu.core_type<tc>, window_params = [{transform_indices = @transform_0, window_bounds = array<i64: 2, 16, 640>}, {pipeline_mode = #tpu.pipeline_mode<synchronous>, transform_indices = @transform_1, window_bounds = array<i64: 64, 16>}, {pipeline_mode = #tpu.pipeline_mode<synchronous>, transform_indices = @transform_2, window_bounds = array<i64: 64, 1>}, {pipeline_mode = #tpu.pipeline_mode<synchronous>, transform_indices = @transform_3, window_bounds = array<i64: 64, 1>}, {pipeline_mode = #tpu.pipeline_mode<synchronous>, transform_indices = @transform_4, window_bounds = array<i64: 64, 1>}, {transform_indices = @transform_5, window_bounds = array<i64: 2, 16, 640>}]} {
    %c0 = arith.constant 0 : index
    %c0_0 = arith.constant 0 : index
    %0 = vector.load %arg2[%c0, %c0_0] : memref<64x16xf32, #tpu.memory_space<vmem>>, vector<64x16xf32>
    %c0_1 = arith.constant 0 : index
    %c0_2 = arith.constant 0 : index
    %1 = vector.load %arg3[%c0_1, %c0_2] : memref<64x1xf32, #tpu.memory_space<vmem>>, vector<64x1xf32>
    %c0_3 = arith.constant 0 : index
    %c0_4 = arith.constant 0 : index
    %2 = vector.load %arg4[%c0_3, %c0_4] : memref<64x1xf32, #tpu.memory_space<vmem>>, vector<64x1xf32>
    %c0_5 = arith.constant 0 : index
    %c0_6 = arith.constant 0 : index
    %3 = vector.load %arg5[%c0_5, %c0_6] : memref<64x1xf32, #tpu.memory_space<vmem>>, vector<64x1xf32>
    %c0_7 = arith.constant 0 : index
    %c0_8 = arith.constant 0 : index
    %c0_9 = arith.constant 0 : index
    %4 = vector.load %arg1[%c0_7, %c0_8, %c0_9] : memref<2x16x640xf32, #tpu.memory_space<vmem>>, vector<1x16x640xf32>
    %5 = vector.shape_cast %4 : vector<1x16x640xf32> to vector<16x640xf32>
    %cst = arith.constant dense<0.000000e+00> : vector<64x640xf32>
    %6 = tpu.matmul %0, %5, %cst {dimension_numbers = #tpu.dot_dimension_numbers<[1], [0], [0], [1], [0, 0, 1, 1], [], []>} : vector<64x16xf32>, vector<16x640xf32>, vector<64x640xf32> -> vector<64x640xf32>
    %7 = vector.broadcast %1 : vector<64x1xf32> to vector<64x640xf32>
    %8 = arith.addf %6, %7 : vector<64x640xf32>
    %cst_10 = arith.constant 0.000000e+00 : f32
    %9 = vector.broadcast %cst_10 : f32 to vector<64x640xf32>
    %10 = arith.maximumf %8, %9 : vector<64x640xf32>
    %11 = vector.broadcast %2 : vector<64x1xf32> to vector<64x640xf32>
    %12 = arith.mulf %10, %11 : vector<64x640xf32>
    %13 = vector.broadcast %3 : vector<64x1xf32> to vector<64x640xf32>
    %14 = arith.addf %12, %13 : vector<64x640xf32>
    %15 = vector.extract_strided_slice %14 {offsets = [0, 0], sizes = [16, 640], strides = [1, 1]} : vector<64x640xf32> to vector<16x640xf32>
    %16 = vector.extract_strided_slice %14 {offsets = [16, 0], sizes = [16, 640], strides = [1, 1]} : vector<64x640xf32> to vector<16x640xf32>
    %17 = arith.maximumf %15, %16 : vector<16x640xf32>
    %18 = vector.extract_strided_slice %14 {offsets = [32, 0], sizes = [16, 640], strides = [1, 1]} : vector<64x640xf32> to vector<16x640xf32>
    %19 = vector.extract_strided_slice %14 {offsets = [48, 0], sizes = [16, 640], strides = [1, 1]} : vector<64x640xf32> to vector<16x640xf32>
    %20 = arith.maximumf %18, %19 : vector<16x640xf32>
    %21 = arith.maximumf %17, %20 : vector<16x640xf32>
    %22 = arith.truncf %21 : vector<16x640xf32> to vector<16x640xbf16>
    %c0_11 = arith.constant 0 : index
    %c0_12 = arith.constant 0 : index
    %c0_13 = arith.constant 0 : index
    %23 = vector.load %arg6[%c0_11, %c0_12, %c0_13] : memref<2x16x640xbf16, #tpu.memory_space<vmem>>, vector<1x16x640xbf16>
    %24 = vector.shape_cast %23 : vector<1x16x640xbf16> to vector<16x640xbf16>
    %25 = vector.shape_cast %22 : vector<16x640xbf16> to vector<1x16x640xbf16>
    tpu.vector_store %arg6[%c0_11, %c0_12, %c0_13], %25 {strides = array<i32>} : memref<2x16x640xbf16, #tpu.memory_space<vmem>>, vector<1x16x640xbf16>,
    %c1 = arith.constant 1 : index
    %c0_14 = arith.constant 0 : index
    %c0_15 = arith.constant 0 : index
    %26 = vector.load %arg1[%c1, %c0_14, %c0_15] : memref<2x16x640xf32, #tpu.memory_space<vmem>>, vector<1x16x640xf32>
    %27 = vector.shape_cast %26 : vector<1x16x640xf32> to vector<16x640xf32>
    %cst_16 = arith.constant dense<0.000000e+00> : vector<64x640xf32>
    %28 = tpu.matmul %0, %27, %cst_16 {dimension_numbers = #tpu.dot_dimension_numbers<[1], [0], [0], [1], [0, 0, 1, 1], [], []>} : vector<64x16xf32>, vector<16x640xf32>, vector<64x640xf32> -> vector<64x640xf32>
    %29 = vector.broadcast %1 : vector<64x1xf32> to vector<64x640xf32>
    %30 = arith.addf %28, %29 : vector<64x640xf32>
    %cst_17 = arith.constant 0.000000e+00 : f32
    %31 = vector.broadcast %cst_17 : f32 to vector<64x640xf32>
    %32 = arith.maximumf %30, %31 : vector<64x640xf32>
    %33 = vector.broadcast %2 : vector<64x1xf32> to vector<64x640xf32>
    %34 = arith.mulf %32, %33 : vector<64x640xf32>
    %35 = vector.broadcast %3 : vector<64x1xf32> to vector<64x640xf32>
    %36 = arith.addf %34, %35 : vector<64x640xf32>
    %37 = vector.extract_strided_slice %36 {offsets = [0, 0], sizes = [16, 640], strides = [1, 1]} : vector<64x640xf32> to vector<16x640xf32>
    %38 = vector.extract_strided_slice %36 {offsets = [16, 0], sizes = [16, 640], strides = [1, 1]} : vector<64x640xf32> to vector<16x640xf32>
    %39 = arith.maximumf %37, %38 : vector<16x640xf32>
    %40 = vector.extract_strided_slice %36 {offsets = [32, 0], sizes = [16, 640], strides = [1, 1]} : vector<64x640xf32> to vector<16x640xf32>
    %41 = vector.extract_strided_slice %36 {offsets = [48, 0], sizes = [16, 640], strides = [1, 1]} : vector<64x640xf32> to vector<16x640xf32>
    %42 = arith.maximumf %40, %41 : vector<16x640xf32>
    %43 = arith.maximumf %39, %42 : vector<16x640xf32>
    %44 = arith.truncf %43 : vector<16x640xf32> to vector<16x640xbf16>
    %c1_18 = arith.constant 1 : index
    %c0_19 = arith.constant 0 : index
    %c0_20 = arith.constant 0 : index
    %45 = vector.load %arg6[%c1_18, %c0_19, %c0_20] : memref<2x16x640xbf16, #tpu.memory_space<vmem>>, vector<1x16x640xbf16>
    %46 = vector.shape_cast %45 : vector<1x16x640xbf16> to vector<16x640xbf16>
    %47 = vector.shape_cast %44 : vector<16x640xbf16> to vector<1x16x640xbf16>
    tpu.vector_store %arg6[%c1_18, %c0_19, %c0_20], %47 {strides = array<i32>} : memref<2x16x640xbf16, #tpu.memory_space<vmem>>, vector<1x16x640xbf16>,
    return
  }
  func.func @transform_0(%arg0: i32) -> (i32, i32, i32) {
    %c0_i32 = arith.constant 0 : i32
    %c0_i32_0 = arith.constant 0 : i32
    %c0_i32_1 = arith.constant 0 : i32
    return %arg0, %c0_i32, %c0_i32_0 : i32, i32, i32
  }
  func.func @transform_1(%arg0: i32) -> (i32, i32) {
    %c0_i32 = arith.constant 0 : i32
    %c0_i32_0 = arith.constant 0 : i32
    %c0_i32_1 = arith.constant 0 : i32
    return %c0_i32, %c0_i32_0 : i32, i32
  }
  func.func @transform_2(%arg0: i32) -> (i32, i32) {
    %c0_i32 = arith.constant 0 : i32
    %c0_i32_0 = arith.constant 0 : i32
    %c0_i32_1 = arith.constant 0 : i32
    return %c0_i32, %c0_i32_0 : i32, i32
  }
  func.func @transform_3(%arg0: i32) -> (i32, i32) {
    %c0_i32 = arith.constant 0 : i32
    %c0_i32_0 = arith.constant 0 : i32
    %c0_i32_1 = arith.constant 0 : i32
    return %c0_i32, %c0_i32_0 : i32, i32
  }
  func.func @transform_4(%arg0: i32) -> (i32, i32) {
    %c0_i32 = arith.constant 0 : i32
    %c0_i32_0 = arith.constant 0 : i32
    %c0_i32_1 = arith.constant 0 : i32
    return %c0_i32, %c0_i32_0 : i32, i32
  }
  func.func @transform_5(%arg0: i32) -> (i32, i32, i32) {
    %c0_i32 = arith.constant 0 : i32
    %c0_i32_0 = arith.constant 0 : i32
    %c0_i32_1 = arith.constant 0 : i32
    return %arg0, %c0_i32, %c0_i32_0 : i32, i32, i32
  }
}

module attributes {stable_mosaic.version = 11 : i64} {
  func.func @mlp_kernel(%arg0: i32, %arg1: memref<2x10240xbf16, #tpu.memory_space<vmem>>, %arg2: memref<10240x8xbf16, #tpu.memory_space<vmem>>, %arg3: memref<1x8xf32, #tpu.memory_space<vmem>>, %arg4: memref<8x2xf32, #tpu.memory_space<vmem>>, %arg5: memref<1x2xf32, #tpu.memory_space<vmem>>, %arg6: memref<2x2xf32, #tpu.memory_space<vmem>>) attributes {dimension_semantics = [#tpu.dimension_semantics<parallel>], iteration_bounds = array<i64: 1>, scalar_prefetch = 0 : i64, scratch_operands = 0 : i64, tpu.core_type = #tpu.core_type<tc>, window_params = [{transform_indices = @transform_0, window_bounds = array<i64: 2, 10240>}, {pipeline_mode = #tpu.pipeline_mode<synchronous>, transform_indices = @transform_1, window_bounds = array<i64: 10240, 8>}, {pipeline_mode = #tpu.pipeline_mode<synchronous>, transform_indices = @transform_2, window_bounds = array<i64: 1, 8>}, {pipeline_mode = #tpu.pipeline_mode<synchronous>, transform_indices = @transform_3, window_bounds = array<i64: 8, 2>}, {pipeline_mode = #tpu.pipeline_mode<synchronous>, transform_indices = @transform_4, window_bounds = array<i64: 1, 2>}, {transform_indices = @transform_5, window_bounds = array<i64: 2, 2>}]} {
    %c0 = arith.constant 0 : index
    %c0_0 = arith.constant 0 : index
    %0 = vector.load %arg1[%c0, %c0_0] : memref<2x10240xbf16, #tpu.memory_space<vmem>>, vector<2x10240xbf16>
    %c0_1 = arith.constant 0 : index
    %c0_2 = arith.constant 0 : index
    %1 = vector.load %arg2[%c0_1, %c0_2] : memref<10240x8xbf16, #tpu.memory_space<vmem>>, vector<10240x8xbf16>
    %cst = arith.constant dense<0.000000e+00> : vector<2x8xf32>
    %2 = tpu.matmul %0, %1, %cst {dimension_numbers = #tpu.dot_dimension_numbers<[1], [0], [0], [1], [0, 0, 1, 1], [], []>} : vector<2x10240xbf16>, vector<10240x8xbf16>, vector<2x8xf32> -> vector<2x8xf32>
    %c0_3 = arith.constant 0 : index
    %c0_4 = arith.constant 0 : index
    %3 = vector.load %arg3[%c0_3, %c0_4] : memref<1x8xf32, #tpu.memory_space<vmem>>, vector<1x8xf32>
    %4 = vector.broadcast %3 : vector<1x8xf32> to vector<2x8xf32>
    %5 = arith.addf %2, %4 : vector<2x8xf32>
    %cst_5 = arith.constant 0.000000e+00 : f32
    %6 = vector.broadcast %cst_5 : f32 to vector<2x8xf32>
    %7 = arith.maximumf %5, %6 : vector<2x8xf32>
    %c0_6 = arith.constant 0 : index
    %c0_7 = arith.constant 0 : index
    %8 = vector.load %arg4[%c0_6, %c0_7] : memref<8x2xf32, #tpu.memory_space<vmem>>, vector<8x2xf32>
    %cst_8 = arith.constant dense<0.000000e+00> : vector<2x2xf32>
    %9 = tpu.matmul %7, %8, %cst_8 {dimension_numbers = #tpu.dot_dimension_numbers<[1], [0], [0], [1], [0, 0, 1, 1], [], []>} : vector<2x8xf32>, vector<8x2xf32>, vector<2x2xf32> -> vector<2x2xf32>
    %c0_9 = arith.constant 0 : index
    %c0_10 = arith.constant 0 : index
    %10 = vector.load %arg5[%c0_9, %c0_10] : memref<1x2xf32, #tpu.memory_space<vmem>>, vector<1x2xf32>
    %11 = vector.broadcast %10 : vector<1x2xf32> to vector<2x2xf32>
    %12 = arith.addf %9, %11 : vector<2x2xf32>
    %c0_11 = arith.constant 0 : index
    %c0_12 = arith.constant 0 : index
    %13 = vector.load %arg6[%c0_11, %c0_12] : memref<2x2xf32, #tpu.memory_space<vmem>>, vector<2x2xf32>
    tpu.vector_store %arg6[%c0_11, %c0_12], %12 {strides = array<i32>} : memref<2x2xf32, #tpu.memory_space<vmem>>, vector<2x2xf32>,
    return
  }
  func.func @transform_0(%arg0: i32) -> (i32, i32) {
    %c0_i32 = arith.constant 0 : i32
    %c0_i32_0 = arith.constant 0 : i32
    return %arg0, %c0_i32 : i32, i32
  }
  func.func @transform_1(%arg0: i32) -> (i32, i32) {
    %c0_i32 = arith.constant 0 : i32
    %c0_i32_0 = arith.constant 0 : i32
    %c0_i32_1 = arith.constant 0 : i32
    return %c0_i32, %c0_i32_0 : i32, i32
  }
  func.func @transform_2(%arg0: i32) -> (i32, i32) {
    %c0_i32 = arith.constant 0 : i32
    %c0_i32_0 = arith.constant 0 : i32
    %c0_i32_1 = arith.constant 0 : i32
    return %c0_i32, %c0_i32_0 : i32, i32
  }
  func.func @transform_3(%arg0: i32) -> (i32, i32) {
    %c0_i32 = arith.constant 0 : i32
    %c0_i32_0 = arith.constant 0 : i32
    %c0_i32_1 = arith.constant 0 : i32
    return %c0_i32, %c0_i32_0 : i32, i32
  }
  func.func @transform_4(%arg0: i32) -> (i32, i32) {
    %c0_i32 = arith.constant 0 : i32
    %c0_i32_0 = arith.constant 0 : i32
    %c0_i32_1 = arith.constant 0 : i32
    return %c0_i32, %c0_i32_0 : i32, i32
  }
  func.func @transform_5(%arg0: i32) -> (i32, i32) {
    %c0_i32 = arith.constant 0 : i32
    %c0_i32_0 = arith.constant 0 : i32
    return %arg0, %c0_i32 : i32, i32
  }
}

</mosaic_0001>

<bundles_post_ra>
// kernel: cnn_forward.2
= control target key start
LH: loop header
LB: loop body
LE: loop exit
PB: predicated region body
PF: predicated region fallthrough
CT: control target
= control target key end

     0   :  { %v1405_v3 = vmov 0.0   ;;  %vm102_vm0 = vcmask 130048   ;;  %v1406_v21 = vmov 0   ;;  %s2196_s0 = inlined_call_operand.vmem [shape: f32[2,16,640], index: 0, kind: input, shape index: {}]   ;;  %s2197_s1 = inlined_call_operand.vmem [shape: f32[64,16], index: 1, kind: input, shape index: {}]   ;;  %s2198_s2 = inlined_call_operand.vmem [shape: f32[64,1], index: 2, kind: input, shape index: {}]   ;;  %s2199_s3 = inlined_call_operand.vmem [shape: f32[64,1], index: 3, kind: input, shape index: {}]   ;;  %s2200_s4 = inlined_call_operand.vmem [shape: f32[64,1], index: 4, kind: input, shape index: {}]   ;;  %s2201_s5 = inlined_call_operand.vmem [shape: bf16[2,16,640], index: 5, kind: output, shape index: {}]  }
   0x1   :  { %v58_v0 = vld [vmem:[%s2196_s0 + $0x30] sm:$0xff]  ;;  %v60_v1 = vld [vmem:[%s2196_s0 + $0x40] sm:$0xff]  ;;  %v57_v2 = vld [vmem:[%s2196_s0 + $0x28] sm:$0xff]  ;;  %191 = vmatprep.mubr.f32.mxu0 %v1405_v3  ;;  %304 = vmatprep.mubr.f32.mxu1 %v1405_v3 }
   0x2   :  { %155 = vmatprep.subr.mxu0 %v58_v0  ;;  %268 = vmatprep.subr.mxu1 %v60_v1  ;;  %v59_v4 = vld [vmem:[%s2196_s0 + $0x38] sm:$0xff]  ;;  %v53_v5 = vld [vmem:[%s2196_s0 + $0x8] sm:$0xff]  ;;  %v52_v7 = vld [vmem:[%s2196_s0] sm:$0xff] }
   0x3   :  { %v55_v6 = vld [vmem:[%s2196_s0 + $0x18] sm:$0xff]  ;;  %156 = vmatpush1.msra.mxu0 %v57_v2  ;;  %269 = vmatpush1.msra.mxu1 %v59_v4  ;;  %v54_v8 = vld [vmem:[%s2196_s0 + $0x10] sm:$0xff]  ;;  %v1466_v9 = vld [vmem:[%s2197_s1] sm:$0xff] }
   0x4   :  { %157 = vmatprep.subr.mxu0 %v53_v5  ;;  %270 = vmatprep.subr.mxu1 %v55_v6  ;;  %v61_v10 = vld [vmem:[%s2196_s0 + $0x48] sm:$0xff]  ;;  %v1297_v11 = vld [vmem:[%s2196_s0 + $0x80] sm:$0xff]  ;;  %v1296_v12 = vld [vmem:[%s2196_s0 + $0x78] sm:$0xff] }
   0x5   :  { %158 = vmatpush1.msra.mxu0 %v52_v7  ;;  %271 = vmatpush1.msra.mxu1 %v54_v8  ;;  %v1484_v13 = vld [vmem:[%s2197_s1 + $0x8] sm:$0xff]  ;;  %v56_v14 = vld [vmem:[%s2196_s0 + $0x20] sm:$0xff]  ;;  %v1292_v15 = vld [vmem:[%s2196_s0 + $0x58] sm:$0xff] }
   0x6   :  { %1261 = vmatmul.mubr.msk.f32.vlgmr.msra.gmra.mxu0 %vm102_vm0, %v1466_v9  ;;  %1269 = vmatmul.mubr.msk.f32.vlgmr.msra.gmra.mxu1 %vm102_vm0, %v1466_v9  ;;  %v1291_v16 = vld [vmem:[%s2196_s0 + $0x50] sm:$0xff]  ;;  %v1300_v19 = vld [vmem:[%s2196_s0 + $0x98] sm:$0xff]  ;;  %v28_v22 = vld [vmem:[%s2198_s2] sm:$0xff] }
   0x7   :  { %1369 = vmatprep.subr.mxu0 %v61_v10  ;;  %765 = vmatprep.subr.mxu1 %v1297_v11  ;;  %v1506_v17 = vld [vmem:[%s2197_s1 + $0x10] sm:$0xff]  ;;  %v1523_v20 = vld [vmem:[%s2197_s1 + $0x18] sm:$0xff]  ;;  %v1540_v24 = vld [vmem:[%s2197_s1 + $0x20] sm:$0xff] }
   0x8   :  { %1370 = vmatpush3.msra.mxu0 %v61_v10  ;;  %766 = vmatpush1.msra.mxu1 %v1296_v12  ;;  %v1299_v18 = vld [vmem:[%s2196_s0 + $0x90] sm:$0xff]  ;;  %v29_v25 = vld [vmem:[%s2198_s2 + $0x8] sm:$0xff]  ;;  %v31_v26 = vld [vmem:[%s2198_s2 + $0x18] sm:$0xff] }
   0x9   :  { %197 = vmatprep.mubr.f32.mxu0 %v1405_v3  ;;  %310 = vmatprep.mubr.f32.mxu1 %v1405_v3  ;;  %v30_v23 = vld [vmem:[%s2198_s2 + $0x10] sm:$0xff]  ;;  %v1557_v27 = vld [vmem:[%s2197_s1 + $0x28] sm:$0xff]  ;;  %v32_v28 = vld [vmem:[%s2198_s2 + $0x20] sm:$0xff] }
   0xa   :  { %1262 = vmatmul.mubr.msk.f32.gmra.mxu0 %vm102_vm0, %v1484_v13  ;;  %1270 = vmatmul.mubr.msk.f32.gmra.mxu1 %vm102_vm0, %v1484_v13  ;;  %v33_v29 = vld [vmem:[%s2198_s2 + $0x28] sm:$0xff]  ;;  %v1574_v30 = vld [vmem:[%s2197_s1 + $0x30] sm:$0xff]  ;;  %v35_v32 = vld [vmem:[%s2198_s2 + $0x38] sm:$0xff] }
   0xb   :  { %203 = vmatprep.mubr.f32.mxu0 %v1405_v3  ;;  %316 = vmatprep.mubr.f32.mxu1 %v1405_v3  ;;  %v34_v31 = vld [vmem:[%s2198_s2 + $0x30] sm:$0xff]  ;;  %v1591_v33 = vld [vmem:[%s2197_s1 + $0x38] sm:$0xff]  ;;  %v36_v34 = vld [vmem:[%s2199_s3] sm:$0xff] }
   0xc   :  { %1371 = vmatprep.subr.mxu0 %v56_v14  ;;  %767 = vmatprep.subr.mxu1 %v1292_v15  ;;  %v37_v35 = vld [vmem:[%s2199_s3 + $0x8] sm:$0xff]  ;;  %v1295_v38 = vld [vmem:[%s2196_s0 + $0x70] sm:$0xff]  ;;  %v1293_v39 = vld [vmem:[%s2196_s0 + $0x60] sm:$0xff] }
   0xd   :  { %1372 = vmatpush3.msra.mxu0 %v56_v14  ;;  %768 = vmatpush1.msra.mxu1 %v1291_v16  ;;  %v1298_v36 = vld [vmem:[%s2196_s0 + $0x88] sm:$0xff]  ;;  %v38_v40 = vld [vmem:[%s2199_s3 + $0x10] sm:$0xff]  ;;  %v39_v41 = vld [vmem:[%s2199_s3 + $0x18] sm:$0xff] }
   0xe   :  { %1263 = vmatmul.mubr.msk.f32.gmra.mxu0 %vm102_vm0, %v1506_v17  ;;  %1271 = vmatmul.mubr.msk.f32.gmra.mxu1 %vm102_vm0, %v1506_v17  ;;  %v1294_v37 = vld [vmem:[%s2196_s0 + $0x68] sm:$0xff]  ;;  %v40_v42 = vld [vmem:[%s2199_s3 + $0x20] sm:$0xff]  ;;  %v42_v44 = vld [vmem:[%s2199_s3 + $0x30] sm:$0xff] }
   0xf   :  { %209 = vmatprep.mubr.f32.mxu0 %v1405_v3  ;;  %322 = vmatprep.mubr.f32.mxu1 %v1405_v3  ;;  %v41_v43 = vld [vmem:[%s2199_s3 + $0x28] sm:$0xff]  ;;  %v43_v45 = vld [vmem:[%s2199_s3 + $0x38] sm:$0xff]  ;;  %v44_v46 = vld [vmem:[%s2200_s4] sm:$0xff] }
  0x10   :  { %878 = vmatprep.subr.mxu0 %v1299_v18  ;;  %1385 = vmatprep.subr.mxu1 %v1300_v19  ;;  %v45_v47 = vld [vmem:[%s2200_s4 + $0x8] sm:$0xff]  ;;  %v46_v48 = vld [vmem:[%s2200_s4 + $0x10] sm:$0xff]  ;;  %v47_v49 = vld [vmem:[%s2200_s4 + $0x18] sm:$0xff] }
  0x11   :  { %1403 = vset.pattern.permute.xlu0 %v1406_v21  ;;  %1404 = vset.pattern.permute.xlu1 %v1406_v21  ;;  %v48_v50 = vld [vmem:[%s2200_s4 + $0x20] sm:$0xff]  ;;  %v49_v51 = vld [vmem:[%s2200_s4 + $0x28] sm:$0xff]  ;;  %v50_v52 = vld [vmem:[%s2200_s4 + $0x30] sm:$0xff] }
  0x12   :  { %1264 = vmatmul.mubr.msk.f32.gmra.mxu0 %vm102_vm0, %v1523_v20  ;;  %1272 = vmatmul.mubr.msk.f32.gmra.mxu1 %vm102_vm0, %v1523_v20  ;;  %v51_v53 = vld [vmem:[%s2200_s4 + $0x38] sm:$0xff] }
  0x13   :  { %215 = vmatprep.mubr.f32.mxu0 %v1405_v3  ;;  %328 = vmatprep.mubr.f32.mxu1 %v1405_v3 }
  0x14   :  { %64 = vperm.xlu0 %1403, %v28_v22   ;;  %74 = vperm.xlu1 %1404, %v30_v23  }
  0x16   :  { %1265 = vmatmul.mubr.msk.f32.gmra.mxu0 %vm102_vm0, %v1540_v24  ;;  %1273 = vmatmul.mubr.msk.f32.gmra.mxu1 %vm102_vm0, %v1540_v24 }
  0x17   :  { %221 = vmatprep.mubr.f32.mxu0 %v1405_v3  ;;  %334 = vmatprep.mubr.f32.mxu1 %v1405_v3 }
  0x18   :  { %69 = vperm.xlu0 %1403, %v29_v25   ;;  %79 = vperm.xlu1 %1404, %v31_v26  }
  0x1a   :  { %1266 = vmatmul.mubr.msk.f32.gmra.mxu0 %vm102_vm0, %v1557_v27  ;;  %1274 = vmatmul.mubr.msk.f32.gmra.mxu1 %vm102_vm0, %v1557_v27 }
  0x1b   :  { %227 = vmatprep.mubr.f32.mxu0 %v1405_v3  ;;  %340 = vmatprep.mubr.f32.mxu1 %v1405_v3 }
  0x1c   :  { %84 = vperm.xlu0 %1403, %v32_v28   ;;  %89 = vperm.xlu1 %1404, %v33_v29  }
  0x1e   :  { %1267 = vmatmul.mubr.msk.f32.gmra.mxu0 %vm102_vm0, %v1574_v30  ;;  %1275 = vmatmul.mubr.msk.f32.gmra.mxu1 %vm102_vm0, %v1574_v30 }
  0x1f   :  { %233 = vmatprep.mubr.f32.mxu0 %v1405_v3  ;;  %346 = vmatprep.mubr.f32.mxu1 %v1405_v3 }
  0x20   :  { %94 = vperm.xlu0 %1403, %v34_v31   ;;  %99 = vperm.xlu1 %1404, %v35_v32  }
  0x22   :  { %1268 = vmatmul.mubr.msk.f32.gmra.mxu0 %vm102_vm0, %v1591_v33  ;;  %1276 = vmatmul.mubr.msk.f32.gmra.mxu1 %vm102_vm0, %v1591_v33 }
  0x23   :  { %1373 = vmatprep.mubr.msk.f32.mxu0 %vm102_vm0, %v1466_v9  ;;  %801 = vmatprep.mubr.f32.mxu1 %v1405_v3 }
  0x24   :  { %500 = vperm.xlu0 %1403, %v36_v34   ;;  %505 = vperm.xlu1 %1404, %v37_v35  }
  0x26   :  { %1374 = vmatmul.mubr.msk.f32.vlgmr.msra.gmra.mxu0 %vm102_vm0, %v1484_v13  ;;  %1301 = vmatmul.mubr.msk.f32.vlgmr.msra.gmra.mxu1 %vm102_vm0, %v1466_v9 }
  0x27   :  { %879 = vmatpush1.msra.mxu0 %v1298_v36  ;;  %1386 = vmatpush3.msra.mxu1 %v1300_v19 }
  0x28   :  { %1376 = vmatprep.mubr.msk.f32.mxu0 %vm102_vm0, %v1506_v17  ;;  %807 = vmatprep.mubr.f32.mxu1 %v1405_v3 }
  0x29   :  { %880 = vmatprep.subr.mxu0 %v1294_v37  ;;  %1387 = vmatprep.subr.mxu1 %v1295_v38 }
  0x2a   :  { %1377 = vmatmul.mubr.msk.f32.gmra.mxu0 %vm102_vm0, %v1523_v20  ;;  %1302 = vmatmul.mubr.msk.f32.gmra.mxu1 %vm102_vm0, %v1484_v13 }
  0x2b   :  { %1379 = vmatprep.mubr.msk.f32.mxu0 %vm102_vm0, %v1540_v24  ;;  %813 = vmatprep.mubr.f32.mxu1 %v1405_v3 }
  0x2c   :  { %881 = vmatpush1.msra.mxu0 %v1293_v39  ;;  %1388 = vmatpush3.msra.mxu1 %v1295_v38 }
  0x2d   :  { %510 = vperm.xlu0 %1403, %v38_v40   ;;  %515 = vperm.xlu1 %1404, %v39_v41  }
  0x2e   :  { %1380 = vmatmul.mubr.msk.f32.gmra.mxu0 %vm102_vm0, %v1557_v27  ;;  %1303 = vmatmul.mubr.msk.f32.gmra.mxu1 %vm102_vm0, %v1506_v17 }
  0x2f   :  { %1382 = vmatprep.mubr.msk.f32.mxu0 %vm102_vm0, %v1574_v30  ;;  %819 = vmatprep.mubr.f32.mxu1 %v1405_v3 }
  0x31   :  { %520 = vperm.xlu0 %1403, %v40_v42   ;;  %525 = vperm.xlu1 %1404, %v41_v43  }
  0x32   :  { %1383 = vmatmul.mubr.msk.f32.gmra.mxu0 %vm102_vm0, %v1591_v33  ;;  %1304 = vmatmul.mubr.msk.f32.gmra.mxu1 %vm102_vm0, %v1523_v20 }
  0x33   :  { %825 = vmatprep.mubr.f32.mxu1 %v1405_v3  ;;  %914 = vmatprep.mubr.f32.mxu0 %v1405_v3 }
  0x35   :  { %530 = vperm.xlu0 %1403, %v42_v44   ;;  %535 = vperm.xlu1 %1404, %v43_v45  }
  0x36   :  { %1305 = vmatmul.mubr.msk.f32.gmra.mxu1 %vm102_vm0, %v1540_v24  ;;  %1309 = vmatmul.mubr.msk.f32.vlgmr.msra.gmra.mxu0 %vm102_vm0, %v1466_v9 }
  0x37   :  { %831 = vmatprep.mubr.f32.mxu1 %v1405_v3  ;;  %920 = vmatprep.mubr.f32.mxu0 %v1405_v3 }
  0x39   :  { %580 = vperm.xlu0 %1403, %v44_v46   ;;  %585 = vperm.xlu1 %1404, %v45_v47  }
  0x3a   :  { %1306 = vmatmul.mubr.msk.f32.gmra.mxu1 %vm102_vm0, %v1557_v27  ;;  %1310 = vmatmul.mubr.msk.f32.gmra.mxu0 %vm102_vm0, %v1484_v13 }
  0x3b   :  { %837 = vmatprep.mubr.f32.mxu1 %v1405_v3  ;;  %926 = vmatprep.mubr.f32.mxu0 %v1405_v3 }
  0x3d   :  { %590 = vperm.xlu0 %1403, %v46_v48   ;;  %595 = vperm.xlu1 %1404, %v47_v49  }
  0x3e   :  { %1307 = vmatmul.mubr.msk.f32.gmra.mxu1 %vm102_vm0, %v1574_v30  ;;  %1311 = vmatmul.mubr.msk.f32.gmra.mxu0 %vm102_vm0, %v1506_v17 }
  0x3f   :  { %843 = vmatprep.mubr.f32.mxu1 %v1405_v3  ;;  %932 = vmatprep.mubr.f32.mxu0 %v1405_v3 }
  0x41   :  { %600 = vperm.xlu0 %1403, %v48_v50   ;;  %605 = vperm.xlu1 %1404, %v49_v51  }
  0x42   :  { %1308 = vmatmul.mubr.msk.f32.gmra.mxu1 %vm102_vm0, %v1591_v33  ;;  %1312 = vmatmul.mubr.msk.f32.gmra.mxu0 %vm102_vm0, %v1523_v20 }
  0x43   :  { %938 = vmatprep.mubr.f32.mxu0 %v1405_v3  ;;  %1389 = vmatprep.mubr.msk.f32.mxu1 %vm102_vm0, %v1466_v9 }
  0x45   :  { %610 = vperm.xlu0 %1403, %v50_v52   ;;  %615 = vperm.xlu1 %1404, %v51_v53  }
  0x46   :  { %1313 = vmatmul.mubr.msk.f32.gmra.mxu0 %vm102_vm0, %v1540_v24  ;;  %1390 = vmatmul.mubr.msk.f32.vlgmr.msra.gmra.mxu1 %vm102_vm0, %v1484_v13 }
  0x47   :  { %944 = vmatprep.mubr.f32.mxu0 %v1405_v3  ;;  %1392 = vmatprep.mubr.msk.f32.mxu1 %vm102_vm0, %v1506_v17 }
  0x4a   :  { %1314 = vmatmul.mubr.msk.f32.gmra.mxu0 %vm102_vm0, %v1557_v27  ;;  %1393 = vmatmul.mubr.msk.f32.gmra.mxu1 %vm102_vm0, %v1523_v20 }
  0x4b   :  { %950 = vmatprep.mubr.f32.mxu0 %v1405_v3  ;;  %1395 = vmatprep.mubr.msk.f32.mxu1 %vm102_vm0, %v1540_v24 }
  0x4e   :  { %1315 = vmatmul.mubr.msk.f32.gmra.mxu0 %vm102_vm0, %v1574_v30  ;;  %1396 = vmatmul.mubr.msk.f32.gmra.mxu1 %vm102_vm0, %v1557_v27 }
  0x4f   :  { %956 = vmatprep.mubr.f32.mxu0 %v1405_v3  ;;  %1398 = vmatprep.mubr.msk.f32.mxu1 %vm102_vm0, %v1574_v30 }
  0x52   :  { %1316 = vmatmul.mubr.msk.f32.gmra.mxu0 %vm102_vm0, %v1591_v33  ;;  %1399 = vmatmul.mubr.msk.f32.gmra.mxu1 %vm102_vm0, %v1591_v33 }
  0x8f   :  { %v1737_v54 = vpop.permute.xlu0 %64  ;;  %v1739_v55 = vpop.permute.xlu1 %74 }
  0x93   :  { %v1741_v56 = vpop.permute.xlu0 %69  ;;  %v1743_v57 = vpop.permute.xlu1 %79 }
  0x97   :  { %v1745_v58 = vpop.permute.xlu0 %84  ;;  %v1747_v59 = vpop.permute.xlu1 %89 }
  0x9b   :  { %v1749_v60 = vpop.permute.xlu0 %94  ;;  %v1751_v61 = vpop.permute.xlu1 %99 }
  0x9f   :  { %v1753_v62 = vpop.permute.xlu0 %500  ;;  %v1755_v63 = vpop.permute.xlu1 %505 }
  0xa8   :  { %v1757_v0 = vpop.permute.xlu0 %510  ;;  %v1759_v1 = vpop.permute.xlu1 %515 }
  0xac   :  { %v1761_v2 = vpop.permute.xlu0 %520  ;;  %v1763_v3 = vpop.permute.xlu1 %525 }
  0xad   :  { %2217 = vst [vmem:[#allocation2_spill] sm:$0xff] %v1761_v2 }
  0xb0   :  { %v1767_v8 = vpop.permute.xlu0 %530  ;;  %v1771_v19 = vpop.permute.xlu1 %535 }
  0xb1   :  { %2218 = vst [vmem:[#allocation3_spill] sm:$0xff] %v1767_v8 }
  0xb4   :  { %v1779_v28 = vpop.permute.xlu0 %580  ;;  %v1794_v46 = vpop.permute.xlu1 %585 }
  0xb5   :  { %2219 = vst [vmem:[#allocation4_spill] sm:$0xff] %v1779_v28 }
  0xc6   :  { %v193_v4 = vpop.f32.mrf.mxu0  ;;  %v306_v5 = vpop.f32.mrf.mxu1 }
  0xc7   :  { %v194_v6 = vadd.f32 %v193_v4, %v1737_v54  ;;  %v307_v7 = vadd.f32 %v306_v5, %v1737_v54 }
  0xc8   :  { %v195_v9 = vpop.f32.mrf.mxu0  ;;  %v308_v10 = vpop.f32.mrf.mxu1 }
  0xc9   :  { %v458_v11 = vmax.f32 %v194_v6, 0.0  ;;  %v460_v12 = vmax.f32 %v307_v7, 0.0  ;;  %v196_v13 = vadd.f32 %v195_v9, %v1737_v54  ;;  %v309_v14 = vadd.f32 %v308_v10, %v1737_v54 }
  0xca   :  { %v199_v15 = vpop.f32.mrf.mxu0  ;;  %v312_v16 = vpop.f32.mrf.mxu1 }
  0xcb   :  { %v459_v17 = vmax.f32 %v196_v13, 0.0  ;;  %v461_v18 = vmax.f32 %v309_v14, 0.0  ;;  %v538_v20 = vmul.f32 %v1753_v62, %v458_v11  ;;  %v200_v21 = vadd.f32 %v199_v15, %v1741_v56 }
  0xcc   :  { %v313_v22 = vadd.f32 %v312_v16, %v1741_v56  ;;  %v201_v23 = vpop.f32.mrf.mxu0  ;;  %v314_v24 = vpop.f32.mrf.mxu1  ;;  %v540_v25 = vmul.f32 %v1753_v62, %v460_v12 }
  0xcd   :  { %v202_v26 = vadd.f32 %v201_v23, %v1741_v56  ;;  %v315_v27 = vadd.f32 %v314_v24, %v1741_v56  ;;  %v539_v29 = vmul.f32 %v1753_v62, %v459_v17  ;;  %v463_v30 = vmax.f32 %v200_v21, 0.0  ;;  %v1812_v16 = vpop.permute.xlu0 %590 }
  0xce   :  { %v465_v31 = vmax.f32 %v313_v22, 0.0  ;;  %v205_v32 = vpop.f32.mrf.mxu0  ;;  %v318_v33 = vpop.f32.mrf.mxu1  ;;  %v541_v34 = vmul.f32 %v1753_v62, %v461_v18  ;;  %v1784_v37 = vadd.f32 %v1779_v28, %v538_v20  ;;  %v1790_v43 = vadd.f32 %v1779_v28, %v540_v25  ;;  %2220 = vst [vmem:[#allocation5_spill] sm:$0xff] %v1812_v16 }
  0xcf   :  { %v464_v35 = vmax.f32 %v202_v26, 0.0  ;;  %v466_v36 = vmax.f32 %v315_v27, 0.0  ;;  %v206_v38 = vadd.f32 %v205_v32, %v1739_v55  ;;  %v319_v39 = vadd.f32 %v318_v33, %v1739_v55 }
  0xd0   :  { %v207_v40 = vpop.f32.mrf.mxu0  ;;  %v320_v41 = vpop.f32.mrf.mxu1  ;;  %v543_v42 = vmul.f32 %v1755_v63, %v463_v30  ;;  %v545_v47 = vmul.f32 %v1755_v63, %v465_v31  ;;  %v1798_v48 = vadd.f32 %v1779_v28, %v539_v29  ;;  %v1803_v5 = vadd.f32 %v1779_v28, %v541_v34 }
  0xd1   :  { %v208_v44 = vadd.f32 %v207_v40, %v1739_v55  ;;  %v321_v45 = vadd.f32 %v320_v41, %v1739_v55  ;;  %v468_v49 = vmax.f32 %v206_v38, 0.0  ;;  %v470_v50 = vmax.f32 %v319_v39, 0.0  ;;  %v1836_v40 = vpop.permute.xlu1 %595 }
  0xd2   :  { %v211_v51 = vpop.f32.mrf.mxu0  ;;  %v324_v52 = vpop.f32.mrf.mxu1  ;;  %v544_v53 = vmul.f32 %v1755_v63, %v464_v35  ;;  %v546_v4 = vmul.f32 %v1755_v63, %v466_v36  ;;  %v1810_v15 = vadd.f32 %v1794_v46, %v543_v42  ;;  %v1818_v21 = vadd.f32 %v1794_v46, %v545_v47 }
  0xd3   :  { %v469_v6 = vmax.f32 %v208_v44, 0.0  ;;  %v548_v7 = vmul.f32 %v1757_v0, %v468_v49  ;;  %v471_v9 = vmax.f32 %v321_v45, 0.0  ;;  %v212_v10 = vadd.f32 %v211_v51, %v1743_v57 }
  0xd4   :  { %v325_v11 = vadd.f32 %v324_v52, %v1743_v57  ;;  %v213_v12 = vpop.f32.mrf.mxu0  ;;  %v326_v13 = vpop.f32.mrf.mxu1  ;;  %v550_v14 = vmul.f32 %v1757_v0, %v470_v50  ;;  %v1821_v26 = vadd.f32 %v1794_v46, %v544_v53  ;;  %v1824_v27 = vadd.f32 %v1794_v46, %v546_v4 }
  0xd5   :  { %v214_v17 = vadd.f32 %v213_v12, %v1743_v57  ;;  %v327_v18 = vadd.f32 %v326_v13, %v1743_v57  ;;  %v549_v20 = vmul.f32 %v1757_v0, %v469_v6  ;;  %v473_v22 = vmax.f32 %v212_v10, 0.0 }
  0xd6   :  { %v475_v23 = vmax.f32 %v325_v11, 0.0  ;;  %v217_v24 = vpop.f32.mrf.mxu0  ;;  %v330_v25 = vpop.f32.mrf.mxu1  ;;  %v551_v31 = vmul.f32 %v1757_v0, %v471_v9  ;;  %v1828_v32 = vadd.f32 %v1812_v16, %v548_v7  ;;  %v1834_v39 = vadd.f32 %v1812_v16, %v550_v14 }
  0xd7   :  { %v474_v29 = vmax.f32 %v214_v17, 0.0  ;;  %v476_v30 = vmax.f32 %v327_v18, 0.0  ;;  %v218_v33 = vadd.f32 %v217_v24, %v1745_v58  ;;  %v331_v34 = vadd.f32 %v330_v25, %v1745_v58 }
  0xd8   :  { %v219_v35 = vpop.f32.mrf.mxu0  ;;  %v332_v36 = vpop.f32.mrf.mxu1  ;;  %v553_v38 = vmul.f32 %v1759_v1, %v473_v22  ;;  %v555_v44 = vmul.f32 %v1759_v1, %v475_v23  ;;  %v1842_v45 = vadd.f32 %v1812_v16, %v549_v20  ;;  %v1853_v14 = vadd.f32 %v1812_v16, %v551_v31 }
  0xd9   :  { %v220_v41 = vadd.f32 %v219_v35, %v1745_v58  ;;  %v333_v42 = vadd.f32 %v332_v36, %v1745_v58  ;;  %v478_v47 = vmax.f32 %v218_v33, 0.0  ;;  %v480_v49 = vmax.f32 %v331_v34, 0.0  ;;  %v1862_v22 = vpop.permute.xlu0 %600 }
  0xda   :  { %v223_v50 = vpop.f32.mrf.mxu0  ;;  %v336_v51 = vpop.f32.mrf.mxu1  ;;  %v554_v52 = vmul.f32 %v1759_v1, %v474_v29  ;;  %v556_v53 = vmul.f32 %v1759_v1, %v476_v30  ;;  %v1856_v17 = vadd.f32 %v1836_v40, %v553_v38  ;;  %2221 = vst [vmem:[#allocation6_spill] sm:$0xff] %v1862_v22  ;;  %v1865_v23 = vadd.f32 %v1836_v40, %v555_v44 }
  0xdb   :  { %v479_v4 = vmax.f32 %v220_v41, 0.0  ;;  %v481_v6 = vmax.f32 %v333_v42, 0.0  ;;  %v558_v7 = vmul.f32 %v1761_v2, %v478_v47  ;;  %v560_v9 = vmul.f32 %v1761_v2, %v480_v49 }
  0xdc   :  { %v224_v10 = vadd.f32 %v223_v50, %v1747_v59  ;;  %v1850_v11 = vadd.f32 %v336_v51, %v1747_v59  ;;  %v225_v12 = vpop.f32.mrf.mxu0  ;;  %v338_v13 = vpop.f32.mrf.mxu1  ;;  %v1870_v33 = vadd.f32 %v1836_v40, %v554_v52  ;;  %v1873_v34 = vadd.f32 %v1836_v40, %v556_v53 }
  0xdd   :  { %v226_v18 = vadd.f32 %v225_v12, %v1747_v59  ;;  %v1860_v20 = vadd.f32 %v338_v13, %v1747_v59  ;;  %v559_v24 = vmul.f32 %v1761_v2, %v479_v4  ;;  %v561_v25 = vmul.f32 %v1761_v2, %v481_v6  ;;  %v1884_v4 = vpop.permute.xlu0 %610 }
  0xde   :  { %v483_v29 = vmax.f32 %v224_v10, 0.0  ;;  %v229_v30 = vpop.f32.mrf.mxu0  ;;  %v342_v31 = vpop.f32.mrf.mxu1  ;;  %v485_v38 = vmax.f32 %v1850_v11, 0.0  ;;  %v638_v47 = vadd.f32 %v1862_v22, %v558_v7  ;;  %v640_v49 = vadd.f32 %v1862_v22, %v560_v9  ;;  %2222 = vst [vmem:[#allocation7_spill] sm:$0xff] %v1884_v4 }
  0xdf   :  { %v230_v35 = vadd.f32 %v229_v30, %v1749_v60  ;;  %v343_v36 = vadd.f32 %v342_v31, %v1749_v60  ;;  %v484_v41 = vmax.f32 %v226_v18, 0.0  ;;  %v486_v51 = vmax.f32 %v1860_v20, 0.0 }
  0xe0   :  { %v231_v42 = vpop.f32.mrf.mxu0  ;;  %v344_v44 = vpop.f32.mrf.mxu1  ;;  %v1881_v50 = vmul.f32 %v1763_v3, %v483_v29  ;;  %v639_v13 = vadd.f32 %v1862_v22, %v559_v24  ;;  %v641_v7 = vadd.f32 %v1862_v22, %v561_v25 }
  0xe1   :  { %v488_v52 = vmax.f32 %v230_v35, 0.0  ;;  %v490_v53 = vmax.f32 %v343_v36, 0.0  ;;  %v232_v6 = vadd.f32 %v231_v42, %v1749_v60  ;;  %v345_v10 = vadd.f32 %v344_v44, %v1749_v60  ;;  %v1897_v24 = vpop.permute.xlu1 %605 }
  0xe2   :  { %v235_v11 = vpop.f32.mrf.mxu0  ;;  %v348_v12 = vpop.f32.mrf.mxu1  ;;  %v564_v30 = vmul.f32 %v1763_v3, %v484_v41  ;;  %v658_v36 = vmax.f32 %v1784_v37, %v1828_v32  ;;  %v659_v32 = vmax.f32 %v1798_v48, %v1842_v45  ;;  %v661_v48 = vmax.f32 %v1803_v5, %v1853_v14 }
  0xe3   :  { %v568_v9 = vmul.f32 %v1767_v8, %v488_v52  ;;  %v570_v18 = vmul.f32 %v1767_v8, %v490_v53  ;;  %v236_v20 = vadd.f32 %v235_v11, %v1751_v61  ;;  %v349_v29 = vadd.f32 %v348_v12, %v1751_v61 }
  0xe4   :  { %v489_v31 = vmax.f32 %v232_v6, 0.0  ;;  %v491_v35 = vmax.f32 %v345_v10, 0.0  ;;  %v237_v42 = vpop.f32.mrf.mxu0  ;;  %v350_v44 = vpop.f32.mrf.mxu1 }
  0xe5   :  { %v493_v25 = vmax.f32 %v236_v20, 0.0  ;;  %v495_v22 = vmax.f32 %v349_v29, 0.0  ;;  %v648_v52 = vadd.f32 %v1884_v4, %v568_v9  ;;  %v650_v53 = vadd.f32 %v1884_v4, %v570_v18 }
  0xe6   :  { %v569_v11 = vmul.f32 %v1767_v8, %v489_v31  ;;  %v571_v12 = vmul.f32 %v1767_v8, %v491_v35  ;;  %v238_v41 = vadd.f32 %v237_v42, %v1751_v61  ;;  %v351_v6 = vadd.f32 %v350_v44, %v1751_v61  ;;  %v1375_v10 = vpop.f32.mrf.mxu0  ;;  %v803_v37 = vpop.f32.mrf.mxu1 }
  0xe7   :  { %v660_v20 = vmax.f32 %v1790_v43, %v1834_v39  ;;  %v668_v29 = vmax.f32 %v638_v47, %v648_v52  ;;  %v670_v9 = vmax.f32 %v640_v49, %v650_v53  ;;  %v573_v44 = vmul.f32 %v1771_v19, %v493_v25  ;;  %v1916_v43 = vpop.permute.xlu1 %615 }
  0xe8   :  { %v649_v18 = vadd.f32 %v1884_v4, %v569_v11  ;;  %v651_v31 = vadd.f32 %v1884_v4, %v571_v12  ;;  %v494_v16 = vmax.f32 %v238_v41, 0.0  ;;  %v496_v35 = vmax.f32 %v351_v6, 0.0  ;;  %v419_v8 = vpop.f32.mrf.mxu0  ;;  %v805_v42 = vpop.f32.mrf.mxu1  ;;  %2223 = vst [vmem:[#allocation8_spill] sm:$0xff] %v1916_v43 }
  0xe9   :  { %v575_v2 = vmul.f32 %v1771_v19, %v495_v22  ;;  %v425_v45 = vadd.f32 %v1375_v10, %v1741_v56  ;;  %v565_v12 = vmul.f32 %v1763_v3, %v485_v38  ;;  %v566_v25 = vmul.f32 %v1763_v3, %v486_v51 }
  0xea   :  { %v669_v39 = vmax.f32 %v639_v13, %v649_v18  ;;  %v671_v47 = vmax.f32 %v641_v7, %v651_v31  ;;  %v574_v49 = vmul.f32 %v1771_v19, %v494_v16  ;;  %v576_v52 = vmul.f32 %v1771_v19, %v496_v35  ;;  %v1378_v53 = vpop.f32.mrf.mxu0  ;;  %v809_v11 = vpop.f32.mrf.mxu1 }
  0xeb   :  { %v678_v22 = vmax.f32 %v658_v36, %v668_v29  ;;  %v804_v41 = vadd.f32 %v803_v37, %v1737_v54  ;;  %v680_v14 = vmax.f32 %v660_v20, %v670_v9  ;;  %v467_v10 = vmax.f32 %v425_v45, 0.0 }
  0xec   :  { %v679_v5 = vmax.f32 %v659_v32, %v669_v39  ;;  %v681_v6 = vmax.f32 %v661_v48, %v671_v47  ;;  %v429_v4 = vpop.f32.mrf.mxu0  ;;  %v811_v13 = vpop.f32.mrf.mxu1  ;;  %v643_v16 = vadd.f32 %v1897_v24, %v1881_v50  ;;  %v644_v7 = vadd.f32 %v1897_v24, %v564_v30 }
  0xed   :  { %v653_v18 = vadd.f32 %v1916_v43, %v573_v44  ;;  %v654_v38 = vadd.f32 %v1916_v43, %v574_v49  ;;  %v655_v36 = vadd.f32 %v1916_v43, %v575_v2  ;;  %v656_v37 = vadd.f32 %v1916_v43, %v576_v52 }
  0xee   :  { %v1337_v31 = vpack.c.bf16 %v679_v5, %v678_v22  ;;  %v1338_v51 = vpack.c.bf16 %v681_v6, %v680_v14  ;;  %v1381_v32 = vpop.f32.mrf.mxu0  ;;  %v815_v20 = vpop.f32.mrf.mxu1  ;;  %v1068_v29 = vmax.f32 %v804_v41, 0.0  ;;  %v645_v9 = vadd.f32 %v1897_v24, %v565_v12 }
  0xef   :  { %v646_v35 = vadd.f32 %v1897_v24, %v566_v25  ;;  %v663_v50 = vmax.f32 %v1810_v15, %v1856_v17  ;;  %v664_v2 = vmax.f32 %v1821_v26, %v1870_v33  ;;  %v665_v30 = vmax.f32 %v1818_v21, %v1865_v23 }
  0xf0   :  { %720 = vst [vmem:[%s2201_s5] sm:$0xff] %v1337_v31  ;;  %721 = vst [vmem:[%s2201_s5 + $0x8] sm:$0xff] %v1338_v51  ;;  %v673_v44 = vmax.f32 %v643_v16, %v653_v18  ;;  %v674_v48 = vmax.f32 %v644_v7, %v654_v38  ;;  %v439_v45 = vpop.f32.mrf.mxu0  ;;  %v817_v39 = vpop.f32.mrf.mxu1  ;;  %v666_v15 = vmax.f32 %v1824_v27, %v1873_v34 }
  0xf1   :  { %v675_v17 = vmax.f32 %v645_v9, %v655_v36  ;;  %v676_v47 = vmax.f32 %v646_v35, %v656_v37  ;;  %v420_v49 = vadd.f32 %v419_v8, %v1737_v54  ;;  %v806_v25 = vadd.f32 %v805_v42, %v1737_v54 }
  0xf2   :  { %v683_v52 = vmax.f32 %v663_v50, %v673_v44  ;;  %v684_v12 = vmax.f32 %v664_v2, %v674_v48  ;;  %v435_v26 = vadd.f32 %v1378_v53, %v1743_v57  ;;  %v1384_v33 = vpop.f32.mrf.mxu0  ;;  %v821_v22 = vpop.f32.mrf.mxu1  ;;  %v810_v41 = vadd.f32 %v809_v11, %v1741_v56 }
  0xf3   :  { %v685_v21 = vmax.f32 %v665_v30, %v675_v17  ;;  %v686_v23 = vmax.f32 %v666_v15, %v676_v47  ;;  %v462_v14 = vmax.f32 %v420_v49, 0.0  ;;  %v430_v8 = vadd.f32 %v429_v4, %v1739_v55 }
  0xf4   :  { %v1340_v5 = vpack.c.bf16 %v684_v12, %v683_v52  ;;  %v477_v6 = vmax.f32 %v435_v26, 0.0  ;;  %v449_v27 = vpop.f32.mrf.mxu0  ;;  %v823_v34 = vpop.f32.mrf.mxu1  ;;  %v547_v7 = vmul.f32 %v1755_v63, %v467_v10  ;;  %v1108_v42 = vmul.f32 %v1068_v29, %v1753_v62 }
  0xf5   :  { %v1341_v16 = vpack.c.bf16 %v686_v23, %v685_v21  ;;  %v1069_v53 = vmax.f32 %v806_v25, 0.0  ;;  %v445_v18 = vadd.f32 %v1381_v32, %v1747_v59  ;;  %v1073_v31 = vmax.f32 %v810_v41, 0.0 }
  0xf6   :  { %723 = vst [vmem:[%s2201_s5 + $0x14] sm:$0xff] %v1340_v5  ;;  %v827_v11 = vpop.f32.mrf.mxu1  ;;  %v916_v38 = vpop.f32.mrf.mxu0  ;;  %v812_v4 = vadd.f32 %v811_v13, %v1741_v56  ;;  %v816_v10 = vadd.f32 %v815_v20, %v1739_v55  ;;  %v542_v51 = vmul.f32 %v1753_v62, %v462_v14  ;;  %v557_v36 = vmul.f32 %v1759_v1, %v477_v6  ;;  %v2224_v14 = vld [vmem:[#allocation2_spill] sm:$0xff] }
  0xf7   :  { %724 = vst [vmem:[%s2201_s5 + $0x1c] sm:$0xff] %v1341_v16  ;;  %v487_v37 = vmax.f32 %v445_v18, 0.0  ;;  %v472_v35 = vmax.f32 %v430_v8, 0.0  ;;  %v440_v50 = vadd.f32 %v439_v45, %v1745_v58  ;;  %v818_v2 = vadd.f32 %v817_v39, %v1739_v55 }
  0xf8   :  { %v829_v29 = vpop.f32.mrf.mxu1  ;;  %v918_v9 = vpop.f32.mrf.mxu0  ;;  %v1078_v32 = vmax.f32 %v816_v10, 0.0  ;;  %v627_v30 = vadd.f32 %v1794_v46, %v547_v7  ;;  %v1968_v44 = vadd.f32 %v1108_v42, %v1779_v28  ;;  %v1109_v13 = vmul.f32 %v1069_v53, %v1753_v62 }
  0xf9   :  { %v455_v20 = vadd.f32 %v1384_v33, %v1751_v61  ;;  %v1113_v17 = vmul.f32 %v1073_v31, %v1755_v63  ;;  %v1074_v47 = vmax.f32 %v812_v4, 0.0  ;;  %v482_v49 = vmax.f32 %v440_v50, 0.0 }
  0xfa   :  { %v833_v48 = vpop.f32.mrf.mxu1  ;;  %v1972_v15 = vpop.f32.mrf.mxu0  ;;  %v1079_v52 = vmax.f32 %v818_v2, 0.0  ;;  %v637_v45 = vadd.f32 %v1836_v40, %v557_v36  ;;  %v567_v39 = vmul.f32 %v1763_v3, %v487_v37  ;;  %v822_v25 = vadd.f32 %v821_v22, %v1743_v57 }
  0xfb   :  { %v497_v12 = vmax.f32 %v455_v20, 0.0  ;;  %v622_v33 = vadd.f32 %v1779_v28, %v542_v51  ;;  %v552_v23 = vmul.f32 %v1757_v0, %v472_v35  ;;  %v1118_v41 = vmul.f32 %v1078_v32, %v1757_v0  ;;  %v2225_v32 = vld [vmem:[#allocation5_spill] sm:$0xff] }
  0xfc   :  { %v1978_v26 = vpop.f32.mrf.mxu1  ;;  %v1980_v21 = vpop.f32.mrf.mxu0  ;;  %v450_v5 = vadd.f32 %v449_v27, %v1749_v60  ;;  %v562_v6 = vmul.f32 %v2224_v14, %v482_v49  ;;  %v1083_v8 = vmax.f32 %v822_v25, 0.0  ;;  %v824_v7 = vadd.f32 %v823_v34, %v1743_v57  ;;  %v2226_v34 = vld [vmem:[#allocation3_spill] sm:$0xff] }
  0xfd   :  { %v577_v16 = vmul.f32 %v1771_v19, %v497_v12  ;;  %v1114_v53 = vmul.f32 %v1074_v47, %v1755_v63  ;;  %v1119_v18 = vmul.f32 %v1079_v52, %v1757_v0  ;;  %v828_v4 = vadd.f32 %v827_v11, %v1745_v58  ;;  %v2227_v11 = vld [vmem:[#allocation6_spill] sm:$0xff] }
  0xfe   :  { %v839_v22 = vpop.f32.mrf.mxu1  ;;  %v928_v42 = vpop.f32.mrf.mxu0  ;;  %v492_v31 = vmax.f32 %v450_v5, 0.0  ;;  %v667_v10 = vmax.f32 %v627_v30, %v637_v45  ;;  %v647_v51 = vadd.f32 %v1897_v24, %v567_v39  ;;  %v1084_v36 = vmax.f32 %v824_v7, 0.0 }
  0xff   :  { %v657_v27 = vadd.f32 %v1916_v43, %v577_v16  ;;  %v632_v50 = vadd.f32 %v2225_v32, %v552_v23  ;;  %v917_v20 = vadd.f32 %v916_v38, %v1737_v54  ;;  %v830_v47 = vadd.f32 %v829_v29, %v1745_v58  ;;  %v2228_v23 = vld [vmem:[#allocation7_spill] sm:$0xff] }
 0x100   :  { %v841_v37 = vpop.f32.mrf.mxu1  ;;  %v930_v35 = vpop.f32.mrf.mxu0  ;;  %v572_v2 = vmul.f32 %v2226_v34, %v492_v31  ;;  %v1999_v49 = vadd.f32 %v1118_v41, %v2225_v32  ;;  %v642_v30 = vadd.f32 %v2227_v11, %v562_v6  ;;  %v1123_v45 = vmul.f32 %v1083_v8, %v1759_v1 }
 0x101   :  { %v677_v52 = vmax.f32 %v647_v51, %v657_v27  ;;  %v2006_v25 = vadd.f32 %v1119_v18, %v2225_v32  ;;  %v1088_v16 = vmax.f32 %v828_v4, 0.0  ;;  %v919_v38 = vadd.f32 %v918_v9, %v1737_v54 }
 0x102   :  { %v845_v39 = vpop.f32.mrf.mxu1  ;;  %v2003_v12 = vpop.f32.mrf.mxu0  ;;  %v652_v5 = vadd.f32 %v2228_v23, %v572_v2  ;;  %v1124_v41 = vmul.f32 %v1084_v36, %v1759_v1  ;;  %v1070_v7 = vmax.f32 %v917_v20, 0.0  ;;  %v1089_v31 = vmax.f32 %v830_v47, 0.0 }
 0x103   :  { %v687_v29 = vmax.f32 %v667_v10, %v677_v52  ;;  %v2012_v8 = vadd.f32 %v1109_v13, %v1779_v28  ;;  %v2015_v27 = vadd.f32 %v1113_v17, %v1794_v46  ;;  %v662_v18 = vmax.f32 %v622_v33, %v632_v50 }
 0x104   :  { %v847_v6 = vpop.f32.mrf.mxu1  ;;  %v936_v51 = vpop.f32.mrf.mxu0  ;;  %v672_v32 = vmax.f32 %v642_v30, %v652_v5  ;;  %v2018_v4 = vadd.f32 %v1123_v45, %v1836_v40  ;;  %v1071_v9 = vmax.f32 %v919_v38, 0.0  ;;  %v834_v10 = vadd.f32 %v833_v48, %v1747_v59 }
 0x105   :  { %v1342_v43 = vpack.c.bf16 %v687_v29, %v687_v29  ;;  %v2024_v20 = vadd.f32 %v1114_v53, %v1794_v46  ;;  %v2034_v50 = vadd.f32 %v1124_v41, %v1836_v40  ;;  %v1128_v48 = vmul.f32 %v1088_v16, %v2224_v14 }
 0x106   :  { %v940_v36 = vpop.f32.mrf.mxu0  ;;  %v2021_v2 = vpop.f32.mrf.mxu1  ;;  %v682_v33 = vmax.f32 %v662_v18, %v672_v32  ;;  %v1110_v47 = vmul.f32 %v1070_v7, %v1753_v62  ;;  %v1129_v53 = vmul.f32 %v1089_v31, %v2224_v14  ;;  %v1093_v52 = vmax.f32 %v834_v10, 0.0 }
 0x107   :  { %725 = vst [vmem:[%s2201_s5 + $0x24] sm:$0xf] %v1342_v43  ;;  %v923_v45 = vadd.f32 %v1972_v15, %v1741_v56  ;;  %v840_v32 = vadd.f32 %v839_v22, %v1749_v60  ;;  %v1111_v38 = vmul.f32 %v1071_v9, %v1753_v62  ;;  %v836_v16 = vadd.f32 %v1978_v26, %v1747_v59 }
 0x108   :  { %v1339_v30 = vpack.c.bf16 %v682_v33, %v682_v33  ;;  %v942_v5 = vpop.f32.mrf.mxu0  ;;  %v929_v29 = vadd.f32 %v928_v42, %v1739_v55  ;;  %v2048_v41 = vpop.f32.mrf.mxu1  ;;  %v925_v15 = vadd.f32 %v1980_v21, %v1741_v56  ;;  %v842_v7 = vadd.f32 %v841_v37, %v1749_v60 }
 0x109   :  { %v1098_v22 = vmax.f32 %v840_v32, 0.0  ;;  %v931_v31 = vadd.f32 %v930_v35, %v1739_v55  ;;  %v1168_v26 = vadd.f32 %v1128_v48, %v2227_v11  ;;  %v2061_v42 = vadd.f32 %v1110_v47, %v1779_v28 }
 0x10a   :  { %722 = vst [vmem:[%s2201_s5 + $0x10] sm:$0xf] %v1339_v30  ;;  %v1169_v9 = vadd.f32 %v1129_v53, %v2227_v11  ;;  %v1133_v10 = vmul.f32 %v1093_v52, %v1763_v3  ;;  %v1075_v33 = vmax.f32 %v923_v45, 0.0  ;;  %v1099_v30 = vmax.f32 %v842_v7, 0.0  ;;  %v946_v32 = vpop.f32.mrf.mxu0  ;;  %v1394_v48 = vpop.f32.mrf.mxu1 }
 0x10b   :  { %v1138_v21 = vmul.f32 %v1098_v22, %v2226_v34  ;;  %v2067_v37 = vadd.f32 %v1111_v38, %v1779_v28  ;;  %v1094_v35 = vmax.f32 %v836_v16, 0.0  ;;  %v1080_v43 = vmax.f32 %v929_v29, 0.0 }
 0x10c   :  { %v846_v18 = vadd.f32 %v845_v39, %v1751_v61  ;;  %v1076_v17 = vmax.f32 %v925_v15, 0.0  ;;  %v1139_v53 = vmul.f32 %v1099_v30, %v2226_v34  ;;  %v1081_v13 = vmax.f32 %v931_v31, 0.0  ;;  %v948_v7 = vpop.f32.mrf.mxu0 }
 0x10d   :  { %v1178_v47 = vadd.f32 %v1138_v21, %v2228_v23  ;;  %v935_v45 = vadd.f32 %v2003_v12, %v1743_v57  ;;  %v848_v22 = vadd.f32 %v847_v6, %v1751_v61  ;;  %v937_v38 = vadd.f32 %v936_v51, %v1743_v57  ;;  %v1039_v12 = vpop.f32.mrf.mxu1 }
 0x10e   :  { %v1103_v52 = vmax.f32 %v846_v18, 0.0  ;;  %v1173_v16 = vadd.f32 %v1133_v10, %v1897_v24  ;;  %v1115_v29 = vmul.f32 %v1075_v33, %v1755_v63  ;;  %v1179_v15 = vadd.f32 %v1139_v53, %v2228_v23  ;;  %v2229_v33 = vld [vmem:[#allocation8_spill] sm:$0xff] }
 0x10f   :  { %v1198_v39 = vmax.f32 %v1168_v26, %v1178_v47  ;;  %v1134_v21 = vmul.f32 %v1094_v35, %v1763_v3  ;;  %v1120_v31 = vmul.f32 %v1080_v43, %v1757_v0  ;;  %v1104_v30 = vmax.f32 %v848_v22, 0.0 }
 0x110   :  { %v1143_v18 = vmul.f32 %v1103_v52, %v1771_v19  ;;  %v1116_v6 = vmul.f32 %v1076_v17, %v1755_v63  ;;  %v1199_v28 = vmax.f32 %v1169_v9, %v1179_v15  ;;  %v1121_v51 = vmul.f32 %v1081_v13, %v1757_v0 }
 0x111   :  { %v941_v10 = vadd.f32 %v940_v36, %v1745_v58  ;;  %v1085_v47 = vmax.f32 %v935_v45, 0.0  ;;  %v1144_v53 = vmul.f32 %v1104_v30, %v1771_v19  ;;  %v1086_v23 = vmax.f32 %v937_v38, 0.0  ;;  %v952_v36 = vpop.f32.mrf.mxu0  ;;  %v2232_v45 = vld [vmem:[#allocation5_spill] sm:$0xff] }
 0x112   :  { %v1183_v26 = vadd.f32 %v1143_v18, %v2229_v33  ;;  %v2230_v43 = vmax.f32 %v1968_v44, %v1999_v49  ;;  %v2231_v52 = vmax.f32 %v2012_v8, %v2006_v25  ;;  %v1035_v17 = vadd.f32 %v2021_v2, %v1741_v56  ;;  %v1397_v44 = vpop.f32.mrf.mxu1 }
 0x113   :  { %v943_v13 = vadd.f32 %v942_v5, %v1745_v58  ;;  %v1174_v9 = vadd.f32 %v1134_v21, %v1897_v24  ;;  %v2098_v15 = vadd.f32 %v1120_v31, %v2232_v45  ;;  %v1184_v18 = vadd.f32 %v1144_v53, %v2229_v33 }
 0x114   :  { %v1208_v35 = vmax.f32 %v2230_v43, %v1198_v39  ;;  %v1209_v22 = vmax.f32 %v2231_v52, %v1199_v28  ;;  %v1203_v38 = vmax.f32 %v1173_v16, %v1183_v26  ;;  %v2102_v39 = vadd.f32 %v1121_v51, %v2232_v45  ;;  %v954_v51 = vpop.f32.mrf.mxu0  ;;  %v1049_v43 = vpop.f32.mrf.mxu1 }
 0x115   :  { %v1090_v28 = vmax.f32 %v941_v10, 0.0  ;;  %v1077_v25 = vmax.f32 %v1035_v17, 0.0  ;;  %v2105_v56 = vadd.f32 %v1115_v29, %v1794_v46  ;;  %v1125_v8 = vmul.f32 %v1085_v47, %v1759_v1 }
 0x116   :  { %v1343_v49 = vpack.c.bf16 %v1209_v22, %v1208_v35  ;;  %v1204_v2 = vmax.f32 %v1174_v9, %v1184_v18  ;;  %v1091_v5 = vmax.f32 %v943_v13, 0.0  ;;  %v2109_v21 = vadd.f32 %v1116_v6, %v1794_v46  ;;  %v958_v35 = vpop.f32.mrf.mxu0  ;;  %v1400_v17 = vpop.f32.mrf.mxu1 }
 0x117   :  { %v2233_v16 = vmax.f32 %v2015_v27, %v2018_v4  ;;  %v1126_v30 = vmul.f32 %v1086_v23, %v1759_v1  ;;  %v1030_v29 = vadd.f32 %v2048_v41, %v1737_v54  ;;  %v2234_v10 = vmax.f32 %v2024_v20, %v2034_v50 }
 0x118   :  { %1331 = vst [vmem:[%s2201_s5 + $0x28] sm:$0xff] %v1343_v49  ;;  %v947_v6 = vadd.f32 %v946_v32, %v1747_v59  ;;  %v1045_v47 = vadd.f32 %v1394_v48, %v1743_v57  ;;  %v949_v53 = vadd.f32 %v948_v7, %v1747_v59  ;;  %v1190_v27 = vmax.f32 %v2061_v42, %v2098_v15 }
 0x119   :  { %v1213_v31 = vmax.f32 %v2233_v16, %v1203_v38  ;;  %v1214_v26 = vmax.f32 %v2234_v10, %v1204_v2  ;;  %v1191_v23 = vmax.f32 %v2067_v37, %v2102_v39  ;;  %v1130_v54 = vmul.f32 %v1090_v28, %v2224_v14  ;;  %v960_v28 = vpop.f32.mrf.mxu0  ;;  %v2235_v16 = vld [vmem:[#allocation7_spill] sm:$0xff] }
 0x11a   :  { %v1117_v4 = vmul.f32 %v1077_v25, %v1755_v63  ;;  %v2133_v20 = vadd.f32 %v1125_v8, %v1836_v40  ;;  %v1131_v41 = vmul.f32 %v1091_v5, %v2224_v14  ;;  %v1040_v57 = vadd.f32 %v1039_v12, %v1739_v55  ;;  %v1059_v5 = vpop.f32.mrf.mxu1 }
 0x11b   :  { %v1346_v50 = vpack.c.bf16 %v1214_v26, %v1213_v31  ;;  %v1072_v32 = vmax.f32 %v1030_v29, 0.0  ;;  %v1087_v48 = vmax.f32 %v1045_v47, 0.0  ;;  %v953_v7 = vadd.f32 %v952_v36, %v1749_v60 }
 0x11c   :  { %v1055_v42 = vadd.f32 %v1397_v44, %v1747_v59  ;;  %v2143_v63 = vadd.f32 %v1126_v30, %v1836_v40  ;;  %v1095_v37 = vmax.f32 %v947_v6, 0.0  ;;  %v1096_v52 = vmax.f32 %v949_v53, 0.0 }
 0x11d   :  { %1334 = vst [vmem:[%s2201_s5 + $0x3c] sm:$0xff] %v1346_v50  ;;  %v955_v22 = vadd.f32 %v954_v51, %v1749_v60  ;;  %v1170_v55 = vadd.f32 %v1130_v54, %v2227_v11  ;;  %v1157_v12 = vadd.f32 %v1117_v4, %v1794_v46  ;;  %v1100_v13 = vmax.f32 %v953_v7, 0.0 }
 0x11e   :  { %v1097_v36 = vmax.f32 %v1055_v42, 0.0  ;;  %v1171_v59 = vadd.f32 %v1131_v41, %v2227_v11  ;;  %v1082_v9 = vmax.f32 %v1040_v57, 0.0  ;;  %v1050_v38 = vadd.f32 %v1049_v43, %v1745_v58 }
 0x11f   :  { %v1101_v15 = vmax.f32 %v955_v22, 0.0  ;;  %v1112_v18 = vmul.f32 %v1072_v32, %v1753_v62  ;;  %v1127_v44 = vmul.f32 %v1087_v48, %v1759_v1  ;;  %v1140_v49 = vmul.f32 %v1100_v13, %v2226_v34 }
 0x120   :  { %v959_v39 = vadd.f32 %v958_v35, %v1751_v61  ;;  %v1135_v25 = vmul.f32 %v1095_v37, %v1763_v3  ;;  %v1136_v46 = vmul.f32 %v1096_v52, %v1763_v3  ;;  %v1065_v2 = vadd.f32 %v1400_v17, %v1751_v61  ;;  %v2236_v17 = vld [vmem:[#allocation4_spill] sm:$0xff] }
 0x121   :  { %v1141_v8 = vmul.f32 %v1101_v15, %v2226_v34  ;;  %v1180_v58 = vadd.f32 %v1140_v49, %v2235_v16  ;;  %v1137_v62 = vmul.f32 %v1097_v36, %v1763_v3  ;;  %v1092_v31 = vmax.f32 %v1050_v38, 0.0 }
 0x122   :  { %v1105_v1 = vmax.f32 %v959_v39, 0.0  ;;  %v1122_v30 = vmul.f32 %v1082_v9, %v1757_v0  ;;  %v1107_v51 = vmax.f32 %v1065_v2, 0.0  ;;  %v961_v10 = vadd.f32 %v960_v28, %v1751_v61 }
 0x123   :  { %v1181_v29 = vadd.f32 %v1141_v8, %v2235_v16  ;;  %v1167_v26 = vadd.f32 %v1127_v44, %v1836_v40  ;;  %v1200_v6 = vmax.f32 %v1170_v55, %v1180_v58  ;;  %v1060_v53 = vadd.f32 %v1059_v5, %v1749_v60 }
 0x124   :  { %v1145_v47 = vmul.f32 %v1105_v1, %v1771_v19  ;;  %v1175_v43 = vadd.f32 %v1135_v25, %v1897_v24  ;;  %v1147_v3 = vmul.f32 %v1107_v51, %v1771_v19  ;;  %v1106_v4 = vmax.f32 %v961_v10, 0.0 }
 0x125   :  { %v1201_v54 = vmax.f32 %v1171_v59, %v1181_v29  ;;  %v1177_v0 = vadd.f32 %v1137_v62, %v1897_v24  ;;  %v1132_v50 = vmul.f32 %v1092_v31, %v2224_v14  ;;  %v1102_v61 = vmax.f32 %v1060_v53, 0.0 }
 0x126   :  { %v1185_v41 = vadd.f32 %v1145_v47, %v2229_v33  ;;  %v1210_v57 = vmax.f32 %v1190_v27, %v1200_v6  ;;  %v1187_v32 = vadd.f32 %v1147_v3, %v2229_v33  ;;  %v1146_v48 = vmul.f32 %v1106_v4, %v1771_v19 }
 0x127   :  { %v1211_v40 = vmax.f32 %v1191_v23, %v1201_v54  ;;  %v1197_v60 = vmax.f32 %v1157_v12, %v1167_v26  ;;  %v1176_v7 = vadd.f32 %v1136_v46, %v1897_v24  ;;  %v1162_v42 = vadd.f32 %v1122_v30, %v2232_v45 }
 0x128   :  { %v1142_v35 = vmul.f32 %v1102_v61, %v2226_v34  ;;  %v1205_v52 = vmax.f32 %v1175_v43, %v1185_v41  ;;  %v1207_v22 = vmax.f32 %v1177_v0, %v1187_v32  ;;  %v1186_v14 = vadd.f32 %v1146_v48, %v2229_v33 }
 0x129   :  { %v1344_v37 = vpack.c.bf16 %v1211_v40, %v1210_v57  ;;  %v1152_v55 = vadd.f32 %v1112_v18, %v2236_v17  ;;  %v1172_v27 = vadd.f32 %v1132_v50, %v2227_v11  ;;  %v1195_v19 = vmax.f32 %v2105_v56, %v2133_v20 }
 0x12a   :  { %v1182_v23 = vadd.f32 %v1142_v35, %v2235_v16  ;;  %v1196_v24 = vmax.f32 %v2109_v21, %v2143_v63  ;;  %v1217_v34 = vmax.f32 %v1197_v60, %v1207_v22  ;;  %v1206_v45 = vmax.f32 %v1176_v7, %v1186_v14 }
 0x12b   :  { %1332 = vst [vmem:[%s2201_s5 + $0x30] sm:$0xff] %v1344_v37  ;;  %v1192_v12 = vmax.f32 %v1152_v55, %v1162_v42  ;;  %v1215_v13 = vmax.f32 %v1195_v19, %v1205_v52 }
 0x12c   :  { %v1202_v33 = vmax.f32 %v1172_v27, %v1182_v23  ;;  %v1348_v36 = vpack.c.bf16 %v1217_v34, %v1217_v34  ;;  %v1216_v59 = vmax.f32 %v1196_v24, %v1206_v45 }
 0x12e   :  { %v1212_v11 = vmax.f32 %v1192_v12, %v1202_v33  ;;  %1336 = vst [vmem:[%s2201_s5 + $0x4c] sm:$0xf] %v1348_v36  ;;  %v1347_v56 = vpack.c.bf16 %v1216_v59, %v1215_v13 }
 0x130   :  { %v1345_v20 = vpack.c.bf16 %v1212_v11, %v1212_v11  ;;  %1335 = vst [vmem:[%s2201_s5 + $0x44] sm:$0xff] %v1347_v56 }
 0x132   :  { %1333 = vst [vmem:[%s2201_s5 + $0x38] sm:$0xf] %v1345_v20 }

// kernel: cnn_forward.3
= control target key start
LH: loop header
LB: loop body
LE: loop exit
PB: predicated region body
PF: predicated region fallthrough
CT: control target
= control target key end

     0   :  { %v1333_v28 = vlaneseq  ;;  %v9644_v36 = vmov 1966171168   ;;  %s11788_s0 = inlined_call_operand.vmem [shape: bf16[2,10240], index: 0, kind: input, shape index: {}]   ;;  %s11789_s1 = inlined_call_operand.vmem [shape: bf16[10240,8], index: 1, kind: input, shape index: {}]   ;;  %s11790_s2 = inlined_call_operand.vmem [shape: f32[1,8], index: 2, kind: input, shape index: {}]   ;;  %s11791_s3 = inlined_call_operand.vmem [shape: f32[8,2], index: 3, kind: input, shape index: {}]   ;;  %s11792_s4 = inlined_call_operand.vmem [shape: f32[1,2], index: 4, kind: input, shape index: {}]   ;;  %s11793_s5 = inlined_call_operand.hbm [shape: f32[2,2], index: 5, kind: output, shape index: {}]  }
   0x1   :  { %v8972_v0 = vld [vmem:[%s11789_s1 + $0x78] sm:$0xff]   ;;  %v8976_v4 = vld [vmem:[%s11789_s1 + $0x70] sm:$0xff]   ;;  %v8980_v8 = vld [vmem:[%s11789_s1 + $0x68] sm:$0xff]   ;;  %v1331_v37 = vunpack.c.l.s4 %v9644_v36 }
   0x2   :  { %v8973_v1 = vld [vmem:[%s11789_s1 + $0xf8] sm:$0xff]   ;;  %8081 = vmatprep.subr.bf16.mxu0 %v8972_v0  ;;  %v8977_v5 = vld [vmem:[%s11789_s1 + $0xf0] sm:$0xff]   ;;  %v8981_v9 = vld [vmem:[%s11789_s1 + $0xe8] sm:$0xff]   ;;  %v1334_v33 = vshrl.u32 %v1333_v28, 7 }
   0x3   :  { %v8974_v2 = vld [vmem:[%s11789_s1 + $0x38] sm:$0xff]   ;;  %8103 = vmatprep.subr.bf16.mxu1 %v8973_v1  ;;  %v8978_v6 = vld [vmem:[%s11789_s1 + $0x30] sm:$0xff]   ;;  %v8982_v10 = vld [vmem:[%s11789_s1 + $0x28] sm:$0xff]   ;;  %v1332_v40 = vunpack.c.0.s8 %v1331_v37 }
   0x4   :  { %v8975_v3 = vld [vmem:[%s11789_s1 + $0xb8] sm:$0xff]   ;;  %8082 = vmatpush3.bf16.msra.mxu0 %v8974_v2  ;;  %v8979_v7 = vld [vmem:[%s11789_s1 + $0xb0] sm:$0xff]   ;;  %v8983_v11 = vld [vmem:[%s11789_s1 + $0xa8] sm:$0xff]  }
   0x5   :  { %8104 = vmatpush3.bf16.msra.mxu1 %v8975_v3  ;;  %8083 = vmatprep.subr.bf16.mxu0 %v8976_v4  ;;  %v8984_v12 = vld [vmem:[%s11789_s1 + $0x60] sm:$0xff]   ;;  %v8988_v16 = vld [vmem:[%s11789_s1 + $0x58] sm:$0xff]   ;;  %v8992_v20 = vld [vmem:[%s11789_s1 + $0x50] sm:$0xff]   ;;  %v9783_v41 = vsub.s32 %v1332_v40, %v1334_v33 }
   0x6   :  { %8105 = vmatprep.subr.bf16.mxu1 %v8977_v5  ;;  %v8985_v13 = vld [vmem:[%s11789_s1 + $0xe0] sm:$0xff]   ;;  %v8989_v17 = vld [vmem:[%s11789_s1 + $0xd8] sm:$0xff]   ;;  %v8993_v21 = vld [vmem:[%s11789_s1 + $0xd0] sm:$0xff]  }
   0x7   :  { %v8986_v14 = vld [vmem:[%s11789_s1 + $0x20] sm:$0xff]   ;;  %v8990_v18 = vld [vmem:[%s11789_s1 + $0x18] sm:$0xff]   ;;  %v8994_v22 = vld [vmem:[%s11789_s1 + $0x10] sm:$0xff]  }
   0x8   :  { %8084 = vmatpush3.bf16.msra.mxu0 %v8978_v6  ;;  %v8987_v15 = vld [vmem:[%s11789_s1 + $0xa0] sm:$0xff]   ;;  %v8991_v19 = vld [vmem:[%s11789_s1 + $0x98] sm:$0xff]   ;;  %v8995_v23 = vld [vmem:[%s11789_s1 + $0x90] sm:$0xff]  }
   0x9   :  { %8106 = vmatpush3.bf16.msra.mxu1 %v8979_v7  ;;  %8085 = vmatprep.subr.bf16.mxu0 %v8980_v8  ;;  %v8996_v24 = vld [vmem:[%s11789_s1 + $0x48] sm:$0xff]   ;;  %v9000_v29 = vld [vmem:[%s11789_s1 + $0x40] sm:$0xff]   ;;  %v9005_v35 = vld [vmem:[%s11789_s1 + $0x178] sm:$0xff]  }
   0xa   :  { %8107 = vmatprep.subr.bf16.mxu1 %v8981_v9  ;;  %v8997_v25 = vld [vmem:[%s11789_s1 + $0xc8] sm:$0xff]   ;;  %v9001_v30 = vld [vmem:[%s11789_s1 + $0xc0] sm:$0xff]   ;;  %v9006_v38 = vld [vmem:[%s11789_s1 + $0x1f8] sm:$0xff]  }
   0xb   :  { %v8998_v26 = vld [vmem:[%s11789_s1 + $0x8] sm:$0xff]   ;;  %v9002_v31 = vld [vmem:[%s11789_s1] sm:$0xff]   ;;  %v9007_v47 = vld [vmem:[%s11789_s1 + $0x138] sm:$0xff]  }
   0xc   :  { %8086 = vmatpush3.bf16.msra.mxu0 %v8982_v10  ;;  %v8999_v27 = vld [vmem:[%s11789_s1 + $0x88] sm:$0xff]   ;;  %v9003_v32 = vld [vmem:[%s11789_s1 + $0x80] sm:$0xff]   ;;  %v9008_v49 = vld [vmem:[%s11789_s1 + $0x1b8] sm:$0xff]  }
   0xd   :  { %8108 = vmatpush3.bf16.msra.mxu1 %v8983_v11  ;;  %8087 = vmatprep.subr.bf16.mxu0 %v8984_v12  ;;  %v22_v34 = vld [vmem:[%s11788_s0] sm:$0xff]  ;;  %v9009_v52 = vld [vmem:[%s11789_s1 + $0x170] sm:$0xff]   ;;  %v9013_v58 = vld [vmem:[%s11789_s1 + $0x168] sm:$0xff]  }
   0xe   :  { %8109 = vmatprep.subr.bf16.mxu1 %v8985_v13  ;;  %v1329_v39 = vcombine.high %v22_v34, %v22_v34  ;;  %v1336_v42 = vrot.slane %v22_v34, %v9783_v41  ;;  %v9010_v54 = vld [vmem:[%s11789_s1 + $0x1f0] sm:$0xff]   ;;  %v9014_v59 = vld [vmem:[%s11789_s1 + $0x1e8] sm:$0xff]   ;;  %v9017_v62 = vld [vmem:[%s11789_s1 + $0x160] sm:$0xff]  }
   0xf   :  { %v9011_v55 = vld [vmem:[%s11789_s1 + $0x130] sm:$0xff]   ;;  %v9015_v60 = vld [vmem:[%s11789_s1 + $0x128] sm:$0xff]   ;;  %v9018_v63 = vld [vmem:[%s11789_s1 + $0x1e0] sm:$0xff]  }
  0x10   :  { %8088 = vmatpush3.bf16.msra.mxu0 %v8986_v14  ;;  %v9787_v43 = vrot.slane %v1329_v39, %v9783_v41  ;;  %v1344_v44 = vcombine.high %v1336_v42, %v1336_v42  ;;  %v1352_v45 = vrot.slane %v1336_v42, %v9783_v41  ;;  %v9012_v57 = vld [vmem:[%s11789_s1 + $0x1b0] sm:$0xff]   ;;  %v9016_v61 = vld [vmem:[%s11789_s1 + $0x1a8] sm:$0xff]   ;;  %v9019_v0 = vld [vmem:[%s11789_s1 + $0x120] sm:$0xff]  }
  0x11   :  { %8110 = vmatpush3.bf16.msra.mxu1 %v8987_v15  ;;  %8089 = vmatprep.subr.bf16.mxu0 %v8988_v16  ;;  %v9020_v1 = vld [vmem:[%s11789_s1 + $0x1a0] sm:$0xff]   ;;  %v9021_v2 = vld [vmem:[%s11789_s1 + $0x158] sm:$0xff]   ;;  %v9025_v6 = vld [vmem:[%s11789_s1 + $0x150] sm:$0xff]  }
  0x12   :  { %8111 = vmatprep.subr.bf16.mxu1 %v8989_v17  ;;  %v1345_v46 = vcombine.high %v9787_v43, %v9787_v43  ;;  %v1366_v48 = vrot.slane %v1344_v44, %v9783_v41  ;;  %v1374_v51 = vcombine.high %v1352_v45, %v1352_v45  ;;  %v9022_v3 = vld [vmem:[%s11789_s1 + $0x1d8] sm:$0xff]   ;;  %v9026_v7 = vld [vmem:[%s11789_s1 + $0x1d0] sm:$0xff]   ;;  %v9029_v10 = vld [vmem:[%s11789_s1 + $0x148] sm:$0xff]  }
  0x13   :  { %v9023_v4 = vld [vmem:[%s11789_s1 + $0x118] sm:$0xff]   ;;  %v9027_v8 = vld [vmem:[%s11789_s1 + $0x110] sm:$0xff]   ;;  %v9030_v11 = vld [vmem:[%s11789_s1 + $0x1c8] sm:$0xff]  }
  0x14   :  { %8090 = vmatpush3.bf16.msra.mxu0 %v8990_v18  ;;  %v1373_v50 = vrot.slane %v1345_v46, %v9783_v41  ;;  %5771 = vmatprep.mubr.bf16.mxu0 %v1366_v48  ;;  %v1376_v53 = vcombine.high %v1366_v48, %v1366_v48  ;;  %v9024_v5 = vld [vmem:[%s11789_s1 + $0x198] sm:$0xff]   ;;  %v9028_v9 = vld [vmem:[%s11789_s1 + $0x190] sm:$0xff]   ;;  %v9031_v12 = vld [vmem:[%s11789_s1 + $0x108] sm:$0xff]   ;;  %v1359_v18 = vrot.slane %v9787_v43, %v9783_v41 }
  0x15   :  { %8112 = vmatpush3.bf16.msra.mxu1 %v8991_v19  ;;  %8091 = vmatprep.subr.bf16.mxu0 %v8992_v20  ;;  %v9032_v13 = vld [vmem:[%s11789_s1 + $0x188] sm:$0xff]   ;;  %v9033_v14 = vld [vmem:[%s11789_s1 + $0x140] sm:$0xff]   ;;  %v9037_v19 = vld [vmem:[%s11789_s1 + $0x278] sm:$0xff]  }
  0x16   :  { %8113 = vmatprep.subr.bf16.mxu1 %v8993_v21  ;;  %v1377_v56 = vcombine.high %v1373_v50, %v1373_v50  ;;  %5811 = vmatprep.mubr.bf16.mxu1 %v1376_v53  ;;  %v9034_v15 = vld [vmem:[%s11789_s1 + $0x1c0] sm:$0xff]   ;;  %v9038_v20 = vld [vmem:[%s11789_s1 + $0x2f8] sm:$0xff]   ;;  %v9045_v28 = vld [vmem:[%s11789_s1 + $0x268] sm:$0xff]  }
  0x17   :  { %v9035_v16 = vld [vmem:[%s11789_s1 + $0x100] sm:$0xff]   ;;  %v9039_v21 = vld [vmem:[%s11789_s1 + $0x238] sm:$0xff]   ;;  %v9057_v40 = vld [vmem:[%s11789_s1 + $0x250] sm:$0xff]  }
  0x18   :  { %8092 = vmatpush3.bf16.msra.mxu0 %v8994_v22  ;;  %v9036_v17 = vld [vmem:[%s11789_s1 + $0x180] sm:$0xff]   ;;  %v9040_v22 = vld [vmem:[%s11789_s1 + $0x2b8] sm:$0xff]   ;;  %v9058_v42 = vld [vmem:[%s11789_s1 + $0x2d0] sm:$0xff]  }
  0x19   :  { %8114 = vmatpush3.bf16.msra.mxu1 %v8995_v23  ;;  %8093 = vmatprep.subr.bf16.mxu0 %v8996_v24  ;;  %v1375_v23 = vcombine.high %v1359_v18, %v1359_v18  ;;  %v9041_v24 = vld [vmem:[%s11789_s1 + $0x270] sm:$0xff]   ;;  %v9050_v33 = vld [vmem:[%s11789_s1 + $0x2e0] sm:$0xff]   ;;  %v9053_v36 = vld [vmem:[%s11789_s1 + $0x258] sm:$0xff]  }
  0x1a   :  { %8115 = vmatprep.subr.bf16.mxu1 %v8997_v25  ;;  %v9042_v25 = vld [vmem:[%s11789_s1 + $0x2f0] sm:$0xff]   ;;  %v9051_v34 = vld [vmem:[%s11789_s1 + $0x220] sm:$0xff]   ;;  %v9054_v37 = vld [vmem:[%s11789_s1 + $0x2d8] sm:$0xff]  }
  0x1b   :  { %v9056_v39 = vld [vmem:[%s11789_s1 + $0x298] sm:$0xff]   ;;  %v9059_v43 = vld [vmem:[%s11789_s1 + $0x210] sm:$0xff]   ;;  %v23_v46 = vld [vmem:[%s11788_s0 + $0x8] sm:$0xff] }
  0x1c   :  { %8094 = vmatpush3.bf16.msra.mxu0 %v8998_v26  ;;  %v9043_v26 = vld [vmem:[%s11789_s1 + $0x230] sm:$0xff]   ;;  %v1385_v48 = vrot.slane %v23_v46, %v9783_v41 }
  0x1d   :  { %8116 = vmatpush3.bf16.msra.mxu1 %v8999_v27  ;;  %8095 = vmatprep.subr.bf16.mxu0 %v9000_v29  ;;  %v9044_v27 = vld [vmem:[%s11789_s1 + $0x2b0] sm:$0xff]   ;;  %v9046_v29 = vld [vmem:[%s11789_s1 + $0x2e8] sm:$0xff]  }
  0x1e   :  { %8117 = vmatprep.subr.bf16.mxu1 %v9001_v30  ;;  %v9047_v30 = vld [vmem:[%s11789_s1 + $0x228] sm:$0xff]   ;;  %v9060_v44 = vld [vmem:[%s11789_s1 + $0x290] sm:$0xff]  }
  0x20   :  { %8096 = vmatpush3.bf16.msra.mxu0 %v9002_v31  ;;  %v9048_v31 = vld [vmem:[%s11789_s1 + $0x2a8] sm:$0xff]  }
  0x21   :  { %8118 = vmatpush3.bf16.msra.mxu1 %v9003_v32  ;;  %8125 = vmatprep.subr.bf16.mxu0 %v9005_v35  ;;  %v9049_v32 = vld [vmem:[%s11789_s1 + $0x260] sm:$0xff]  }
  0x22   :  { %8147 = vmatprep.subr.bf16.mxu1 %v9006_v38  ;;  %v9052_v35 = vld [vmem:[%s11789_s1 + $0x2a0] sm:$0xff]   ;;  %v9055_v38 = vld [vmem:[%s11789_s1 + $0x218] sm:$0xff]  }
  0x23   :  { %5772 = vmatmul.mubr.bf16.vlgmr.msra.gmra.mxu0 %v1352_v45  ;;  %v9061_v45 = vld [vmem:[%s11789_s1 + $0x248] sm:$0xff]  }
  0x24   :  { %8126 = vmatpush3.bf16.msra.mxu0 %v9007_v47  ;;  %5812 = vmatmul.mubr.bf16.vlgmr.msra.gmra.mxu1 %v1374_v51  ;;  %v9062_v47 = vld [vmem:[%s11789_s1 + $0x2c8] sm:$0xff]  }
  0x25   :  { %8127 = vmatprep.subr.bf16.mxu0 %v9009_v52  ;;  %8148 = vmatpush3.bf16.msra.mxu1 %v9008_v49  ;;  %v1378_v49 = vcombine.high %v23_v46, %v23_v46  ;;  %v9064_v51 = vld [vmem:[%s11789_s1 + $0x288] sm:$0xff]   ;;  %v1393_v52 = vcombine.high %v1385_v48, %v1385_v48 }
  0x26   :  { %5851 = vmatprep.mubr.bf16.mxu0 %v1373_v50  ;;  %8149 = vmatprep.subr.bf16.mxu1 %v9010_v54  ;;  %v9063_v50 = vld [vmem:[%s11789_s1 + $0x208] sm:$0xff]   ;;  %v9065_v54 = vld [vmem:[%s11789_s1 + $0x240] sm:$0xff]  }
  0x27   :  { %5891 = vmatprep.mubr.bf16.mxu1 %v1377_v56  ;;  %v9975_v53 = vrot.slane %v1378_v49, %v9783_v41  ;;  %v1415_v56 = vrot.slane %v1393_v52, %v9783_v41  ;;  %v9112_v46 = vld [vmem:[%s11789_s1 + $0x428] sm:$0xff]   ;;  %v9115_v49 = vld [vmem:[%s11789_s1 + $0x4e0] sm:$0xff]   ;;  %v9118_v52 = vld [vmem:[%s11789_s1 + $0x458] sm:$0xff]  }
  0x28   :  { %8128 = vmatpush3.bf16.msra.mxu0 %v9011_v55  ;;  %v9066_v55 = vld [vmem:[%s11789_s1 + $0x2c0] sm:$0xff]  }
  0x29   :  { %8129 = vmatprep.subr.bf16.mxu0 %v9013_v58  ;;  %8150 = vmatpush3.bf16.msra.mxu1 %v9012_v57  ;;  %v1394_v57 = vcombine.high %v9975_v53, %v9975_v53  ;;  %v9067_v58 = vld [vmem:[%s11789_s1 + $0x200] sm:$0xff]  }
  0x2a   :  { %8151 = vmatprep.subr.bf16.mxu1 %v9014_v59  ;;  %v9068_v59 = vld [vmem:[%s11789_s1 + $0x280] sm:$0xff]  }
  0x2c   :  { %8130 = vmatpush3.bf16.msra.mxu0 %v9015_v60  ;;  %v1425_v60 = vcombine.high %v1415_v56, %v1415_v56 }
  0x2d   :  { %8131 = vmatprep.subr.bf16.mxu0 %v9017_v62  ;;  %8152 = vmatpush3.bf16.msra.mxu1 %v9016_v61  ;;  %v1401_v61 = vrot.slane %v1385_v48, %v9783_v41  ;;  %v9069_v62 = vld [vmem:[%s11789_s1 + $0x378] sm:$0xff]   ;;  %v9114_v48 = vld [vmem:[%s11789_s1 + $0x460] sm:$0xff]  }
  0x2e   :  { %8153 = vmatprep.subr.bf16.mxu1 %v9018_v63  ;;  %v9070_v63 = vld [vmem:[%s11789_s1 + $0x3f8] sm:$0xff]  }
  0x30   :  { %8132 = vmatpush3.bf16.msra.mxu0 %v9019_v0  ;;  %v1422_v0 = vrot.slane %v1394_v57, %v9783_v41  ;;  %v9123_v57 = vld [vmem:[%s11789_s1 + $0x4d0] sm:$0xff]  }
  0x31   :  { %8133 = vmatprep.subr.bf16.mxu0 %v9021_v2  ;;  %8154 = vmatpush3.bf16.msra.mxu1 %v9020_v1  ;;  %v9071_v1 = vld [vmem:[%s11789_s1 + $0x338] sm:$0xff]  }
  0x32   :  { %8155 = vmatprep.subr.bf16.mxu1 %v9022_v3  ;;  %v9072_v2 = vld [vmem:[%s11789_s1 + $0x3b8] sm:$0xff]   ;;  %v1423_v3 = vcombine.high %v1401_v61, %v1401_v61 }
  0x34   :  { %8134 = vmatpush3.bf16.msra.mxu0 %v9023_v4  ;;  %v9073_v4 = vld [vmem:[%s11789_s1 + $0x370] sm:$0xff]  }
  0x35   :  { %8135 = vmatprep.subr.bf16.mxu0 %v9025_v6  ;;  %8156 = vmatpush3.bf16.msra.mxu1 %v9024_v5  ;;  %v9074_v5 = vld [vmem:[%s11789_s1 + $0x3f0] sm:$0xff]   ;;  %v1426_v6 = vcombine.high %v1422_v0, %v1422_v0 }
  0x36   :  { %8157 = vmatprep.subr.bf16.mxu1 %v9026_v7  ;;  %v9075_v7 = vld [vmem:[%s11789_s1 + $0x330] sm:$0xff]  }
  0x38   :  { %8136 = vmatpush3.bf16.msra.mxu0 %v9027_v8  ;;  %v9076_v8 = vld [vmem:[%s11789_s1 + $0x3b0] sm:$0xff]  }
  0x39   :  { %8137 = vmatprep.subr.bf16.mxu0 %v9029_v10  ;;  %8158 = vmatpush3.bf16.msra.mxu1 %v9028_v9  ;;  %v9077_v9 = vld [vmem:[%s11789_s1 + $0x368] sm:$0xff]  }
  0x3a   :  { %8159 = vmatprep.subr.bf16.mxu1 %v9030_v11  ;;  %v9078_v10 = vld [vmem:[%s11789_s1 + $0x3e8] sm:$0xff]  }
  0x3b   :  { %v9079_v11 = vld [vmem:[%s11789_s1 + $0x328] sm:$0xff]  }
  0x3c   :  { %8138 = vmatpush3.bf16.msra.mxu0 %v9031_v12  ;;  %v9080_v12 = vld [vmem:[%s11789_s1 + $0x3a8] sm:$0xff]  }
  0x3d   :  { %8139 = vmatprep.subr.bf16.mxu0 %v9033_v14  ;;  %8160 = vmatpush3.bf16.msra.mxu1 %v9032_v13  ;;  %v9081_v13 = vld [vmem:[%s11789_s1 + $0x360] sm:$0xff]  }
  0x3e   :  { %8161 = vmatprep.subr.bf16.mxu1 %v9034_v15  ;;  %v9082_v14 = vld [vmem:[%s11789_s1 + $0x3e0] sm:$0xff]  }
  0x3f   :  { %v9083_v15 = vld [vmem:[%s11789_s1 + $0x320] sm:$0xff]  }
  0x40   :  { %8140 = vmatpush3.bf16.msra.mxu0 %v9035_v16  ;;  %v9084_v16 = vld [vmem:[%s11789_s1 + $0x3a0] sm:$0xff]  }
  0x41   :  { %8169 = vmatprep.subr.bf16.mxu0 %v9037_v19  ;;  %8162 = vmatpush3.bf16.msra.mxu1 %v9036_v17  ;;  %v9085_v17 = vld [vmem:[%s11789_s1 + $0x358] sm:$0xff]  }
  0x42   :  { %8191 = vmatprep.subr.bf16.mxu1 %v9038_v20  ;;  %v9087_v19 = vld [vmem:[%s11789_s1 + $0x318] sm:$0xff]  }
  0x43   :  { %5852 = vmatmul.mubr.bf16.vlgmr.msra.gmra.mxu0 %v1359_v18  ;;  %v9086_v18 = vld [vmem:[%s11789_s1 + $0x3d8] sm:$0xff]  }
  0x44   :  { %8170 = vmatpush3.bf16.msra.mxu0 %v9039_v21  ;;  %5892 = vmatmul.mubr.bf16.vlgmr.msra.gmra.mxu1 %v1375_v23  ;;  %v9088_v20 = vld [vmem:[%s11789_s1 + $0x398] sm:$0xff]   ;;  %v9089_v21 = vld [vmem:[%s11789_s1 + $0x350] sm:$0xff]  }
  0x45   :  { %8171 = vmatprep.subr.bf16.mxu0 %v9041_v24  ;;  %8192 = vmatpush3.bf16.msra.mxu1 %v9040_v22  ;;  %v9090_v22 = vld [vmem:[%s11789_s1 + $0x3d0] sm:$0xff]  }
  0x46   :  { %8193 = vmatprep.subr.bf16.mxu1 %v9042_v25  ;;  %5931 = vmatprep.mubr.bf16.mxu0 %v1415_v56  ;;  %v9091_v23 = vld [vmem:[%s11789_s1 + $0x310] sm:$0xff]   ;;  %v9093_v25 = vld [vmem:[%s11789_s1 + $0x348] sm:$0xff]  }
  0x47   :  { %5971 = vmatprep.mubr.bf16.mxu1 %v1425_v60  ;;  %v9092_v24 = vld [vmem:[%s11789_s1 + $0x390] sm:$0xff]   ;;  %v9126_v60 = vld [vmem:[%s11789_s1 + $0x448] sm:$0xff]  }
  0x48   :  { %8172 = vmatpush3.bf16.msra.mxu0 %v9043_v26  ;;  %v9094_v26 = vld [vmem:[%s11789_s1 + $0x3c8] sm:$0xff]   ;;  %v9122_v56 = vld [vmem:[%s11789_s1 + $0x450] sm:$0xff]  }
  0x49   :  { %8173 = vmatprep.subr.bf16.mxu0 %v9045_v28  ;;  %8194 = vmatpush3.bf16.msra.mxu1 %v9044_v27  ;;  %v9095_v27 = vld [vmem:[%s11789_s1 + $0x308] sm:$0xff]  }
  0x4a   :  { %8195 = vmatprep.subr.bf16.mxu1 %v9046_v29  ;;  %v9096_v28 = vld [vmem:[%s11789_s1 + $0x388] sm:$0xff]   ;;  %v9097_v29 = vld [vmem:[%s11789_s1 + $0x340] sm:$0xff]  }
  0x4c   :  { %8174 = vmatpush3.bf16.msra.mxu0 %v9047_v30  ;;  %v9098_v30 = vld [vmem:[%s11789_s1 + $0x3c0] sm:$0xff]  }
  0x4d   :  { %8175 = vmatprep.subr.bf16.mxu0 %v9049_v32  ;;  %8196 = vmatpush3.bf16.msra.mxu1 %v9048_v31  ;;  %v9099_v31 = vld [vmem:[%s11789_s1 + $0x300] sm:$0xff]  }
  0x4e   :  { %8197 = vmatprep.subr.bf16.mxu1 %v9050_v33  ;;  %v9100_v32 = vld [vmem:[%s11789_s1 + $0x380] sm:$0xff]   ;;  %v1408_v33 = vrot.slane %v9975_v53, %v9783_v41  ;;  %v9119_v53 = vld [vmem:[%s11789_s1 + $0x4d8] sm:$0xff]  }
  0x50   :  { %8176 = vmatpush3.bf16.msra.mxu0 %v9051_v34  ;;  %v9102_v34 = vld [vmem:[%s11789_s1 + $0x478] sm:$0xff]  }
  0x51   :  { %8177 = vmatprep.subr.bf16.mxu0 %v9053_v36  ;;  %8198 = vmatpush3.bf16.msra.mxu1 %v9052_v35  ;;  %v9103_v35 = vld [vmem:[%s11789_s1 + $0x4f8] sm:$0xff]  }
  0x52   :  { %8199 = vmatprep.subr.bf16.mxu1 %v9054_v37  ;;  %v9104_v36 = vld [vmem:[%s11789_s1 + $0x438] sm:$0xff]  }
  0x53   :  { %v9105_v37 = vld [vmem:[%s11789_s1 + $0x4b8] sm:$0xff]  }
  0x54   :  { %8178 = vmatpush3.bf16.msra.mxu0 %v9055_v38  ;;  %v1424_v38 = vcombine.high %v1408_v33, %v1408_v33 }
  0x55   :  { %8179 = vmatprep.subr.bf16.mxu0 %v9057_v40  ;;  %8200 = vmatpush3.bf16.msra.mxu1 %v9056_v39  ;;  %v9106_v39 = vld [vmem:[%s11789_s1 + $0x470] sm:$0xff]  }
  0x56   :  { %8201 = vmatprep.subr.bf16.mxu1 %v9058_v42  ;;  %v9107_v40 = vld [vmem:[%s11789_s1 + $0x4f0] sm:$0xff]  }
  0x57   :  { %v9108_v42 = vld [vmem:[%s11789_s1 + $0x430] sm:$0xff]  }
  0x58   :  { %8180 = vmatpush3.bf16.msra.mxu0 %v9059_v43  ;;  %v9109_v43 = vld [vmem:[%s11789_s1 + $0x4b0] sm:$0xff]  }
  0x59   :  { %8181 = vmatprep.subr.bf16.mxu0 %v9061_v45  ;;  %8202 = vmatpush3.bf16.msra.mxu1 %v9060_v44  ;;  %v9110_v44 = vld [vmem:[%s11789_s1 + $0x468] sm:$0xff]  }
  0x5a   :  { %8203 = vmatprep.subr.bf16.mxu1 %v9062_v47  ;;  %v9111_v45 = vld [vmem:[%s11789_s1 + $0x4e8] sm:$0xff]  }
  0x5b   :  { %v9113_v47 = vld [vmem:[%s11789_s1 + $0x4a8] sm:$0xff]  }
  0x5c   :  { %8182 = vmatpush3.bf16.msra.mxu0 %v9063_v50  ;;  %v9116_v50 = vld [vmem:[%s11789_s1 + $0x420] sm:$0xff]  }
  0x5d   :  { %8183 = vmatprep.subr.bf16.mxu0 %v9065_v54  ;;  %8204 = vmatpush3.bf16.msra.mxu1 %v9064_v51  ;;  %v9117_v51 = vld [vmem:[%s11789_s1 + $0x4a0] sm:$0xff]   ;;  %v9120_v54 = vld [vmem:[%s11789_s1 + $0x418] sm:$0xff]  }
  0x5e   :  { %8205 = vmatprep.subr.bf16.mxu1 %v9066_v55  ;;  %v9121_v55 = vld [vmem:[%s11789_s1 + $0x498] sm:$0xff]  }
  0x60   :  { %8184 = vmatpush3.bf16.msra.mxu0 %v9067_v58  ;;  %v9124_v58 = vld [vmem:[%s11789_s1 + $0x410] sm:$0xff]  }
  0x61   :  { %8213 = vmatprep.subr.bf16.mxu0 %v9069_v62  ;;  %8206 = vmatpush3.bf16.msra.mxu1 %v9068_v59  ;;  %v9125_v59 = vld [vmem:[%s11789_s1 + $0x490] sm:$0xff]   ;;  %v9127_v62 = vld [vmem:[%s11789_s1 + $0x4c8] sm:$0xff]  }
  0x62   :  { %8235 = vmatprep.subr.bf16.mxu1 %v9070_v63 }
  0x63   :  { %5932 = vmatmul.mubr.bf16.vlgmr.msra.gmra.mxu0 %v1401_v61  ;;  %v24_v61 = vld [vmem:[%s11788_s0 + $0x10] sm:$0xff] }
  0x64   :  { %8214 = vmatpush3.bf16.msra.mxu0 %v9071_v1  ;;  %6011 = vmatprep.mubr.bf16.mxu0 %v1422_v0  ;;  %v1434_v63 = vrot.slane %v24_v61, %v9783_v41  ;;  %v1427_v0 = vcombine.high %v24_v61, %v24_v61  ;;  %v9128_v1 = vld [vmem:[%s11789_s1 + $0x408] sm:$0xff]  }
  0x65   :  { %5972 = vmatmul.mubr.bf16.vlgmr.msra.gmra.mxu1 %v1423_v3  ;;  %8215 = vmatprep.subr.bf16.mxu0 %v9073_v4  ;;  %v9177_v61 = vld [vmem:[%s11789_s1 + $0x628] sm:$0xff]  }
  0x66   :  { %8236 = vmatpush3.bf16.msra.mxu1 %v9072_v2  ;;  %6051 = vmatprep.mubr.bf16.mxu1 %v1426_v6  ;;  %v9129_v2 = vld [vmem:[%s11789_s1 + $0x488] sm:$0xff]   ;;  %v1442_v3 = vcombine.high %v1434_v63, %v1434_v63  ;;  %v10181_v4 = vrot.slane %v1427_v0, %v9783_v41  ;;  %v9131_v6 = vld [vmem:[%s11789_s1 + $0x4c0] sm:$0xff]  }
  0x67   :  { %8237 = vmatprep.subr.bf16.mxu1 %v9074_v5  ;;  %v9130_v5 = vld [vmem:[%s11789_s1 + $0x440] sm:$0xff]  }
  0x68   :  { %8216 = vmatpush3.bf16.msra.mxu0 %v9075_v7  ;;  %v1464_v7 = vrot.slane %v1442_v3, %v9783_v41  ;;  %v9180_v0 = vld [vmem:[%s11789_s1 + $0x6e0] sm:$0xff]   ;;  %v9183_v3 = vld [vmem:[%s11789_s1 + $0x658] sm:$0xff]  }
  0x69   :  { %8217 = vmatprep.subr.bf16.mxu0 %v9077_v9  ;;  %v9132_v9 = vld [vmem:[%s11789_s1 + $0x400] sm:$0xff]  }
  0x6a   :  { %8238 = vmatpush3.bf16.msra.mxu1 %v9076_v8  ;;  %v1443_v8 = vcombine.high %v10181_v4, %v10181_v4 }
  0x6b   :  { %8239 = vmatprep.subr.bf16.mxu1 %v9078_v10  ;;  %v9133_v10 = vld [vmem:[%s11789_s1 + $0x480] sm:$0xff]  }
  0x6c   :  { %8218 = vmatpush3.bf16.msra.mxu0 %v9079_v11  ;;  %v1474_v11 = vcombine.high %v1464_v7, %v1464_v7 }
  0x6d   :  { %8219 = vmatprep.subr.bf16.mxu0 %v9081_v13  ;;  %v9134_v13 = vld [vmem:[%s11789_s1 + $0x578] sm:$0xff]  }
  0x6e   :  { %8240 = vmatpush3.bf16.msra.mxu1 %v9080_v12  ;;  %v1450_v12 = vrot.slane %v1434_v63, %v9783_v41  ;;  %v9179_v63 = vld [vmem:[%s11789_s1 + $0x660] sm:$0xff]  }
  0x6f   :  { %8241 = vmatprep.subr.bf16.mxu1 %v9082_v14  ;;  %v9135_v14 = vld [vmem:[%s11789_s1 + $0x5f8] sm:$0xff]  }
  0x70   :  { %8220 = vmatpush3.bf16.msra.mxu0 %v9083_v15  ;;  %v1471_v15 = vrot.slane %v1443_v8, %v9783_v41  ;;  %v9188_v8 = vld [vmem:[%s11789_s1 + $0x6d0] sm:$0xff]  }
  0x71   :  { %8221 = vmatprep.subr.bf16.mxu0 %v9085_v17  ;;  %v9137_v17 = vld [vmem:[%s11789_s1 + $0x5b8] sm:$0xff]  }
  0x72   :  { %8242 = vmatpush3.bf16.msra.mxu1 %v9084_v16  ;;  %v9136_v16 = vld [vmem:[%s11789_s1 + $0x538] sm:$0xff]  }
  0x73   :  { %8243 = vmatprep.subr.bf16.mxu1 %v9086_v18  ;;  %v1472_v18 = vcombine.high %v1450_v12, %v1450_v12 }
  0x74   :  { %8222 = vmatpush3.bf16.msra.mxu0 %v9087_v19  ;;  %v9138_v19 = vld [vmem:[%s11789_s1 + $0x570] sm:$0xff]  }
  0x75   :  { %8223 = vmatprep.subr.bf16.mxu0 %v9089_v21  ;;  %v1475_v21 = vcombine.high %v1471_v15, %v1471_v15 }
  0x76   :  { %8244 = vmatpush3.bf16.msra.mxu1 %v9088_v20  ;;  %v9139_v20 = vld [vmem:[%s11789_s1 + $0x5f0] sm:$0xff]  }
  0x77   :  { %8245 = vmatprep.subr.bf16.mxu1 %v9090_v22  ;;  %v9140_v22 = vld [vmem:[%s11789_s1 + $0x530] sm:$0xff]  }
  0x78   :  { %8224 = vmatpush3.bf16.msra.mxu0 %v9091_v23  ;;  %v9141_v23 = vld [vmem:[%s11789_s1 + $0x5b0] sm:$0xff]  }
  0x79   :  { %8225 = vmatprep.subr.bf16.mxu0 %v9093_v25  ;;  %v9143_v25 = vld [vmem:[%s11789_s1 + $0x5e8] sm:$0xff]  }
  0x7a   :  { %8246 = vmatpush3.bf16.msra.mxu1 %v9092_v24  ;;  %v9142_v24 = vld [vmem:[%s11789_s1 + $0x568] sm:$0xff]  }
  0x7b   :  { %8247 = vmatprep.subr.bf16.mxu1 %v9094_v26  ;;  %v9144_v26 = vld [vmem:[%s11789_s1 + $0x528] sm:$0xff]  }
  0x7c   :  { %8226 = vmatpush3.bf16.msra.mxu0 %v9095_v27  ;;  %v9145_v27 = vld [vmem:[%s11789_s1 + $0x5a8] sm:$0xff]  }
  0x7d   :  { %8227 = vmatprep.subr.bf16.mxu0 %v9097_v29  ;;  %v9147_v29 = vld [vmem:[%s11789_s1 + $0x5e0] sm:$0xff]  }
  0x7e   :  { %8248 = vmatpush3.bf16.msra.mxu1 %v9096_v28  ;;  %v9146_v28 = vld [vmem:[%s11789_s1 + $0x560] sm:$0xff]  }
  0x7f   :  { %8249 = vmatprep.subr.bf16.mxu1 %v9098_v30  ;;  %v9148_v30 = vld [vmem:[%s11789_s1 + $0x520] sm:$0xff]  }
  0x80   :  { %8228 = vmatpush3.bf16.msra.mxu0 %v9099_v31  ;;  %v9149_v31 = vld [vmem:[%s11789_s1 + $0x5a0] sm:$0xff]  }
  0x81   :  { %8257 = vmatprep.subr.bf16.mxu0 %v9102_v34  ;;  %v9152_v34 = vld [vmem:[%s11789_s1 + $0x518] sm:$0xff]  }
  0x82   :  { %8250 = vmatpush3.bf16.msra.mxu1 %v9100_v32  ;;  %v9150_v32 = vld [vmem:[%s11789_s1 + $0x558] sm:$0xff]  }
  0x83   :  { %6012 = vmatmul.mubr.bf16.vlgmr.msra.gmra.mxu0 %v1408_v33  ;;  %8279 = vmatprep.subr.bf16.mxu1 %v9103_v35  ;;  %v9151_v33 = vld [vmem:[%s11789_s1 + $0x5d8] sm:$0xff]  }
  0x84   :  { %8258 = vmatpush3.bf16.msra.mxu0 %v9104_v36  ;;  %6091 = vmatprep.mubr.bf16.mxu0 %v1464_v7  ;;  %v9153_v35 = vld [vmem:[%s11789_s1 + $0x598] sm:$0xff]   ;;  %v9154_v36 = vld [vmem:[%s11789_s1 + $0x550] sm:$0xff]  }
  0x85   :  { %6052 = vmatmul.mubr.bf16.vlgmr.msra.gmra.mxu1 %v1424_v38  ;;  %8259 = vmatprep.subr.bf16.mxu0 %v9106_v39  ;;  %v9156_v38 = vld [vmem:[%s11789_s1 + $0x510] sm:$0xff]  }
  0x86   :  { %8280 = vmatpush3.bf16.msra.mxu1 %v9105_v37  ;;  %6131 = vmatprep.mubr.bf16.mxu1 %v1474_v11  ;;  %v9155_v37 = vld [vmem:[%s11789_s1 + $0x5d0] sm:$0xff]   ;;  %v9191_v11 = vld [vmem:[%s11789_s1 + $0x648] sm:$0xff]  }
  0x87   :  { %8281 = vmatprep.subr.bf16.mxu1 %v9107_v40  ;;  %v9157_v39 = vld [vmem:[%s11789_s1 + $0x590] sm:$0xff]   ;;  %v9158_v40 = vld [vmem:[%s11789_s1 + $0x548] sm:$0xff]  }
  0x88   :  { %8260 = vmatpush3.bf16.msra.mxu0 %v9108_v42  ;;  %v9159_v42 = vld [vmem:[%s11789_s1 + $0x5c8] sm:$0xff]   ;;  %v9187_v7 = vld [vmem:[%s11789_s1 + $0x650] sm:$0xff]  }
  0x89   :  { %8261 = vmatprep.subr.bf16.mxu0 %v9110_v44  ;;  %v9161_v44 = vld [vmem:[%s11789_s1 + $0x588] sm:$0xff]  }
  0x8a   :  { %8282 = vmatpush3.bf16.msra.mxu1 %v9109_v43  ;;  %v9160_v43 = vld [vmem:[%s11789_s1 + $0x508] sm:$0xff]  }
  0x8b   :  { %8283 = vmatprep.subr.bf16.mxu1 %v9111_v45  ;;  %v9162_v45 = vld [vmem:[%s11789_s1 + $0x540] sm:$0xff]  }
  0x8c   :  { %8262 = vmatpush3.bf16.msra.mxu0 %v9112_v46  ;;  %v9163_v46 = vld [vmem:[%s11789_s1 + $0x5c0] sm:$0xff]  }
  0x8d   :  { %8263 = vmatprep.subr.bf16.mxu0 %v9114_v48  ;;  %v9165_v48 = vld [vmem:[%s11789_s1 + $0x580] sm:$0xff]  }
  0x8e   :  { %8284 = vmatpush3.bf16.msra.mxu1 %v9113_v47  ;;  %v9164_v47 = vld [vmem:[%s11789_s1 + $0x500] sm:$0xff]  }
  0x8f   :  { %8285 = vmatprep.subr.bf16.mxu1 %v9115_v49  ;;  %v1457_v49 = vrot.slane %v10181_v4, %v9783_v41  ;;  %v9184_v4 = vld [vmem:[%s11789_s1 + $0x6d8] sm:$0xff]  }
  0x90   :  { %8264 = vmatpush3.bf16.msra.mxu0 %v9116_v50  ;;  %v9167_v50 = vld [vmem:[%s11789_s1 + $0x678] sm:$0xff]  }
  0x91   :  { %8265 = vmatprep.subr.bf16.mxu0 %v9118_v52  ;;  %v9169_v52 = vld [vmem:[%s11789_s1 + $0x638] sm:$0xff]  }
  0x92   :  { %8286 = vmatpush3.bf16.msra.mxu1 %v9117_v51  ;;  %v9168_v51 = vld [vmem:[%s11789_s1 + $0x6f8] sm:$0xff]  }
  0x93   :  { %8287 = vmatprep.subr.bf16.mxu1 %v9119_v53  ;;  %v9170_v53 = vld [vmem:[%s11789_s1 + $0x6b8] sm:$0xff]  }
  0x94   :  { %8266 = vmatpush3.bf16.msra.mxu0 %v9120_v54  ;;  %v1473_v54 = vcombine.high %v1457_v49, %v1457_v49 }
  0x95   :  { %8267 = vmatprep.subr.bf16.mxu0 %v9122_v56  ;;  %v9172_v56 = vld [vmem:[%s11789_s1 + $0x6f0] sm:$0xff]  }
  0x96   :  { %8288 = vmatpush3.bf16.msra.mxu1 %v9121_v55  ;;  %v9171_v55 = vld [vmem:[%s11789_s1 + $0x670] sm:$0xff]  }
  0x97   :  { %8289 = vmatprep.subr.bf16.mxu1 %v9123_v57  ;;  %v9173_v57 = vld [vmem:[%s11789_s1 + $0x630] sm:$0xff]  }
  0x98   :  { %8268 = vmatpush3.bf16.msra.mxu0 %v9124_v58  ;;  %v9174_v58 = vld [vmem:[%s11789_s1 + $0x6b0] sm:$0xff]  }
  0x99   :  { %8269 = vmatprep.subr.bf16.mxu0 %v9126_v60  ;;  %v9176_v60 = vld [vmem:[%s11789_s1 + $0x6e8] sm:$0xff]  }
  0x9a   :  { %8290 = vmatpush3.bf16.msra.mxu1 %v9125_v59  ;;  %v9175_v59 = vld [vmem:[%s11789_s1 + $0x668] sm:$0xff]  }
  0x9b   :  { %8291 = vmatprep.subr.bf16.mxu1 %v9127_v62  ;;  %v9178_v62 = vld [vmem:[%s11789_s1 + $0x6a8] sm:$0xff]  }
  0x9c   :  { %8270 = vmatpush3.bf16.msra.mxu0 %v9128_v1  ;;  %v9181_v1 = vld [vmem:[%s11789_s1 + $0x620] sm:$0xff]  }
  0x9d   :  { %8271 = vmatprep.subr.bf16.mxu0 %v9130_v5  ;;  %v9185_v5 = vld [vmem:[%s11789_s1 + $0x618] sm:$0xff]  }
  0x9e   :  { %8292 = vmatpush3.bf16.msra.mxu1 %v9129_v2  ;;  %v9182_v2 = vld [vmem:[%s11789_s1 + $0x6a0] sm:$0xff]  }
  0x9f   :  { %8293 = vmatprep.subr.bf16.mxu1 %v9131_v6  ;;  %v9186_v6 = vld [vmem:[%s11789_s1 + $0x698] sm:$0xff]  }
  0xa0   :  { %8272 = vmatpush3.bf16.msra.mxu0 %v9132_v9  ;;  %v9189_v9 = vld [vmem:[%s11789_s1 + $0x610] sm:$0xff]  }
  0xa1   :  { %8301 = vmatprep.subr.bf16.mxu0 %v9134_v13  ;;  %v9192_v13 = vld [vmem:[%s11789_s1 + $0x6c8] sm:$0xff]  }
  0xa2   :  { %8294 = vmatpush3.bf16.msra.mxu1 %v9133_v10  ;;  %v9190_v10 = vld [vmem:[%s11789_s1 + $0x690] sm:$0xff]  }
  0xa3   :  { %6092 = vmatmul.mubr.bf16.vlgmr.msra.gmra.mxu0 %v1450_v12  ;;  %8323 = vmatprep.subr.bf16.mxu1 %v9135_v14  ;;  %v25_v12 = vld [vmem:[%s11788_s0 + $0x18] sm:$0xff] }
  0xa4   :  { %8302 = vmatpush3.bf16.msra.mxu0 %v9136_v16  ;;  %6171 = vmatprep.mubr.bf16.mxu0 %v1471_v15  ;;  %v1483_v14 = vrot.slane %v25_v12, %v9783_v41  ;;  %v1476_v15 = vcombine.high %v25_v12, %v25_v12  ;;  %v9193_v16 = vld [vmem:[%s11789_s1 + $0x608] sm:$0xff]   ;;  %v9230_v12 = vld [vmem:[%s11789_s1 + $0x780] sm:$0xff]  }
  0xa5   :  { %6132 = vmatmul.mubr.bf16.vlgmr.msra.gmra.mxu1 %v1472_v18  ;;  %8303 = vmatprep.subr.bf16.mxu0 %v9138_v19 }
  0xa6   :  { %8324 = vmatpush3.bf16.msra.mxu1 %v9137_v17  ;;  %6211 = vmatprep.mubr.bf16.mxu1 %v1475_v21  ;;  %v9195_v17 = vld [vmem:[%s11789_s1 + $0x640] sm:$0xff]   ;;  %v1491_v18 = vcombine.high %v1483_v14, %v1483_v14  ;;  %v10387_v19 = vrot.slane %v1476_v15, %v9783_v41  ;;  %v9233_v15 = vld [vmem:[%s11789_s1 + $0x8f8] sm:$0xff]  }
  0xa7   :  { %8325 = vmatprep.subr.bf16.mxu1 %v9139_v20  ;;  %v9194_v20 = vld [vmem:[%s11789_s1 + $0x688] sm:$0xff]   ;;  %v9196_v21 = vld [vmem:[%s11789_s1 + $0x6c0] sm:$0xff]  }
  0xa8   :  { %8304 = vmatpush3.bf16.msra.mxu0 %v9140_v22  ;;  %v9197_v22 = vld [vmem:[%s11789_s1 + $0x600] sm:$0xff]  }
  0xa9   :  { %8305 = vmatprep.subr.bf16.mxu0 %v9142_v24  ;;  %v1492_v24 = vcombine.high %v10387_v19, %v10387_v19 }
  0xaa   :  { %8326 = vmatpush3.bf16.msra.mxu1 %v9141_v23  ;;  %v1513_v23 = vrot.slane %v1491_v18, %v9783_v41 }
  0xab   :  { %8327 = vmatprep.subr.bf16.mxu1 %v9143_v25  ;;  %v9198_v25 = vld [vmem:[%s11789_s1 + $0x680] sm:$0xff]  }
  0xac   :  { %8306 = vmatpush3.bf16.msra.mxu0 %v9144_v26  ;;  %v1523_v26 = vcombine.high %v1513_v23, %v1513_v23 }
  0xad   :  { %8307 = vmatprep.subr.bf16.mxu0 %v9146_v28  ;;  %v9199_v28 = vld [vmem:[%s11789_s1 + $0x778] sm:$0xff]  }
  0xae   :  { %8328 = vmatpush3.bf16.msra.mxu1 %v9145_v27  ;;  %v1499_v27 = vrot.slane %v1483_v14, %v9783_v41  ;;  %v9232_v14 = vld [vmem:[%s11789_s1 + $0x878] sm:$0xff]  }
  0xaf   :  { %8329 = vmatprep.subr.bf16.mxu1 %v9147_v29  ;;  %v9200_v29 = vld [vmem:[%s11789_s1 + $0x7f8] sm:$0xff]  }
  0xb0   :  { %8308 = vmatpush3.bf16.msra.mxu0 %v9148_v30  ;;  %v1520_v30 = vrot.slane %v1492_v24, %v9783_v41 }
  0xb1   :  { %8309 = vmatprep.subr.bf16.mxu0 %v9150_v32  ;;  %v9202_v32 = vld [vmem:[%s11789_s1 + $0x7b8] sm:$0xff]  }
  0xb2   :  { %8330 = vmatpush3.bf16.msra.mxu1 %v9149_v31  ;;  %v9201_v31 = vld [vmem:[%s11789_s1 + $0x738] sm:$0xff]  }
  0xb3   :  { %8331 = vmatprep.subr.bf16.mxu1 %v9151_v33  ;;  %v1521_v33 = vcombine.high %v1499_v27, %v1499_v27 }
  0xb4   :  { %8310 = vmatpush3.bf16.msra.mxu0 %v9152_v34  ;;  %v9203_v34 = vld [vmem:[%s11789_s1 + $0x770] sm:$0xff]  }
  0xb5   :  { %8311 = vmatprep.subr.bf16.mxu0 %v9154_v36  ;;  %v1524_v36 = vcombine.high %v1520_v30, %v1520_v30 }
  0xb6   :  { %8332 = vmatpush3.bf16.msra.mxu1 %v9153_v35  ;;  %v9204_v35 = vld [vmem:[%s11789_s1 + $0x7f0] sm:$0xff]  }
  0xb7   :  { %8333 = vmatprep.subr.bf16.mxu1 %v9155_v37 }
  0xb8   :  { %8312 = vmatpush3.bf16.msra.mxu0 %v9156_v38  ;;  %v7438_v38 = vld [vmem:[%s11790_s2] ss:$0 sm:$0xff] }
  0xb9   :  { %8313 = vmatprep.subr.bf16.mxu0 %v9158_v40  ;;  %v9206_v40 = vld [vmem:[%s11789_s1 + $0x7b0] sm:$0xff]  }
  0xba   :  { %8334 = vmatpush3.bf16.msra.mxu1 %v9157_v39  ;;  %v9205_v39 = vld [vmem:[%s11789_s1 + $0x730] sm:$0xff]  }
  0xbb   :  { %8335 = vmatprep.subr.bf16.mxu1 %v9159_v42 }
  0xbc   :  { %8314 = vmatpush3.bf16.msra.mxu0 %v9160_v43 }
  0xbd   :  { %8315 = vmatprep.subr.bf16.mxu0 %v9162_v45 }
  0xbe   :  { %8336 = vmatpush3.bf16.msra.mxu1 %v9161_v44  ;;  %v9207_v44 = vld [vmem:[%s11789_s1 + $0x768] sm:$0xff]  }
  0xbf   :  { %8337 = vmatprep.subr.bf16.mxu1 %v9163_v46  ;;  %v9208_v46 = vld [vmem:[%s11789_s1 + $0x7e8] sm:$0xff]  }
  0xc0   :  { %8316 = vmatpush3.bf16.msra.mxu0 %v9164_v47 }
  0xc1   :  { %8345 = vmatprep.subr.bf16.mxu0 %v9167_v50 }
  0xc2   :  { %8338 = vmatpush3.bf16.msra.mxu1 %v9165_v48 }
  0xc3   :  { %6172 = vmatmul.mubr.bf16.vlgmr.msra.gmra.mxu0 %v1457_v49  ;;  %8367 = vmatprep.subr.bf16.mxu1 %v9168_v51  ;;  %v9209_v49 = vld [vmem:[%s11789_s1 + $0x728] sm:$0xff]  }
  0xc4   :  { %8346 = vmatpush3.bf16.msra.mxu0 %v9169_v52  ;;  %6251 = vmatprep.mubr.bf16.mxu0 %v1513_v23  ;;  %v9210_v52 = vld [vmem:[%s11789_s1 + $0x7a8] sm:$0xff]   ;;  %v9239_v23 = vld [vmem:[%s11789_s1 + $0x8b0] sm:$0xff]  }
  0xc5   :  { %6212 = vmatmul.mubr.bf16.vlgmr.msra.gmra.mxu1 %v1473_v54  ;;  %8347 = vmatprep.subr.bf16.mxu0 %v9171_v55  ;;  %v9211_v55 = vld [vmem:[%s11789_s1 + $0x760] sm:$0xff]  }
  0xc6   :  { %8368 = vmatpush3.bf16.msra.mxu1 %v9170_v53  ;;  %6291 = vmatprep.mubr.bf16.mxu1 %v1523_v26  ;;  %v9240_v26 = vld [vmem:[%s11789_s1 + $0x868] sm:$0xff]  }
  0xc7   :  { %8369 = vmatprep.subr.bf16.mxu1 %v9172_v56 }
  0xc8   :  { %8348 = vmatpush3.bf16.msra.mxu0 %v9173_v57  ;;  %v9212_v57 = vld [vmem:[%s11789_s1 + $0x7e0] sm:$0xff]  }
  0xc9   :  { %8349 = vmatprep.subr.bf16.mxu0 %v9175_v59  ;;  %v9213_v59 = vld [vmem:[%s11789_s1 + $0x720] sm:$0xff]  }
  0xca   :  { %8370 = vmatpush3.bf16.msra.mxu1 %v9174_v58 }
  0xcb   :  { %8371 = vmatprep.subr.bf16.mxu1 %v9176_v60  ;;  %v9214_v60 = vld [vmem:[%s11789_s1 + $0x7a0] sm:$0xff]  }
  0xcc   :  { %8350 = vmatpush3.bf16.msra.mxu0 %v9177_v61  ;;  %v9215_v61 = vld [vmem:[%s11789_s1 + $0x758] sm:$0xff]  }
  0xcd   :  { %8351 = vmatprep.subr.bf16.mxu0 %v9179_v63  ;;  %v9217_v63 = vld [vmem:[%s11789_s1 + $0x718] sm:$0xff]  }
  0xce   :  { %8372 = vmatpush3.bf16.msra.mxu1 %v9178_v62  ;;  %v9216_v62 = vld [vmem:[%s11789_s1 + $0x7d8] sm:$0xff]  }
  0xcf   :  { %8373 = vmatprep.subr.bf16.mxu1 %v9180_v0  ;;  %v9218_v0 = vld [vmem:[%s11789_s1 + $0x798] sm:$0xff]  }
  0xd0   :  { %8352 = vmatpush3.bf16.msra.mxu0 %v9181_v1  ;;  %v9219_v1 = vld [vmem:[%s11789_s1 + $0x750] sm:$0xff]  }
  0xd1   :  { %8353 = vmatprep.subr.bf16.mxu0 %v9183_v3  ;;  %v9221_v3 = vld [vmem:[%s11789_s1 + $0x710] sm:$0xff]  }
  0xd2   :  { %8374 = vmatpush3.bf16.msra.mxu1 %v9182_v2  ;;  %v9220_v2 = vld [vmem:[%s11789_s1 + $0x7d0] sm:$0xff]  }
  0xd3   :  { %8375 = vmatprep.subr.bf16.mxu1 %v9184_v4  ;;  %v9222_v4 = vld [vmem:[%s11789_s1 + $0x790] sm:$0xff]  }
  0xd4   :  { %8354 = vmatpush3.bf16.msra.mxu0 %v9185_v5  ;;  %v9223_v5 = vld [vmem:[%s11789_s1 + $0x748] sm:$0xff]  }
  0xd5   :  { %8355 = vmatprep.subr.bf16.mxu0 %v9187_v7  ;;  %v9225_v7 = vld [vmem:[%s11789_s1 + $0x708] sm:$0xff]  }
  0xd6   :  { %8376 = vmatpush3.bf16.msra.mxu1 %v9186_v6  ;;  %v9224_v6 = vld [vmem:[%s11789_s1 + $0x7c8] sm:$0xff]  }
  0xd7   :  { %8377 = vmatprep.subr.bf16.mxu1 %v9188_v8  ;;  %v9226_v8 = vld [vmem:[%s11789_s1 + $0x788] sm:$0xff]  }
  0xd8   :  { %8356 = vmatpush3.bf16.msra.mxu0 %v9189_v9  ;;  %v9227_v9 = vld [vmem:[%s11789_s1 + $0x740] sm:$0xff]  }
  0xd9   :  { %8357 = vmatprep.subr.bf16.mxu0 %v9191_v11  ;;  %v9229_v11 = vld [vmem:[%s11789_s1 + $0x700] sm:$0xff]  }
  0xda   :  { %8378 = vmatpush3.bf16.msra.mxu1 %v9190_v10  ;;  %v9228_v10 = vld [vmem:[%s11789_s1 + $0x7c0] sm:$0xff]  }
  0xdb   :  { %8379 = vmatprep.subr.bf16.mxu1 %v9192_v13  ;;  %v1506_v13 = vrot.slane %v10387_v19, %v9783_v41  ;;  %v9236_v19 = vld [vmem:[%s11789_s1 + $0x870] sm:$0xff]  }
  0xdc   :  { %8358 = vmatpush3.bf16.msra.mxu0 %v9193_v16  ;;  %v9234_v16 = vld [vmem:[%s11789_s1 + $0x838] sm:$0xff]  }
  0xdd   :  { %8359 = vmatprep.subr.bf16.mxu0 %v9195_v17  ;;  %v9235_v17 = vld [vmem:[%s11789_s1 + $0x8b8] sm:$0xff]   ;;  %v1522_v18 = vcombine.high %v1506_v13, %v1506_v13 }
  0xde   :  { %8380 = vmatpush3.bf16.msra.mxu1 %v9194_v20  ;;  %v9237_v20 = vld [vmem:[%s11789_s1 + $0x8f0] sm:$0xff]  }
  0xdf   :  { %8381 = vmatprep.subr.bf16.mxu1 %v9196_v21 }
  0xe0   :  { %8360 = vmatpush3.bf16.msra.mxu0 %v9197_v22  ;;  %v9238_v22 = vld [vmem:[%s11789_s1 + $0x830] sm:$0xff]  }
  0xe1   :  { %8389 = vmatprep.subr.bf16.mxu0 %v9199_v28  ;;  %v9241_v28 = vld [vmem:[%s11789_s1 + $0x8e8] sm:$0xff]  }
  0xe2   :  { %8382 = vmatpush3.bf16.msra.mxu1 %v9198_v25 }
  0xe3   :  { %v8097_v37 = vpop.f32.mrf.mxu0  ;;  %6252 = vmatmul.mubr.bf16.vlgmr.msra.gmra.mxu0 %v1499_v27  ;;  %8411 = vmatprep.subr.bf16.mxu1 %v9200_v29 }
  0xe4   :  { %8390 = vmatpush3.bf16.msra.mxu0 %v9201_v31  ;;  %6331 = vmatprep.mubr.bf16.mxu0 %v1520_v30  ;;  %v8119_v42 = vpop.f32.mrf.mxu1  ;;  %v9242_v31 = vld [vmem:[%s11789_s1 + $0x828] sm:$0xff]  }
  0xe5   :  { %6292 = vmatmul.mubr.bf16.vlgmr.msra.gmra.mxu1 %v1521_v33  ;;  %v8098_v43 = vpop.f32.mrf.mxu0  ;;  %8391 = vmatprep.subr.bf16.mxu0 %v9203_v34  ;;  %v9243_v34 = vld [vmem:[%s11789_s1 + $0x8a8] sm:$0xff]  }
  0xe6   :  { %8412 = vmatpush3.bf16.msra.mxu1 %v9202_v32  ;;  %v8099_v45 = vadd.f32 %v8098_v43, %v8097_v37  ;;  %6371 = vmatprep.mubr.bf16.mxu1 %v1524_v36  ;;  %v8120_v47 = vpop.f32.mrf.mxu1  ;;  %v9244_v37 = vld [vmem:[%s11789_s1 + $0x860] sm:$0xff]  }
  0xe7   :  { %v8100_v48 = vpop.f32.mrf.mxu0  ;;  %8413 = vmatprep.subr.bf16.mxu1 %v9204_v35  ;;  %v8121_v51 = vadd.f32 %v8120_v47, %v8119_v42  ;;  %v9246_v42 = vld [vmem:[%s11789_s1 + $0x820] sm:$0xff]   ;;  %v9251_v47 = vld [vmem:[%s11789_s1 + $0x898] sm:$0xff]  }
  0xe8   :  { %v5774_v50 = vadd.f32 %v8099_v45, %v7438_v38  ;;  %8392 = vmatpush3.bf16.msra.mxu0 %v9205_v39  ;;  %v8122_v53 = vpop.f32.mrf.mxu1  ;;  %v9245_v39 = vld [vmem:[%s11789_s1 + $0x8e0] sm:$0xff]   ;;  %v9249_v45 = vld [vmem:[%s11789_s1 + $0x8d8] sm:$0xff]   ;;  %v9252_v48 = vld [vmem:[%s11789_s1 + $0x850] sm:$0xff]  }
  0xe9   :  { %v8101_v54 = vpop.f32.mrf.mxu0  ;;  %8393 = vmatprep.subr.bf16.mxu0 %v9207_v44  ;;  %v9247_v43 = vld [vmem:[%s11789_s1 + $0x8a0] sm:$0xff]   ;;  %v9248_v44 = vld [vmem:[%s11789_s1 + $0x858] sm:$0xff]   ;;  %v9257_v53 = vld [vmem:[%s11789_s1 + $0x8c8] sm:$0xff]  }
  0xea   :  { %v10448_v56 = vadd.f32 %v8121_v51, %v5774_v50  ;;  %8414 = vmatpush3.bf16.msra.mxu1 %v9206_v40  ;;  %v8123_v58 = vpop.f32.mrf.mxu1  ;;  %v9254_v50 = vld [vmem:[%s11789_s1 + $0x810] sm:$0xff]   ;;  %v26_v54 = vld [vmem:[%s11788_s0 + $0x20] sm:$0xff] }
  0xeb   :  { %8415 = vmatprep.subr.bf16.mxu1 %v9208_v46  ;;  %v9250_v46 = vld [vmem:[%s11789_s1 + $0x818] sm:$0xff]   ;;  %v9255_v51 = vld [vmem:[%s11789_s1 + $0x890] sm:$0xff]   ;;  %v9259_v58 = vld [vmem:[%s11789_s1 + $0x888] sm:$0xff]  }
  0xec   :  { %8394 = vmatpush3.bf16.msra.mxu0 %v9209_v49  ;;  %v9253_v49 = vld [vmem:[%s11789_s1 + $0x8d0] sm:$0xff]  }
  0xed   :  { %8395 = vmatprep.subr.bf16.mxu0 %v9211_v55  ;;  %v9258_v55 = vld [vmem:[%s11789_s1 + $0x808] sm:$0xff]  }
  0xee   :  { %8416 = vmatpush3.bf16.msra.mxu1 %v9210_v52  ;;  %v9256_v52 = vld [vmem:[%s11789_s1 + $0x848] sm:$0xff]  }
  0xef   :  { %8417 = vmatprep.subr.bf16.mxu1 %v9212_v57  ;;  %v1525_v57 = vcombine.high %v26_v54, %v26_v54 }
  0xf0   :  { %8396 = vmatpush3.bf16.msra.mxu0 %v9213_v59  ;;  %v9260_v59 = vld [vmem:[%s11789_s1 + $0x840] sm:$0xff]  }
  0xf1   :  { %8397 = vmatprep.subr.bf16.mxu0 %v9215_v61  ;;  %v10604_v61 = vrot.slane %v1525_v57, %v9783_v41  ;;  %v9300_v57 = vld [vmem:[%s11789_s1 + $0xab8] sm:$0xff]  }
  0xf2   :  { %8418 = vmatpush3.bf16.msra.mxu1 %v9214_v60 }
  0xf3   :  { %8419 = vmatprep.subr.bf16.mxu1 %v9216_v62  ;;  %v9261_v62 = vld [vmem:[%s11789_s1 + $0x8c0] sm:$0xff]  }
  0xf4   :  { %8398 = vmatpush3.bf16.msra.mxu0 %v9217_v63  ;;  %v9262_v63 = vld [vmem:[%s11789_s1 + $0x800] sm:$0xff]  }
  0xf5   :  { %8399 = vmatprep.subr.bf16.mxu0 %v9219_v1  ;;  %v1541_v1 = vcombine.high %v10604_v61, %v10604_v61 }
  0xf6   :  { %8420 = vmatpush3.bf16.msra.mxu1 %v9218_v0 }
  0xf7   :  { %8421 = vmatprep.subr.bf16.mxu1 %v9220_v2  ;;  %v9263_v2 = vld [vmem:[%s11789_s1 + $0x880] sm:$0xff]  }
  0xf8   :  { %8400 = vmatpush3.bf16.msra.mxu0 %v9221_v3 }
  0xf9   :  { %8401 = vmatprep.subr.bf16.mxu0 %v9223_v5  ;;  %v9264_v5 = vld [vmem:[%s11789_s1 + $0x978] sm:$0xff]  }
  0xfa   :  { %8422 = vmatpush3.bf16.msra.mxu1 %v9222_v4 }
  0xfb   :  { %8423 = vmatprep.subr.bf16.mxu1 %v9224_v6  ;;  %v9265_v6 = vld [vmem:[%s11789_s1 + $0x9f8] sm:$0xff]  }
  0xfc   :  { %8402 = vmatpush3.bf16.msra.mxu0 %v9225_v7  ;;  %v1569_v7 = vrot.slane %v1541_v1, %v9783_v41 }
  0xfd   :  { %8403 = vmatprep.subr.bf16.mxu0 %v9227_v9  ;;  %v9267_v9 = vld [vmem:[%s11789_s1 + $0x9b8] sm:$0xff]  }
  0xfe   :  { %8424 = vmatpush3.bf16.msra.mxu1 %v9226_v8  ;;  %v9266_v8 = vld [vmem:[%s11789_s1 + $0x938] sm:$0xff]  }
  0xff   :  { %8425 = vmatprep.subr.bf16.mxu1 %v9228_v10 }
 0x100   :  { %8404 = vmatpush3.bf16.msra.mxu0 %v9229_v11  ;;  %v9268_v11 = vld [vmem:[%s11789_s1 + $0x970] sm:$0xff]  }
 0x101   :  { %8433 = vmatprep.subr.bf16.mxu0 %v9232_v14 }
 0x102   :  { %8426 = vmatpush3.bf16.msra.mxu1 %v9230_v12  ;;  %v9269_v12 = vld [vmem:[%s11789_s1 + $0x9f0] sm:$0xff]  }
 0x103   :  { %v8141_v21 = vpop.f32.mrf.mxu0  ;;  %6332 = vmatmul.mubr.bf16.vlgmr.msra.gmra.mxu0 %v1506_v13  ;;  %8455 = vmatprep.subr.bf16.mxu1 %v9233_v15  ;;  %v1573_v13 = vcombine.high %v1569_v7, %v1569_v7  ;;  %v9270_v15 = vld [vmem:[%s11789_s1 + $0x930] sm:$0xff]  }
 0x104   :  { %8434 = vmatpush3.bf16.msra.mxu0 %v9234_v16  ;;  %v8163_v24 = vpop.f32.mrf.mxu1  ;;  %v9271_v16 = vld [vmem:[%s11789_s1 + $0x9b0] sm:$0xff]  }
 0x105   :  { %6372 = vmatmul.mubr.bf16.vlgmr.msra.gmra.mxu1 %v1522_v18  ;;  %v8142_v25 = vpop.f32.mrf.mxu0  ;;  %8435 = vmatprep.subr.bf16.mxu0 %v9236_v19  ;;  %v9272_v19 = vld [vmem:[%s11789_s1 + $0x968] sm:$0xff]  }
 0x106   :  { %8456 = vmatpush3.bf16.msra.mxu1 %v9235_v17  ;;  %v8143_v27 = vadd.f32 %v8142_v25, %v8141_v21  ;;  %v8164_v29 = vpop.f32.mrf.mxu1  ;;  %v9273_v21 = vld [vmem:[%s11789_s1 + $0x9e8] sm:$0xff]  }
 0x107   :  { %v8144_v30 = vpop.f32.mrf.mxu0  ;;  %8457 = vmatprep.subr.bf16.mxu1 %v9237_v20  ;;  %v8165_v33 = vadd.f32 %v8164_v29, %v8163_v24  ;;  %v9274_v24 = vld [vmem:[%s11789_s1 + $0x928] sm:$0xff]  }
 0x108   :  { %v5854_v32 = vadd.f32 %v8143_v27, %v10448_v56  ;;  %8436 = vmatpush3.bf16.msra.mxu0 %v9238_v22  ;;  %v8166_v35 = vpop.f32.mrf.mxu1  ;;  %v1532_v56 = vrot.slane %v26_v54, %v9783_v41  ;;  %v9275_v27 = vld [vmem:[%s11789_s1 + $0x9a8] sm:$0xff]   ;;  %v9276_v30 = vld [vmem:[%s11789_s1 + $0x960] sm:$0xff]   ;;  %v9297_v54 = vld [vmem:[%s11789_s1 + $0xa78] sm:$0xff]  }
 0x109   :  { %v8145_v36 = vpop.f32.mrf.mxu0  ;;  %8437 = vmatprep.subr.bf16.mxu0 %v9240_v26  ;;  %v9279_v35 = vld [vmem:[%s11789_s1 + $0x9a0] sm:$0xff]  }
 0x10a   :  { %v10549_v38 = vadd.f32 %v8165_v33, %v5854_v32  ;;  %8458 = vmatpush3.bf16.msra.mxu1 %v9239_v23  ;;  %v8167_v40 = vpop.f32.mrf.mxu1  ;;  %v1540_v60 = vcombine.high %v1532_v56, %v1532_v56  ;;  %v1548_v4 = vrot.slane %v1532_v56, %v9783_v41  ;;  %v9277_v32 = vld [vmem:[%s11789_s1 + $0x9e0] sm:$0xff]   ;;  %v9280_v36 = vld [vmem:[%s11789_s1 + $0x958] sm:$0xff]  }
 0x10b   :  { %8459 = vmatprep.subr.bf16.mxu1 %v9241_v28  ;;  %v9284_v40 = vld [vmem:[%s11789_s1 + $0x950] sm:$0xff]   ;;  %v9299_v56 = vld [vmem:[%s11789_s1 + $0xa38] sm:$0xff]  }
 0x10c   :  { %8438 = vmatpush3.bf16.msra.mxu0 %v9242_v31  ;;  %v1562_v0 = vrot.slane %v1540_v60, %v9783_v41  ;;  %v1570_v10 = vcombine.high %v1548_v4, %v1548_v4  ;;  %v9302_v60 = vld [vmem:[%s11789_s1 + $0xaf0] sm:$0xff]  }
 0x10d   :  { %8439 = vmatprep.subr.bf16.mxu0 %v9244_v37  ;;  %v9281_v37 = vld [vmem:[%s11789_s1 + $0x9d8] sm:$0xff]  }
 0x10e   :  { %8460 = vmatpush3.bf16.msra.mxu1 %v9243_v34  ;;  %6411 = vmatprep.mubr.bf16.mxu0 %v1562_v0  ;;  %v1572_v3 = vcombine.high %v1562_v0, %v1562_v0  ;;  %v9278_v34 = vld [vmem:[%s11789_s1 + $0x920] sm:$0xff]  }
 0x10f   :  { %8461 = vmatprep.subr.bf16.mxu1 %v9245_v39  ;;  %v9283_v39 = vld [vmem:[%s11789_s1 + $0x998] sm:$0xff]  }
 0x110   :  { %8440 = vmatpush3.bf16.msra.mxu0 %v9246_v42  ;;  %6451 = vmatprep.mubr.bf16.mxu1 %v1572_v3  ;;  %v9285_v42 = vld [vmem:[%s11789_s1 + $0x9d0] sm:$0xff]  }
 0x111   :  { %8441 = vmatprep.subr.bf16.mxu0 %v9248_v44  ;;  %v9287_v44 = vld [vmem:[%s11789_s1 + $0x990] sm:$0xff]  }
 0x112   :  { %8462 = vmatpush3.bf16.msra.mxu1 %v9247_v43  ;;  %v9286_v43 = vld [vmem:[%s11789_s1 + $0x910] sm:$0xff]  }
 0x113   :  { %8463 = vmatprep.subr.bf16.mxu1 %v9249_v45  ;;  %v9288_v45 = vld [vmem:[%s11789_s1 + $0x948] sm:$0xff]  }
 0x114   :  { %8442 = vmatpush3.bf16.msra.mxu0 %v9250_v46  ;;  %v9289_v46 = vld [vmem:[%s11789_s1 + $0x9c8] sm:$0xff]  }
 0x115   :  { %8443 = vmatprep.subr.bf16.mxu0 %v9252_v48  ;;  %v9291_v48 = vld [vmem:[%s11789_s1 + $0x988] sm:$0xff]  }
 0x116   :  { %8464 = vmatpush3.bf16.msra.mxu1 %v9251_v47  ;;  %v9290_v47 = vld [vmem:[%s11789_s1 + $0x908] sm:$0xff]  }
 0x117   :  { %8465 = vmatprep.subr.bf16.mxu1 %v9253_v49  ;;  %v9292_v49 = vld [vmem:[%s11789_s1 + $0x940] sm:$0xff]  }
 0x118   :  { %8444 = vmatpush3.bf16.msra.mxu0 %v9254_v50  ;;  %v9293_v50 = vld [vmem:[%s11789_s1 + $0x9c0] sm:$0xff]  }
 0x119   :  { %8445 = vmatprep.subr.bf16.mxu0 %v9256_v52  ;;  %v9295_v52 = vld [vmem:[%s11789_s1 + $0x980] sm:$0xff]  }
 0x11a   :  { %8466 = vmatpush3.bf16.msra.mxu1 %v9255_v51  ;;  %v9294_v51 = vld [vmem:[%s11789_s1 + $0x900] sm:$0xff]  }
 0x11b   :  { %8467 = vmatprep.subr.bf16.mxu1 %v9257_v53  ;;  %v1555_v53 = vrot.slane %v10604_v61, %v9783_v41 }
 0x11c   :  { %8446 = vmatpush3.bf16.msra.mxu0 %v9258_v55  ;;  %v9298_v55 = vld [vmem:[%s11789_s1 + $0xaf8] sm:$0xff]  }
 0x11d   :  { %8447 = vmatprep.subr.bf16.mxu0 %v9260_v59  ;;  %v9301_v59 = vld [vmem:[%s11789_s1 + $0xa70] sm:$0xff]  }
 0x11e   :  { %8468 = vmatpush3.bf16.msra.mxu1 %v9259_v58  ;;  %v1571_v58 = vcombine.high %v1555_v53, %v1555_v53 }
 0x11f   :  { %8469 = vmatprep.subr.bf16.mxu1 %v9261_v62  ;;  %v9303_v62 = vld [vmem:[%s11789_s1 + $0xa30] sm:$0xff]  }
 0x120   :  { %8448 = vmatpush3.bf16.msra.mxu0 %v9262_v63  ;;  %v9304_v63 = vld [vmem:[%s11789_s1 + $0xab0] sm:$0xff]  }
 0x121   :  { %8477 = vmatprep.subr.bf16.mxu0 %v9264_v5 }
 0x122   :  { %8470 = vmatpush3.bf16.msra.mxu1 %v9263_v2  ;;  %v9305_v2 = vld [vmem:[%s11789_s1 + $0xa68] sm:$0xff]  }
 0x123   :  { %v8185_v14 = vpop.f32.mrf.mxu0  ;;  %6412 = vmatmul.mubr.bf16.vlgmr.msra.gmra.mxu0 %v1548_v4  ;;  %8499 = vmatprep.subr.bf16.mxu1 %v9265_v6  ;;  %v9306_v4 = vld [vmem:[%s11789_s1 + $0xae8] sm:$0xff]  }
 0x124   :  { %8478 = vmatpush3.bf16.msra.mxu0 %v9266_v8  ;;  %6491 = vmatprep.mubr.bf16.mxu0 %v1569_v7  ;;  %v9307_v7 = vld [vmem:[%s11789_s1 + $0xa28] sm:$0xff]  }
 0x125   :  { %v8207_v17 = vpop.f32.mrf.mxu1  ;;  %6452 = vmatmul.mubr.bf16.vlgmr.msra.gmra.mxu1 %v1570_v10  ;;  %v8186_v18 = vpop.f32.mrf.mxu0  ;;  %8479 = vmatprep.subr.bf16.mxu0 %v9268_v11  ;;  %v9308_v10 = vld [vmem:[%s11789_s1 + $0xaa8] sm:$0xff]  }
 0x126   :  { %8500 = vmatpush3.bf16.msra.mxu1 %v9267_v9  ;;  %v8187_v20 = vadd.f32 %v8186_v18, %v8185_v14  ;;  %6531 = vmatprep.mubr.bf16.mxu1 %v1573_v13  ;;  %v9309_v13 = vld [vmem:[%s11789_s1 + $0xa60] sm:$0xff]  }
 0x127   :  { %v8208_v22 = vpop.f32.mrf.mxu1  ;;  %v8188_v23 = vpop.f32.mrf.mxu0  ;;  %8501 = vmatprep.subr.bf16.mxu1 %v9269_v12  ;;  %v9312_v18 = vld [vmem:[%s11789_s1 + $0xaa0] sm:$0xff]  }
 0x128   :  { %v5934_v25 = vadd.f32 %v8187_v20, %v10549_v38  ;;  %v8209_v26 = vadd.f32 %v8208_v22, %v8207_v17  ;;  %8480 = vmatpush3.bf16.msra.mxu0 %v9270_v15  ;;  %v9282_v38 = vld [vmem:[%s11789_s1 + $0x918] sm:$0xff]   ;;  %v9310_v15 = vld [vmem:[%s11789_s1 + $0xae0] sm:$0xff]   ;;  %v9317_v23 = vld [vmem:[%s11789_s1 + $0xa50] sm:$0xff]  }
 0x129   :  { %v8210_v28 = vpop.f32.mrf.mxu1  ;;  %v8189_v29 = vpop.f32.mrf.mxu0  ;;  %8481 = vmatprep.subr.bf16.mxu0 %v9272_v19  ;;  %v9311_v17 = vld [vmem:[%s11789_s1 + $0xa20] sm:$0xff]   ;;  %v9313_v19 = vld [vmem:[%s11789_s1 + $0xa58] sm:$0xff]  }
 0x12a   :  { %v10660_v31 = vadd.f32 %v8209_v26, %v5934_v25  ;;  %8502 = vmatpush3.bf16.msra.mxu1 %v9271_v16  ;;  %v9314_v20 = vld [vmem:[%s11789_s1 + $0xad8] sm:$0xff]   ;;  %v9319_v25 = vld [vmem:[%s11789_s1 + $0xa10] sm:$0xff]   ;;  %v9322_v28 = vld [vmem:[%s11789_s1 + $0xac8] sm:$0xff]  }
 0x12b   :  { %v8211_v33 = vpop.f32.mrf.mxu1  ;;  %8503 = vmatprep.subr.bf16.mxu1 %v9273_v21  ;;  %v9315_v21 = vld [vmem:[%s11789_s1 + $0xa18] sm:$0xff]   ;;  %v9320_v26 = vld [vmem:[%s11789_s1 + $0xa90] sm:$0xff]   ;;  %v9323_v29 = vld [vmem:[%s11789_s1 + $0xa08] sm:$0xff]  }
 0x12c   :  { %8482 = vmatpush3.bf16.msra.mxu0 %v9274_v24  ;;  %v9316_v22 = vld [vmem:[%s11789_s1 + $0xa98] sm:$0xff]   ;;  %v9318_v24 = vld [vmem:[%s11789_s1 + $0xad0] sm:$0xff]  }
 0x12d   :  { %8483 = vmatprep.subr.bf16.mxu0 %v9276_v30  ;;  %v27_v30 = vld [vmem:[%s11788_s0 + $0x28] sm:$0xff] }
 0x12e   :  { %8504 = vmatpush3.bf16.msra.mxu1 %v9275_v27  ;;  %v9321_v27 = vld [vmem:[%s11789_s1 + $0xa48] sm:$0xff]   ;;  %v1574_v33 = vcombine.high %v27_v30, %v27_v30 }
 0x12f   :  { %8505 = vmatprep.subr.bf16.mxu1 %v9277_v32  ;;  %v1581_v32 = vrot.slane %v27_v30, %v9783_v41  ;;  %v9363_v30 = vld [vmem:[%s11789_s1 + $0xcf8] sm:$0xff]  }
 0x130   :  { %8484 = vmatpush3.bf16.msra.mxu0 %v9278_v34  ;;  %v9325_v34 = vld [vmem:[%s11789_s1 + $0xa40] sm:$0xff]  }
 0x131   :  { %8485 = vmatprep.subr.bf16.mxu0 %v9280_v36  ;;  %v1589_v36 = vcombine.high %v1581_v32, %v1581_v32 }
 0x132   :  { %8506 = vmatpush3.bf16.msra.mxu1 %v9279_v35  ;;  %v9326_v35 = vld [vmem:[%s11789_s1 + $0xac0] sm:$0xff]  }
 0x133   :  { %8507 = vmatprep.subr.bf16.mxu1 %v9281_v37  ;;  %v10819_v37 = vrot.slane %v1574_v33, %v9783_v41 }
 0x134   :  { %8486 = vmatpush3.bf16.msra.mxu0 %v9282_v38  ;;  %v9327_v38 = vld [vmem:[%s11789_s1 + $0xa00] sm:$0xff]  }
 0x135   :  { %8487 = vmatprep.subr.bf16.mxu0 %v9284_v40  ;;  %v1611_v40 = vrot.slane %v1589_v36, %v9783_v41 }
 0x136   :  { %8508 = vmatpush3.bf16.msra.mxu1 %v9283_v39  ;;  %v9328_v39 = vld [vmem:[%s11789_s1 + $0xa80] sm:$0xff]  }
 0x137   :  { %8509 = vmatprep.subr.bf16.mxu1 %v9285_v42  ;;  %v1590_v42 = vcombine.high %v10819_v37, %v10819_v37 }
 0x138   :  { %8488 = vmatpush3.bf16.msra.mxu0 %v9286_v43  ;;  %v1597_v43 = vrot.slane %v1581_v32, %v9783_v41  ;;  %v9365_v32 = vld [vmem:[%s11789_s1 + $0xcb8] sm:$0xff]  }
 0x139   :  { %8489 = vmatprep.subr.bf16.mxu0 %v9288_v45  ;;  %v1621_v45 = vcombine.high %v1611_v40, %v1611_v40 }
 0x13a   :  { %8510 = vmatpush3.bf16.msra.mxu1 %v9287_v44  ;;  %v9329_v44 = vld [vmem:[%s11789_s1 + $0xb78] sm:$0xff]  }
 0x13b   :  { %8511 = vmatprep.subr.bf16.mxu1 %v9289_v46  ;;  %v9330_v46 = vld [vmem:[%s11789_s1 + $0xbf8] sm:$0xff]  }
 0x13c   :  { %8490 = vmatpush3.bf16.msra.mxu0 %v9290_v47  ;;  %v1618_v47 = vrot.slane %v1590_v42, %v9783_v41  ;;  %v9370_v42 = vld [vmem:[%s11789_s1 + $0xc68] sm:$0xff]  }
 0x13d   :  { %8491 = vmatprep.subr.bf16.mxu0 %v9292_v49  ;;  %v9332_v49 = vld [vmem:[%s11789_s1 + $0xbb8] sm:$0xff]  }
 0x13e   :  { %8512 = vmatpush3.bf16.msra.mxu1 %v9291_v48  ;;  %v9331_v48 = vld [vmem:[%s11789_s1 + $0xb38] sm:$0xff]  }
 0x13f   :  { %8513 = vmatprep.subr.bf16.mxu1 %v9293_v50  ;;  %v1619_v50 = vcombine.high %v1597_v43, %v1597_v43 }
 0x140   :  { %8492 = vmatpush3.bf16.msra.mxu0 %v9294_v51  ;;  %v9333_v51 = vld [vmem:[%s11789_s1 + $0xb70] sm:$0xff]  }
 0x141   :  { %8521 = vmatprep.subr.bf16.mxu0 %v9297_v54 }
 0x142   :  { %8514 = vmatpush3.bf16.msra.mxu1 %v9295_v52  ;;  %v9334_v52 = vld [vmem:[%s11789_s1 + $0xbf0] sm:$0xff]  }
 0x143   :  { %v8229_v61 = vpop.f32.mrf.mxu0  ;;  %6492 = vmatmul.mubr.bf16.vlgmr.msra.gmra.mxu0 %v1555_v53  ;;  %8543 = vmatprep.subr.bf16.mxu1 %v9298_v55  ;;  %v1622_v53 = vcombine.high %v1618_v47, %v1618_v47  ;;  %v9335_v55 = vld [vmem:[%s11789_s1 + $0xb30] sm:$0xff]  }
 0x144   :  { %8522 = vmatpush3.bf16.msra.mxu0 %v9299_v56  ;;  %6571 = vmatprep.mubr.bf16.mxu0 %v1611_v40  ;;  %v9336_v56 = vld [vmem:[%s11789_s1 + $0xbb0] sm:$0xff]  }
 0x145   :  { %v8251_v0 = vpop.f32.mrf.mxu1  ;;  %6532 = vmatmul.mubr.bf16.vlgmr.msra.gmra.mxu1 %v1571_v58  ;;  %v8230_v1 = vpop.f32.mrf.mxu0  ;;  %8523 = vmatprep.subr.bf16.mxu0 %v9301_v59  ;;  %v9337_v59 = vld [vmem:[%s11789_s1 + $0xb68] sm:$0xff]  }
 0x146   :  { %8544 = vmatpush3.bf16.msra.mxu1 %v9300_v57  ;;  %v8231_v3 = vadd.f32 %v8230_v1, %v8229_v61  ;;  %6611 = vmatprep.mubr.bf16.mxu1 %v1621_v45  ;;  %v9338_v61 = vld [vmem:[%s11789_s1 + $0xbe8] sm:$0xff]  }
 0x147   :  { %v8252_v5 = vpop.f32.mrf.mxu1  ;;  %v8232_v6 = vpop.f32.mrf.mxu0  ;;  %8545 = vmatprep.subr.bf16.mxu1 %v9302_v60 }
 0x148   :  { %v6014_v8 = vadd.f32 %v8231_v3, %v10660_v31  ;;  %v8253_v9 = vadd.f32 %v8252_v5, %v8251_v0  ;;  %8524 = vmatpush3.bf16.msra.mxu0 %v9303_v62  ;;  %v9324_v31 = vld [vmem:[%s11789_s1 + $0xa88] sm:$0xff]   ;;  %v9341_v6 = vld [vmem:[%s11789_s1 + $0xb60] sm:$0xff]  }
 0x149   :  { %v8254_v11 = vpop.f32.mrf.mxu1  ;;  %v8233_v12 = vpop.f32.mrf.mxu0  ;;  %8525 = vmatprep.subr.bf16.mxu0 %v9305_v2  ;;  %v9339_v0 = vld [vmem:[%s11789_s1 + $0xb28] sm:$0xff]  }
 0x14a   :  { %v10761_v14 = vadd.f32 %v8253_v9, %v6014_v8  ;;  %8546 = vmatpush3.bf16.msra.mxu1 %v9304_v63  ;;  %v9340_v3 = vld [vmem:[%s11789_s1 + $0xba8] sm:$0xff]   ;;  %v9342_v8 = vld [vmem:[%s11789_s1 + $0xbe0] sm:$0xff]   ;;  %v9345_v12 = vld [vmem:[%s11789_s1 + $0xb58] sm:$0xff]  }
 0x14b   :  { %v8255_v16 = vpop.f32.mrf.mxu1  ;;  %8547 = vmatprep.subr.bf16.mxu1 %v9306_v4  ;;  %v9344_v11 = vld [vmem:[%s11789_s1 + $0xba0] sm:$0xff]  }
 0x14c   :  { %8526 = vmatpush3.bf16.msra.mxu0 %v9307_v7  ;;  %v9349_v16 = vld [vmem:[%s11789_s1 + $0xb50] sm:$0xff]  }
 0x14d   :  { %8527 = vmatprep.subr.bf16.mxu0 %v9309_v13  ;;  %v9346_v13 = vld [vmem:[%s11789_s1 + $0xbd8] sm:$0xff]  }
 0x14e   :  { %8548 = vmatpush3.bf16.msra.mxu1 %v9308_v10  ;;  %v9343_v10 = vld [vmem:[%s11789_s1 + $0xb20] sm:$0xff]  }
 0x14f   :  { %8549 = vmatprep.subr.bf16.mxu1 %v9310_v15  ;;  %v9348_v15 = vld [vmem:[%s11789_s1 + $0xb98] sm:$0xff]  }
 0x150   :  { %8528 = vmatpush3.bf16.msra.mxu0 %v9311_v17  ;;  %v9350_v17 = vld [vmem:[%s11789_s1 + $0xbd0] sm:$0xff]  }
 0x151   :  { %8529 = vmatprep.subr.bf16.mxu0 %v9313_v19  ;;  %v9352_v19 = vld [vmem:[%s11789_s1 + $0xb90] sm:$0xff]  }
 0x152   :  { %8550 = vmatpush3.bf16.msra.mxu1 %v9312_v18  ;;  %v9351_v18 = vld [vmem:[%s11789_s1 + $0xb10] sm:$0xff]  }
 0x153   :  { %8551 = vmatprep.subr.bf16.mxu1 %v9314_v20  ;;  %v9353_v20 = vld [vmem:[%s11789_s1 + $0xb48] sm:$0xff]  }
 0x154   :  { %8530 = vmatpush3.bf16.msra.mxu0 %v9315_v21  ;;  %v9354_v21 = vld [vmem:[%s11789_s1 + $0xbc8] sm:$0xff]  }
 0x155   :  { %8531 = vmatprep.subr.bf16.mxu0 %v9317_v23  ;;  %v9356_v23 = vld [vmem:[%s11789_s1 + $0xb88] sm:$0xff]  }
 0x156   :  { %8552 = vmatpush3.bf16.msra.mxu1 %v9316_v22  ;;  %v9355_v22 = vld [vmem:[%s11789_s1 + $0xb08] sm:$0xff]  }
 0x157   :  { %8553 = vmatprep.subr.bf16.mxu1 %v9318_v24  ;;  %v9357_v24 = vld [vmem:[%s11789_s1 + $0xb40] sm:$0xff]  }
 0x158   :  { %8532 = vmatpush3.bf16.msra.mxu0 %v9319_v25  ;;  %v9358_v25 = vld [vmem:[%s11789_s1 + $0xbc0] sm:$0xff]  }
 0x159   :  { %8533 = vmatprep.subr.bf16.mxu0 %v9321_v27  ;;  %v9360_v27 = vld [vmem:[%s11789_s1 + $0xb80] sm:$0xff]  }
 0x15a   :  { %8554 = vmatpush3.bf16.msra.mxu1 %v9320_v26  ;;  %v9359_v26 = vld [vmem:[%s11789_s1 + $0xb00] sm:$0xff]  }
 0x15b   :  { %8555 = vmatprep.subr.bf16.mxu1 %v9322_v28  ;;  %v1604_v28 = vrot.slane %v10819_v37, %v9783_v41  ;;  %v9368_v37 = vld [vmem:[%s11789_s1 + $0xc30] sm:$0xff]  }
 0x15c   :  { %8534 = vmatpush3.bf16.msra.mxu0 %v9323_v29  ;;  %v9362_v29 = vld [vmem:[%s11789_s1 + $0xc78] sm:$0xff]  }
 0x15d   :  { %8535 = vmatprep.subr.bf16.mxu0 %v9325_v34  ;;  %v1620_v33 = vcombine.high %v1604_v28, %v1604_v28  ;;  %v9366_v34 = vld [vmem:[%s11789_s1 + $0xc70] sm:$0xff]  }
 0x15e   :  { %8556 = vmatpush3.bf16.msra.mxu1 %v9324_v31  ;;  %v9364_v31 = vld [vmem:[%s11789_s1 + $0xc38] sm:$0xff]  }
 0x15f   :  { %8557 = vmatprep.subr.bf16.mxu1 %v9326_v35  ;;  %v9367_v35 = vld [vmem:[%s11789_s1 + $0xcf0] sm:$0xff]  }
 0x160   :  { %8536 = vmatpush3.bf16.msra.mxu0 %v9327_v38  ;;  %v9369_v38 = vld [vmem:[%s11789_s1 + $0xcb0] sm:$0xff]  }
 0x161   :  { %8565 = vmatprep.subr.bf16.mxu0 %v9329_v44  ;;  %v9371_v44 = vld [vmem:[%s11789_s1 + $0xce8] sm:$0xff]  }
 0x162   :  { %8558 = vmatpush3.bf16.msra.mxu1 %v9328_v39 }
 0x163   :  { %v8273_v54 = vpop.f32.mrf.mxu0  ;;  %6572 = vmatmul.mubr.bf16.vlgmr.msra.gmra.mxu0 %v1597_v43  ;;  %8587 = vmatprep.subr.bf16.mxu1 %v9330_v46 }
 0x164   :  { %8566 = vmatpush3.bf16.msra.mxu0 %v9331_v48  ;;  %6651 = vmatprep.mubr.bf16.mxu0 %v1618_v47  ;;  %v9372_v47 = vld [vmem:[%s11789_s1 + $0xc28] sm:$0xff]  }
 0x165   :  { %v8295_v57 = vpop.f32.mrf.mxu1  ;;  %6612 = vmatmul.mubr.bf16.vlgmr.msra.gmra.mxu1 %v1619_v50  ;;  %v8274_v58 = vpop.f32.mrf.mxu0  ;;  %8567 = vmatprep.subr.bf16.mxu0 %v9333_v51  ;;  %v9373_v50 = vld [vmem:[%s11789_s1 + $0xca8] sm:$0xff]  }
 0x166   :  { %8588 = vmatpush3.bf16.msra.mxu1 %v9332_v49  ;;  %v8275_v60 = vadd.f32 %v8274_v58, %v8273_v54  ;;  %6691 = vmatprep.mubr.bf16.mxu1 %v1622_v53  ;;  %v9374_v53 = vld [vmem:[%s11789_s1 + $0xc60] sm:$0xff]  }
 0x167   :  { %v8296_v62 = vpop.f32.mrf.mxu1  ;;  %v8276_v63 = vpop.f32.mrf.mxu0  ;;  %8589 = vmatprep.subr.bf16.mxu1 %v9334_v52  ;;  %v9377_v58 = vld [vmem:[%s11789_s1 + $0xca0] sm:$0xff]  }
 0x168   :  { %v6094_v1 = vadd.f32 %v8275_v60, %v10761_v14  ;;  %v8297_v2 = vadd.f32 %v8296_v62, %v8295_v57  ;;  %8568 = vmatpush3.bf16.msra.mxu0 %v9335_v55  ;;  %v9347_v14 = vld [vmem:[%s11789_s1 + $0xb18] sm:$0xff]   ;;  %v9375_v55 = vld [vmem:[%s11789_s1 + $0xce0] sm:$0xff]   ;;  %v9382_v63 = vld [vmem:[%s11789_s1 + $0xc50] sm:$0xff]  }
 0x169   :  { %v8298_v4 = vpop.f32.mrf.mxu1  ;;  %v8277_v5 = vpop.f32.mrf.mxu0  ;;  %8569 = vmatprep.subr.bf16.mxu0 %v9337_v59  ;;  %v9376_v57 = vld [vmem:[%s11789_s1 + $0xc20] sm:$0xff]   ;;  %v9378_v59 = vld [vmem:[%s11789_s1 + $0xc58] sm:$0xff]  }
 0x16a   :  { %v10872_v7 = vadd.f32 %v8297_v2, %v6094_v1  ;;  %8590 = vmatpush3.bf16.msra.mxu1 %v9336_v56  ;;  %v9379_v60 = vld [vmem:[%s11789_s1 + $0xcd8] sm:$0xff]   ;;  %v9384_v1 = vld [vmem:[%s11789_s1 + $0xc10] sm:$0xff]   ;;  %v9387_v4 = vld [vmem:[%s11789_s1 + $0xcc8] sm:$0xff]  }
 0x16b   :  { %v8299_v9 = vpop.f32.mrf.mxu1  ;;  %8591 = vmatprep.subr.bf16.mxu1 %v9338_v61  ;;  %v9380_v61 = vld [vmem:[%s11789_s1 + $0xc18] sm:$0xff]   ;;  %v9385_v2 = vld [vmem:[%s11789_s1 + $0xc90] sm:$0xff]   ;;  %v9388_v5 = vld [vmem:[%s11789_s1 + $0xc08] sm:$0xff]  }
 0x16c   :  { %8570 = vmatpush3.bf16.msra.mxu0 %v9339_v0  ;;  %v9381_v62 = vld [vmem:[%s11789_s1 + $0xc98] sm:$0xff]   ;;  %v9383_v0 = vld [vmem:[%s11789_s1 + $0xcd0] sm:$0xff]  }
 0x16d   :  { %8571 = vmatprep.subr.bf16.mxu0 %v9341_v6  ;;  %v28_v6 = vld [vmem:[%s11788_s0 + $0x30] sm:$0xff] }
 0x16e   :  { %8592 = vmatpush3.bf16.msra.mxu1 %v9340_v3  ;;  %v9386_v3 = vld [vmem:[%s11789_s1 + $0xc48] sm:$0xff]   ;;  %v1623_v9 = vcombine.high %v28_v6, %v28_v6 }
 0x16f   :  { %8593 = vmatprep.subr.bf16.mxu1 %v9342_v8  ;;  %v1630_v8 = vrot.slane %v28_v6, %v9783_v41  ;;  %v9428_v6 = vld [vmem:[%s11789_s1 + $0xef8] sm:$0xff]  }
 0x170   :  { %8572 = vmatpush3.bf16.msra.mxu0 %v9343_v10  ;;  %v9390_v10 = vld [vmem:[%s11789_s1 + $0xc40] sm:$0xff]  }
 0x171   :  { %8573 = vmatprep.subr.bf16.mxu0 %v9345_v12  ;;  %v1638_v12 = vcombine.high %v1630_v8, %v1630_v8 }
 0x172   :  { %8594 = vmatpush3.bf16.msra.mxu1 %v9344_v11  ;;  %v9391_v11 = vld [vmem:[%s11789_s1 + $0xcc0] sm:$0xff]  }
 0x173   :  { %8595 = vmatprep.subr.bf16.mxu1 %v9346_v13  ;;  %v11031_v13 = vrot.slane %v1623_v9, %v9783_v41 }
 0x174   :  { %8574 = vmatpush3.bf16.msra.mxu0 %v9347_v14  ;;  %v9392_v14 = vld [vmem:[%s11789_s1 + $0xc00] sm:$0xff]  }
 0x175   :  { %8575 = vmatprep.subr.bf16.mxu0 %v9349_v16  ;;  %v1660_v16 = vrot.slane %v1638_v12, %v9783_v41 }
 0x176   :  { %8596 = vmatpush3.bf16.msra.mxu1 %v9348_v15  ;;  %v9393_v15 = vld [vmem:[%s11789_s1 + $0xc80] sm:$0xff]  }
 0x177   :  { %8597 = vmatprep.subr.bf16.mxu1 %v9350_v17  ;;  %v1639_v17 = vcombine.high %v11031_v13, %v11031_v13 }
 0x178   :  { %8576 = vmatpush3.bf16.msra.mxu0 %v9351_v18  ;;  %v1646_v18 = vrot.slane %v1630_v8, %v9783_v41  ;;  %v9430_v8 = vld [vmem:[%s11789_s1 + $0xeb8] sm:$0xff]  }
 0x179   :  { %8577 = vmatprep.subr.bf16.mxu0 %v9353_v20  ;;  %v1670_v20 = vcombine.high %v1660_v16, %v1660_v16 }
 0x17a   :  { %8598 = vmatpush3.bf16.msra.mxu1 %v9352_v19  ;;  %v9394_v19 = vld [vmem:[%s11789_s1 + $0xd78] sm:$0xff]  }
 0x17b   :  { %8599 = vmatprep.subr.bf16.mxu1 %v9354_v21  ;;  %v9395_v21 = vld [vmem:[%s11789_s1 + $0xdf8] sm:$0xff]  }
 0x17c   :  { %8578 = vmatpush3.bf16.msra.mxu0 %v9355_v22  ;;  %v1667_v22 = vrot.slane %v1639_v17, %v9783_v41  ;;  %v9435_v17 = vld [vmem:[%s11789_s1 + $0xe68] sm:$0xff]  }
 0x17d   :  { %8579 = vmatprep.subr.bf16.mxu0 %v9357_v24  ;;  %v9397_v24 = vld [vmem:[%s11789_s1 + $0xdb8] sm:$0xff]  }
 0x17e   :  { %8600 = vmatpush3.bf16.msra.mxu1 %v9356_v23  ;;  %v9396_v23 = vld [vmem:[%s11789_s1 + $0xd38] sm:$0xff]  }
 0x17f   :  { %8601 = vmatprep.subr.bf16.mxu1 %v9358_v25  ;;  %v1668_v25 = vcombine.high %v1646_v18, %v1646_v18 }
 0x180   :  { %8580 = vmatpush3.bf16.msra.mxu0 %v9359_v26  ;;  %v9398_v26 = vld [vmem:[%s11789_s1 + $0xd70] sm:$0xff]  }
 0x181   :  { %8609 = vmatprep.subr.bf16.mxu0 %v9362_v29 }
 0x182   :  { %8602 = vmatpush3.bf16.msra.mxu1 %v9360_v27  ;;  %v9399_v27 = vld [vmem:[%s11789_s1 + $0xdf0] sm:$0xff]  }
 0x183   :  { %v8317_v36 = vpop.f32.mrf.mxu0  ;;  %6652 = vmatmul.mubr.bf16.vlgmr.msra.gmra.mxu0 %v1604_v28  ;;  %8631 = vmatprep.subr.bf16.mxu1 %v9363_v30  ;;  %v1671_v28 = vcombine.high %v1667_v22, %v1667_v22  ;;  %v9400_v30 = vld [vmem:[%s11789_s1 + $0xd30] sm:$0xff]  }
 0x184   :  { %8610 = vmatpush3.bf16.msra.mxu0 %v9364_v31  ;;  %6731 = vmatprep.mubr.bf16.mxu0 %v1660_v16  ;;  %v9401_v31 = vld [vmem:[%s11789_s1 + $0xdb0] sm:$0xff]  }
 0x185   :  { %v8339_v39 = vpop.f32.mrf.mxu1  ;;  %6692 = vmatmul.mubr.bf16.vlgmr.msra.gmra.mxu1 %v1620_v33  ;;  %v8318_v40 = vpop.f32.mrf.mxu0  ;;  %8611 = vmatprep.subr.bf16.mxu0 %v9366_v34  ;;  %v9402_v34 = vld [vmem:[%s11789_s1 + $0xd68] sm:$0xff]  }
 0x186   :  { %8632 = vmatpush3.bf16.msra.mxu1 %v9365_v32  ;;  %v8319_v43 = vadd.f32 %v8318_v40, %v8317_v36  ;;  %6771 = vmatprep.mubr.bf16.mxu1 %v1670_v20  ;;  %v9403_v36 = vld [vmem:[%s11789_s1 + $0xde8] sm:$0xff]  }
 0x187   :  { %v8340_v45 = vpop.f32.mrf.mxu1  ;;  %v8320_v46 = vpop.f32.mrf.mxu0  ;;  %8633 = vmatprep.subr.bf16.mxu1 %v9367_v35 }
 0x188   :  { %v6174_v48 = vadd.f32 %v8319_v43, %v10872_v7  ;;  %v8341_v49 = vadd.f32 %v8340_v45, %v8339_v39  ;;  %8612 = vmatpush3.bf16.msra.mxu0 %v9368_v37  ;;  %v9389_v7 = vld [vmem:[%s11789_s1 + $0xc88] sm:$0xff]   ;;  %v9406_v46 = vld [vmem:[%s11789_s1 + $0xd60] sm:$0xff]  }
 0x189   :  { %v8342_v51 = vpop.f32.mrf.mxu1  ;;  %v8321_v52 = vpop.f32.mrf.mxu0  ;;  %8613 = vmatprep.subr.bf16.mxu0 %v9370_v42  ;;  %v9404_v39 = vld [vmem:[%s11789_s1 + $0xd28] sm:$0xff]  }
 0x18a   :  { %v10973_v54 = vadd.f32 %v8341_v49, %v6174_v48  ;;  %8634 = vmatpush3.bf16.msra.mxu1 %v9369_v38  ;;  %v9405_v43 = vld [vmem:[%s11789_s1 + $0xda8] sm:$0xff]   ;;  %v9407_v48 = vld [vmem:[%s11789_s1 + $0xde0] sm:$0xff]   ;;  %v9410_v52 = vld [vmem:[%s11789_s1 + $0xd58] sm:$0xff]  }
 0x18b   :  { %v8343_v56 = vpop.f32.mrf.mxu1  ;;  %8635 = vmatprep.subr.bf16.mxu1 %v9371_v44  ;;  %v9409_v51 = vld [vmem:[%s11789_s1 + $0xda0] sm:$0xff]  }
 0x18c   :  { %8614 = vmatpush3.bf16.msra.mxu0 %v9372_v47  ;;  %v9414_v56 = vld [vmem:[%s11789_s1 + $0xd50] sm:$0xff]  }
 0x18d   :  { %8615 = vmatprep.subr.bf16.mxu0 %v9374_v53  ;;  %v9411_v53 = vld [vmem:[%s11789_s1 + $0xdd8] sm:$0xff]  }
 0x18e   :  { %8636 = vmatpush3.bf16.msra.mxu1 %v9373_v50  ;;  %v9408_v50 = vld [vmem:[%s11789_s1 + $0xd20] sm:$0xff]  }
 0x18f   :  { %8637 = vmatprep.subr.bf16.mxu1 %v9375_v55  ;;  %v9413_v55 = vld [vmem:[%s11789_s1 + $0xd98] sm:$0xff]  }
 0x190   :  { %8616 = vmatpush3.bf16.msra.mxu0 %v9376_v57  ;;  %v9415_v57 = vld [vmem:[%s11789_s1 + $0xdd0] sm:$0xff]  }
 0x191   :  { %8617 = vmatprep.subr.bf16.mxu0 %v9378_v59  ;;  %v9417_v59 = vld [vmem:[%s11789_s1 + $0xd90] sm:$0xff]  }
 0x192   :  { %8638 = vmatpush3.bf16.msra.mxu1 %v9377_v58  ;;  %v9416_v58 = vld [vmem:[%s11789_s1 + $0xd10] sm:$0xff]  }
 0x193   :  { %8639 = vmatprep.subr.bf16.mxu1 %v9379_v60  ;;  %v9418_v60 = vld [vmem:[%s11789_s1 + $0xd48] sm:$0xff]  }
 0x194   :  { %8618 = vmatpush3.bf16.msra.mxu0 %v9380_v61  ;;  %v9419_v61 = vld [vmem:[%s11789_s1 + $0xdc8] sm:$0xff]  }
 0x195   :  { %8619 = vmatprep.subr.bf16.mxu0 %v9382_v63  ;;  %v9421_v63 = vld [vmem:[%s11789_s1 + $0xd88] sm:$0xff]  }
 0x196   :  { %8640 = vmatpush3.bf16.msra.mxu1 %v9381_v62  ;;  %v9420_v62 = vld [vmem:[%s11789_s1 + $0xd08] sm:$0xff]  }
 0x197   :  { %8641 = vmatprep.subr.bf16.mxu1 %v9383_v0  ;;  %v9422_v0 = vld [vmem:[%s11789_s1 + $0xd40] sm:$0xff]  }
 0x198   :  { %8620 = vmatpush3.bf16.msra.mxu0 %v9384_v1  ;;  %v9423_v1 = vld [vmem:[%s11789_s1 + $0xdc0] sm:$0xff]  }
 0x199   :  { %8621 = vmatprep.subr.bf16.mxu0 %v9386_v3  ;;  %v9425_v3 = vld [vmem:[%s11789_s1 + $0xd80] sm:$0xff]  }
 0x19a   :  { %8642 = vmatpush3.bf16.msra.mxu1 %v9385_v2  ;;  %v9424_v2 = vld [vmem:[%s11789_s1 + $0xd00] sm:$0xff]  }
 0x19b   :  { %8643 = vmatprep.subr.bf16.mxu1 %v9387_v4  ;;  %v1653_v4 = vrot.slane %v11031_v13, %v9783_v41  ;;  %v9433_v13 = vld [vmem:[%s11789_s1 + $0xe30] sm:$0xff]  }
 0x19c   :  { %8622 = vmatpush3.bf16.msra.mxu0 %v9388_v5  ;;  %v9427_v5 = vld [vmem:[%s11789_s1 + $0xe78] sm:$0xff]  }
 0x19d   :  { %8623 = vmatprep.subr.bf16.mxu0 %v9390_v10  ;;  %v1669_v9 = vcombine.high %v1653_v4, %v1653_v4  ;;  %v9431_v10 = vld [vmem:[%s11789_s1 + $0xe70] sm:$0xff]  }
 0x19e   :  { %8644 = vmatpush3.bf16.msra.mxu1 %v9389_v7  ;;  %v9429_v7 = vld [vmem:[%s11789_s1 + $0xe38] sm:$0xff]  }
 0x19f   :  { %8645 = vmatprep.subr.bf16.mxu1 %v9391_v11  ;;  %v9432_v11 = vld [vmem:[%s11789_s1 + $0xef0] sm:$0xff]  }
 0x1a0   :  { %8624 = vmatpush3.bf16.msra.mxu0 %v9392_v14  ;;  %v9434_v14 = vld [vmem:[%s11789_s1 + $0xeb0] sm:$0xff]  }
 0x1a1   :  { %8653 = vmatprep.subr.bf16.mxu0 %v9394_v19  ;;  %v9436_v19 = vld [vmem:[%s11789_s1 + $0xee8] sm:$0xff]  }
 0x1a2   :  { %8646 = vmatpush3.bf16.msra.mxu1 %v9393_v15 }
 0x1a3   :  { %v8361_v29 = vpop.f32.mrf.mxu0  ;;  %6732 = vmatmul.mubr.bf16.vlgmr.msra.gmra.mxu0 %v1646_v18  ;;  %8675 = vmatprep.subr.bf16.mxu1 %v9395_v21 }
 0x1a4   :  { %8654 = vmatpush3.bf16.msra.mxu0 %v9396_v23  ;;  %6811 = vmatprep.mubr.bf16.mxu0 %v1667_v22  ;;  %v9437_v22 = vld [vmem:[%s11789_s1 + $0xe28] sm:$0xff]  }
 0x1a5   :  { %v8383_v32 = vpop.f32.mrf.mxu1  ;;  %6772 = vmatmul.mubr.bf16.vlgmr.msra.gmra.mxu1 %v1668_v25  ;;  %v8362_v33 = vpop.f32.mrf.mxu0  ;;  %8655 = vmatprep.subr.bf16.mxu0 %v9398_v26  ;;  %v9438_v25 = vld [vmem:[%s11789_s1 + $0xea8] sm:$0xff]  }
 0x1a6   :  { %8676 = vmatpush3.bf16.msra.mxu1 %v9397_v24  ;;  %v8363_v35 = vadd.f32 %v8362_v33, %v8361_v29  ;;  %6851 = vmatprep.mubr.bf16.mxu1 %v1671_v28  ;;  %v9439_v28 = vld [vmem:[%s11789_s1 + $0xe60] sm:$0xff]  }
 0x1a7   :  { %v8384_v37 = vpop.f32.mrf.mxu1  ;;  %v8364_v38 = vpop.f32.mrf.mxu0  ;;  %8677 = vmatprep.subr.bf16.mxu1 %v9399_v27  ;;  %v9442_v33 = vld [vmem:[%s11789_s1 + $0xea0] sm:$0xff]  }
 0x1a8   :  { %v6254_v40 = vadd.f32 %v8363_v35, %v10973_v54  ;;  %v8385_v42 = vadd.f32 %v8384_v37, %v8383_v32  ;;  %8656 = vmatpush3.bf16.msra.mxu0 %v9400_v30  ;;  %v9412_v54 = vld [vmem:[%s11789_s1 + $0xd18] sm:$0xff]   ;;  %v9440_v30 = vld [vmem:[%s11789_s1 + $0xee0] sm:$0xff]   ;;  %v9447_v38 = vld [vmem:[%s11789_s1 + $0xe50] sm:$0xff]  }
 0x1a9   :  { %v8386_v44 = vpop.f32.mrf.mxu1  ;;  %v8365_v45 = vpop.f32.mrf.mxu0  ;;  %8657 = vmatprep.subr.bf16.mxu0 %v9402_v34  ;;  %v9441_v32 = vld [vmem:[%s11789_s1 + $0xe20] sm:$0xff]   ;;  %v9443_v34 = vld [vmem:[%s11789_s1 + $0xe58] sm:$0xff]  }
 0x1aa   :  { %v11084_v47 = vadd.f32 %v8385_v42, %v6254_v40  ;;  %8678 = vmatpush3.bf16.msra.mxu1 %v9401_v31  ;;  %v9444_v35 = vld [vmem:[%s11789_s1 + $0xed8] sm:$0xff]   ;;  %v9449_v40 = vld [vmem:[%s11789_s1 + $0xe10] sm:$0xff]   ;;  %v9452_v44 = vld [vmem:[%s11789_s1 + $0xec8] sm:$0xff]  }
 0x1ab   :  { %v8387_v49 = vpop.f32.mrf.mxu1  ;;  %8679 = vmatprep.subr.bf16.mxu1 %v9403_v36  ;;  %v9445_v36 = vld [vmem:[%s11789_s1 + $0xe18] sm:$0xff]   ;;  %v9450_v42 = vld [vmem:[%s11789_s1 + $0xe90] sm:$0xff]   ;;  %v9453_v45 = vld [vmem:[%s11789_s1 + $0xe08] sm:$0xff]  }
 0x1ac   :  { %8658 = vmatpush3.bf16.msra.mxu0 %v9404_v39  ;;  %v9446_v37 = vld [vmem:[%s11789_s1 + $0xe98] sm:$0xff]   ;;  %v9448_v39 = vld [vmem:[%s11789_s1 + $0xed0] sm:$0xff]  }
 0x1ad   :  { %8659 = vmatprep.subr.bf16.mxu0 %v9406_v46  ;;  %v29_v46 = vld [vmem:[%s11788_s0 + $0x38] sm:$0xff] }
 0x1ae   :  { %8680 = vmatpush3.bf16.msra.mxu1 %v9405_v43  ;;  %v9451_v43 = vld [vmem:[%s11789_s1 + $0xe48] sm:$0xff]   ;;  %v1672_v49 = vcombine.high %v29_v46, %v29_v46 }
 0x1af   :  { %8681 = vmatprep.subr.bf16.mxu1 %v9407_v48  ;;  %v1679_v48 = vrot.slane %v29_v46, %v9783_v41  ;;  %v9493_v46 = vld [vmem:[%s11789_s1 + $0x10f8] sm:$0xff]  }
 0x1b0   :  { %8660 = vmatpush3.bf16.msra.mxu0 %v9408_v50  ;;  %v9455_v50 = vld [vmem:[%s11789_s1 + $0xe40] sm:$0xff]  }
 0x1b1   :  { %8661 = vmatprep.subr.bf16.mxu0 %v9410_v52  ;;  %v1687_v52 = vcombine.high %v1679_v48, %v1679_v48 }
 0x1b2   :  { %8682 = vmatpush3.bf16.msra.mxu1 %v9409_v51  ;;  %v9456_v51 = vld [vmem:[%s11789_s1 + $0xec0] sm:$0xff]  }
 0x1b3   :  { %8683 = vmatprep.subr.bf16.mxu1 %v9411_v53  ;;  %v11243_v53 = vrot.slane %v1672_v49, %v9783_v41 }
 0x1b4   :  { %8662 = vmatpush3.bf16.msra.mxu0 %v9412_v54  ;;  %v9457_v54 = vld [vmem:[%s11789_s1 + $0xe00] sm:$0xff]  }
 0x1b5   :  { %8663 = vmatprep.subr.bf16.mxu0 %v9414_v56  ;;  %v1709_v56 = vrot.slane %v1687_v52, %v9783_v41 }
 0x1b6   :  { %8684 = vmatpush3.bf16.msra.mxu1 %v9413_v55  ;;  %v9458_v55 = vld [vmem:[%s11789_s1 + $0xe80] sm:$0xff]  }
 0x1b7   :  { %8685 = vmatprep.subr.bf16.mxu1 %v9415_v57  ;;  %v1688_v57 = vcombine.high %v11243_v53, %v11243_v53 }
 0x1b8   :  { %8664 = vmatpush3.bf16.msra.mxu0 %v9416_v58  ;;  %v1695_v58 = vrot.slane %v1679_v48, %v9783_v41  ;;  %v9495_v48 = vld [vmem:[%s11789_s1 + $0x10b8] sm:$0xff]  }
 0x1b9   :  { %8665 = vmatprep.subr.bf16.mxu0 %v9418_v60  ;;  %v1719_v60 = vcombine.high %v1709_v56, %v1709_v56 }
 0x1ba   :  { %8686 = vmatpush3.bf16.msra.mxu1 %v9417_v59  ;;  %v9459_v59 = vld [vmem:[%s11789_s1 + $0xf78] sm:$0xff]  }
 0x1bb   :  { %8687 = vmatprep.subr.bf16.mxu1 %v9419_v61  ;;  %v9460_v61 = vld [vmem:[%s11789_s1 + $0xff8] sm:$0xff]  }
 0x1bc   :  { %8666 = vmatpush3.bf16.msra.mxu0 %v9420_v62  ;;  %v1716_v62 = vrot.slane %v1688_v57, %v9783_v41  ;;  %v9500_v57 = vld [vmem:[%s11789_s1 + $0x1068] sm:$0xff]  }
 0x1bd   :  { %8667 = vmatprep.subr.bf16.mxu0 %v9422_v0  ;;  %v9462_v0 = vld [vmem:[%s11789_s1 + $0xfb8] sm:$0xff]  }
 0x1be   :  { %8688 = vmatpush3.bf16.msra.mxu1 %v9421_v63  ;;  %v9461_v63 = vld [vmem:[%s11789_s1 + $0xf38] sm:$0xff]  }
 0x1bf   :  { %8689 = vmatprep.subr.bf16.mxu1 %v9423_v1  ;;  %v1717_v1 = vcombine.high %v1695_v58, %v1695_v58 }
 0x1c0   :  { %8668 = vmatpush3.bf16.msra.mxu0 %v9424_v2  ;;  %v9463_v2 = vld [vmem:[%s11789_s1 + $0xf70] sm:$0xff]  }
 0x1c1   :  { %8697 = vmatprep.subr.bf16.mxu0 %v9427_v5 }
 0x1c2   :  { %8690 = vmatpush3.bf16.msra.mxu1 %v9425_v3  ;;  %v9464_v3 = vld [vmem:[%s11789_s1 + $0xff0] sm:$0xff]  }
 0x1c3   :  { %v8405_v12 = vpop.f32.mrf.mxu0  ;;  %6812 = vmatmul.mubr.bf16.vlgmr.msra.gmra.mxu0 %v1653_v4  ;;  %8719 = vmatprep.subr.bf16.mxu1 %v9428_v6  ;;  %v1720_v4 = vcombine.high %v1716_v62, %v1716_v62  ;;  %v9465_v6 = vld [vmem:[%s11789_s1 + $0xf30] sm:$0xff]  }
 0x1c4   :  { %8698 = vmatpush3.bf16.msra.mxu0 %v9429_v7  ;;  %6891 = vmatprep.mubr.bf16.mxu0 %v1709_v56  ;;  %v9466_v7 = vld [vmem:[%s11789_s1 + $0xfb0] sm:$0xff]  }
 0x1c5   :  { %v8427_v15 = vpop.f32.mrf.mxu1  ;;  %6852 = vmatmul.mubr.bf16.vlgmr.msra.gmra.mxu1 %v1669_v9  ;;  %v8406_v16 = vpop.f32.mrf.mxu0  ;;  %8699 = vmatprep.subr.bf16.mxu0 %v9431_v10  ;;  %v9467_v10 = vld [vmem:[%s11789_s1 + $0xf68] sm:$0xff]  }
 0x1c6   :  { %8720 = vmatpush3.bf16.msra.mxu1 %v9430_v8  ;;  %v8407_v18 = vadd.f32 %v8406_v16, %v8405_v12  ;;  %6931 = vmatprep.mubr.bf16.mxu1 %v1719_v60  ;;  %v9468_v12 = vld [vmem:[%s11789_s1 + $0xfe8] sm:$0xff]  }
 0x1c7   :  { %v8428_v20 = vpop.f32.mrf.mxu1  ;;  %v8408_v21 = vpop.f32.mrf.mxu0  ;;  %8721 = vmatprep.subr.bf16.mxu1 %v9432_v11 }
 0x1c8   :  { %v6334_v23 = vadd.f32 %v8407_v18, %v11084_v47  ;;  %v8429_v24 = vadd.f32 %v8428_v20, %v8427_v15  ;;  %8700 = vmatpush3.bf16.msra.mxu0 %v9433_v13  ;;  %v9454_v47 = vld [vmem:[%s11789_s1 + $0xe88] sm:$0xff]   ;;  %v9471_v21 = vld [vmem:[%s11789_s1 + $0xf60] sm:$0xff]  }
 0x1c9   :  { %v8430_v26 = vpop.f32.mrf.mxu1  ;;  %v8409_v27 = vpop.f32.mrf.mxu0  ;;  %8701 = vmatprep.subr.bf16.mxu0 %v9435_v17  ;;  %v9469_v15 = vld [vmem:[%s11789_s1 + $0xf28] sm:$0xff]  }
 0x1ca   :  { %v11185_v29 = vadd.f32 %v8429_v24, %v6334_v23  ;;  %8722 = vmatpush3.bf16.msra.mxu1 %v9434_v14  ;;  %v9470_v18 = vld [vmem:[%s11789_s1 + $0xfa8] sm:$0xff]   ;;  %v9472_v23 = vld [vmem:[%s11789_s1 + $0xfe0] sm:$0xff]   ;;  %v9475_v27 = vld [vmem:[%s11789_s1 + $0xf58] sm:$0xff]  }
 0x1cb   :  { %v8431_v31 = vpop.f32.mrf.mxu1  ;;  %8723 = vmatprep.subr.bf16.mxu1 %v9436_v19  ;;  %v9474_v26 = vld [vmem:[%s11789_s1 + $0xfa0] sm:$0xff]  }
 0x1cc   :  { %8702 = vmatpush3.bf16.msra.mxu0 %v9437_v22  ;;  %v9479_v31 = vld [vmem:[%s11789_s1 + $0xf50] sm:$0xff]  }
 0x1cd   :  { %8703 = vmatprep.subr.bf16.mxu0 %v9439_v28  ;;  %v9476_v28 = vld [vmem:[%s11789_s1 + $0xfd8] sm:$0xff]  }
 0x1ce   :  { %8724 = vmatpush3.bf16.msra.mxu1 %v9438_v25  ;;  %v9473_v25 = vld [vmem:[%s11789_s1 + $0xf20] sm:$0xff]  }
 0x1cf   :  { %8725 = vmatprep.subr.bf16.mxu1 %v9440_v30  ;;  %v9478_v30 = vld [vmem:[%s11789_s1 + $0xf98] sm:$0xff]  }
 0x1d0   :  { %8704 = vmatpush3.bf16.msra.mxu0 %v9441_v32  ;;  %v9480_v32 = vld [vmem:[%s11789_s1 + $0xfd0] sm:$0xff]  }
 0x1d1   :  { %8705 = vmatprep.subr.bf16.mxu0 %v9443_v34  ;;  %v9482_v34 = vld [vmem:[%s11789_s1 + $0xf90] sm:$0xff]  }
 0x1d2   :  { %8726 = vmatpush3.bf16.msra.mxu1 %v9442_v33  ;;  %v9481_v33 = vld [vmem:[%s11789_s1 + $0xf10] sm:$0xff]  }
 0x1d3   :  { %8727 = vmatprep.subr.bf16.mxu1 %v9444_v35  ;;  %v9483_v35 = vld [vmem:[%s11789_s1 + $0xf48] sm:$0xff]  }
 0x1d4   :  { %8706 = vmatpush3.bf16.msra.mxu0 %v9445_v36  ;;  %v9484_v36 = vld [vmem:[%s11789_s1 + $0xfc8] sm:$0xff]  }
 0x1d5   :  { %8707 = vmatprep.subr.bf16.mxu0 %v9447_v38  ;;  %v9486_v38 = vld [vmem:[%s11789_s1 + $0xf88] sm:$0xff]  }
 0x1d6   :  { %8728 = vmatpush3.bf16.msra.mxu1 %v9446_v37  ;;  %v9485_v37 = vld [vmem:[%s11789_s1 + $0xf08] sm:$0xff]  }
 0x1d7   :  { %8729 = vmatprep.subr.bf16.mxu1 %v9448_v39  ;;  %v9487_v39 = vld [vmem:[%s11789_s1 + $0xf40] sm:$0xff]  }
 0x1d8   :  { %8708 = vmatpush3.bf16.msra.mxu0 %v9449_v40  ;;  %v9488_v40 = vld [vmem:[%s11789_s1 + $0xfc0] sm:$0xff]  }
 0x1d9   :  { %8709 = vmatprep.subr.bf16.mxu0 %v9451_v43  ;;  %v9490_v43 = vld [vmem:[%s11789_s1 + $0xf80] sm:$0xff]  }
 0x1da   :  { %8730 = vmatpush3.bf16.msra.mxu1 %v9450_v42  ;;  %v9489_v42 = vld [vmem:[%s11789_s1 + $0xf00] sm:$0xff]  }
 0x1db   :  { %8731 = vmatprep.subr.bf16.mxu1 %v9452_v44  ;;  %v1702_v44 = vrot.slane %v11243_v53, %v9783_v41  ;;  %v9498_v53 = vld [vmem:[%s11789_s1 + $0x1030] sm:$0xff]  }
 0x1dc   :  { %8710 = vmatpush3.bf16.msra.mxu0 %v9453_v45  ;;  %v9492_v45 = vld [vmem:[%s11789_s1 + $0x1078] sm:$0xff]  }
 0x1dd   :  { %8711 = vmatprep.subr.bf16.mxu0 %v9455_v50  ;;  %v1718_v49 = vcombine.high %v1702_v44, %v1702_v44  ;;  %v9496_v50 = vld [vmem:[%s11789_s1 + $0x1070] sm:$0xff]  }
 0x1de   :  { %8732 = vmatpush3.bf16.msra.mxu1 %v9454_v47  ;;  %v9494_v47 = vld [vmem:[%s11789_s1 + $0x1038] sm:$0xff]  }
 0x1df   :  { %8733 = vmatprep.subr.bf16.mxu1 %v9456_v51  ;;  %v9497_v51 = vld [vmem:[%s11789_s1 + $0x10f0] sm:$0xff]  }
 0x1e0   :  { %8712 = vmatpush3.bf16.msra.mxu0 %v9457_v54  ;;  %v9499_v54 = vld [vmem:[%s11789_s1 + $0x10b0] sm:$0xff]  }
 0x1e1   :  { %8741 = vmatprep.subr.bf16.mxu0 %v9459_v59  ;;  %v9501_v59 = vld [vmem:[%s11789_s1 + $0x10e8] sm:$0xff]  }
 0x1e2   :  { %8734 = vmatpush3.bf16.msra.mxu1 %v9458_v55 }
 0x1e3   :  { %v8449_v5 = vpop.f32.mrf.mxu0  ;;  %6892 = vmatmul.mubr.bf16.vlgmr.msra.gmra.mxu0 %v1695_v58  ;;  %8763 = vmatprep.subr.bf16.mxu1 %v9460_v61 }
 0x1e4   :  { %8742 = vmatpush3.bf16.msra.mxu0 %v9461_v63  ;;  %6971 = vmatprep.mubr.bf16.mxu0 %v1716_v62  ;;  %v9502_v62 = vld [vmem:[%s11789_s1 + $0x1028] sm:$0xff]  }
 0x1e5   :  { %v8471_v8 = vpop.f32.mrf.mxu1  ;;  %6932 = vmatmul.mubr.bf16.vlgmr.msra.gmra.mxu1 %v1717_v1  ;;  %v8450_v9 = vpop.f32.mrf.mxu0  ;;  %8743 = vmatprep.subr.bf16.mxu0 %v9463_v2  ;;  %v9503_v1 = vld [vmem:[%s11789_s1 + $0x10a8] sm:$0xff]  }
 0x1e6   :  { %8764 = vmatpush3.bf16.msra.mxu1 %v9462_v0  ;;  %v8451_v11 = vadd.f32 %v8450_v9, %v8449_v5  ;;  %7011 = vmatprep.mubr.bf16.mxu1 %v1720_v4  ;;  %v9504_v4 = vld [vmem:[%s11789_s1 + $0x1060] sm:$0xff]  }
 0x1e7   :  { %v8472_v13 = vpop.f32.mrf.mxu1  ;;  %v8452_v14 = vpop.f32.mrf.mxu0  ;;  %8765 = vmatprep.subr.bf16.mxu1 %v9464_v3  ;;  %v9507_v9 = vld [vmem:[%s11789_s1 + $0x10a0] sm:$0xff]  }
 0x1e8   :  { %v6414_v16 = vadd.f32 %v8451_v11, %v11185_v29  ;;  %v8473_v17 = vadd.f32 %v8472_v13, %v8471_v8  ;;  %8744 = vmatpush3.bf16.msra.mxu0 %v9465_v6  ;;  %v9477_v29 = vld [vmem:[%s11789_s1 + $0xf18] sm:$0xff]   ;;  %v9505_v6 = vld [vmem:[%s11789_s1 + $0x10e0] sm:$0xff]   ;;  %v9512_v14 = vld [vmem:[%s11789_s1 + $0x1050] sm:$0xff]  }
 0x1e9   :  { %v8474_v19 = vpop.f32.mrf.mxu1  ;;  %v8453_v20 = vpop.f32.mrf.mxu0  ;;  %8745 = vmatprep.subr.bf16.mxu0 %v9467_v10  ;;  %v9506_v8 = vld [vmem:[%s11789_s1 + $0x1020] sm:$0xff]   ;;  %v9508_v10 = vld [vmem:[%s11789_s1 + $0x1058] sm:$0xff]  }
 0x1ea   :  { %v11296_v22 = vadd.f32 %v8473_v17, %v6414_v16  ;;  %8766 = vmatpush3.bf16.msra.mxu1 %v9466_v7  ;;  %v9509_v11 = vld [vmem:[%s11789_s1 + $0x10d8] sm:$0xff]   ;;  %v9514_v16 = vld [vmem:[%s11789_s1 + $0x1010] sm:$0xff]   ;;  %v9517_v19 = vld [vmem:[%s11789_s1 + $0x10c8] sm:$0xff]  }
 0x1eb   :  { %v8475_v24 = vpop.f32.mrf.mxu1  ;;  %8767 = vmatprep.subr.bf16.mxu1 %v9468_v12  ;;  %v9510_v12 = vld [vmem:[%s11789_s1 + $0x1018] sm:$0xff]   ;;  %v9515_v17 = vld [vmem:[%s11789_s1 + $0x1090] sm:$0xff]   ;;  %v9518_v20 = vld [vmem:[%s11789_s1 + $0x1008] sm:$0xff]  }
 0x1ec   :  { %8746 = vmatpush3.bf16.msra.mxu0 %v9469_v15  ;;  %v9511_v13 = vld [vmem:[%s11789_s1 + $0x1098] sm:$0xff]   ;;  %v9513_v15 = vld [vmem:[%s11789_s1 + $0x10d0] sm:$0xff]  }
 0x1ed   :  { %8747 = vmatprep.subr.bf16.mxu0 %v9471_v21  ;;  %v30_v21 = vld [vmem:[%s11788_s0 + $0x40] sm:$0xff] }
 0x1ee   :  { %8768 = vmatpush3.bf16.msra.mxu1 %v9470_v18  ;;  %v9516_v18 = vld [vmem:[%s11789_s1 + $0x1048] sm:$0xff]   ;;  %v1721_v24 = vcombine.high %v30_v21, %v30_v21 }
 0x1ef   :  { %8769 = vmatprep.subr.bf16.mxu1 %v9472_v23  ;;  %v1728_v23 = vrot.slane %v30_v21, %v9783_v41  ;;  %v9558_v21 = vld [vmem:[%s11789_s1 + $0x12f8] sm:$0xff]  }
 0x1f0   :  { %8748 = vmatpush3.bf16.msra.mxu0 %v9473_v25  ;;  %v9519_v25 = vld [vmem:[%s11789_s1 + $0x1088] sm:$0xff]  }
 0x1f1   :  { %8749 = vmatprep.subr.bf16.mxu0 %v9475_v27  ;;  %v1736_v27 = vcombine.high %v1728_v23, %v1728_v23 }
 0x1f2   :  { %8770 = vmatpush3.bf16.msra.mxu1 %v9474_v26  ;;  %v9521_v26 = vld [vmem:[%s11789_s1 + $0x10c0] sm:$0xff]  }
 0x1f3   :  { %8771 = vmatprep.subr.bf16.mxu1 %v9476_v28  ;;  %v11455_v28 = vrot.slane %v1721_v24, %v9783_v41  ;;  %v9561_v24 = vld [vmem:[%s11789_s1 + $0x1270] sm:$0xff]  }
 0x1f4   :  { %8750 = vmatpush3.bf16.msra.mxu0 %v9477_v29  ;;  %v9522_v29 = vld [vmem:[%s11789_s1 + $0x1000] sm:$0xff]  }
 0x1f5   :  { %8751 = vmatprep.subr.bf16.mxu0 %v9479_v31  ;;  %v1744_v31 = vrot.slane %v1728_v23, %v9783_v41 }
 0x1f6   :  { %8772 = vmatpush3.bf16.msra.mxu1 %v9478_v30  ;;  %v1758_v30 = vrot.slane %v1736_v27, %v9783_v41  ;;  %v9562_v27 = vld [vmem:[%s11789_s1 + $0x12f0] sm:$0xff]  }
 0x1f7   :  { %8773 = vmatprep.subr.bf16.mxu1 %v9480_v32  ;;  %v9524_v32 = vld [vmem:[%s11789_s1 + $0x1178] sm:$0xff]  }
 0x1f8   :  { %8752 = vmatpush3.bf16.msra.mxu0 %v9481_v33  ;;  %v1737_v33 = vcombine.high %v11455_v28, %v11455_v28 }
 0x1f9   :  { %8753 = vmatprep.subr.bf16.mxu0 %v9483_v35  ;;  %v1768_v35 = vcombine.high %v1758_v30, %v1758_v30 }
 0x1fa   :  { %8774 = vmatpush3.bf16.msra.mxu1 %v9482_v34  ;;  %v9523_v34 = vld [vmem:[%s11789_s1 + $0x1080] sm:$0xff]  }
 0x1fb   :  { %8775 = vmatprep.subr.bf16.mxu1 %v9484_v36  ;;  %v9525_v36 = vld [vmem:[%s11789_s1 + $0x11f8] sm:$0xff]  }
 0x1fc   :  { %8754 = vmatpush3.bf16.msra.mxu0 %v9485_v37  ;;  %v1765_v37 = vrot.slane %v1737_v33, %v9783_v41  ;;  %v9564_v33 = vld [vmem:[%s11789_s1 + $0x12b0] sm:$0xff]  }
 0x1fd   :  { %8755 = vmatprep.subr.bf16.mxu0 %v9487_v39  ;;  %v1766_v39 = vcombine.high %v1744_v31, %v1744_v31 }
 0x1fe   :  { %8776 = vmatpush3.bf16.msra.mxu1 %v9486_v38  ;;  %v9526_v38 = vld [vmem:[%s11789_s1 + $0x1138] sm:$0xff]  }
 0x1ff   :  { %8777 = vmatprep.subr.bf16.mxu1 %v9488_v40  ;;  %v9528_v40 = vld [vmem:[%s11789_s1 + $0x1170] sm:$0xff]  }
 0x200   :  { %8756 = vmatpush3.bf16.msra.mxu0 %v9489_v42  ;;  %v9527_v42 = vld [vmem:[%s11789_s1 + $0x11b8] sm:$0xff]  }
 0x201   :  { %8785 = vmatprep.subr.bf16.mxu0 %v9492_v45  ;;  %v9529_v45 = vld [vmem:[%s11789_s1 + $0x11f0] sm:$0xff]  }
 0x202   :  { %8778 = vmatpush3.bf16.msra.mxu1 %v9490_v43  ;;  %v1769_v43 = vcombine.high %v1765_v37, %v1765_v37 }
 0x203   :  { %v8493_v52 = vpop.f32.mrf.mxu0  ;;  %6972 = vmatmul.mubr.bf16.vlgmr.msra.gmra.mxu0 %v1702_v44  ;;  %8807 = vmatprep.subr.bf16.mxu1 %v9493_v46  ;;  %v9530_v46 = vld [vmem:[%s11789_s1 + $0x1130] sm:$0xff]  }
 0x204   :  { %8786 = vmatpush3.bf16.msra.mxu0 %v9494_v47  ;;  %7051 = vmatprep.mubr.bf16.mxu0 %v1758_v30 }
 0x205   :  { %v8515_v55 = vpop.f32.mrf.mxu1  ;;  %7012 = vmatmul.mubr.bf16.vlgmr.msra.gmra.mxu1 %v1718_v49  ;;  %v8494_v56 = vpop.f32.mrf.mxu0  ;;  %8787 = vmatprep.subr.bf16.mxu0 %v9496_v50  ;;  %v9532_v49 = vld [vmem:[%s11789_s1 + $0x1168] sm:$0xff]  }
 0x206   :  { %8808 = vmatpush3.bf16.msra.mxu1 %v9495_v48  ;;  %v8495_v58 = vadd.f32 %v8494_v56, %v8493_v52  ;;  %7091 = vmatprep.mubr.bf16.mxu1 %v1768_v35 }
 0x207   :  { %v8516_v60 = vpop.f32.mrf.mxu1  ;;  %v8496_v61 = vpop.f32.mrf.mxu0  ;;  %8809 = vmatprep.subr.bf16.mxu1 %v9497_v51  ;;  %v9531_v51 = vld [vmem:[%s11789_s1 + $0x11b0] sm:$0xff]  }
 0x208   :  { %v6494_v63 = vadd.f32 %v8495_v58, %v11296_v22  ;;  %v8517_v0 = vadd.f32 %v8516_v60, %v8515_v55  ;;  %8788 = vmatpush3.bf16.msra.mxu0 %v9498_v53  ;;  %v9520_v22 = vld [vmem:[%s11789_s1 + $0x1040] sm:$0xff]  }
 0x209   :  { %v8518_v2 = vpop.f32.mrf.mxu1  ;;  %v8497_v3 = vpop.f32.mrf.mxu0  ;;  %8789 = vmatprep.subr.bf16.mxu0 %v9500_v57  ;;  %v9534_v57 = vld [vmem:[%s11789_s1 + $0x1128] sm:$0xff]   ;;  %v9536_v60 = vld [vmem:[%s11789_s1 + $0x1160] sm:$0xff]  }
 0x20a   :  { %v11397_v5 = vadd.f32 %v8517_v0, %v6494_v63  ;;  %8810 = vmatpush3.bf16.msra.mxu1 %v9499_v54  ;;  %v9533_v54 = vld [vmem:[%s11789_s1 + $0x11e8] sm:$0xff]   ;;  %v9537_v0 = vld [vmem:[%s11789_s1 + $0x11e0] sm:$0xff]   ;;  %v9540_v2 = vld [vmem:[%s11789_s1 + $0x1158] sm:$0xff]  }
 0x20b   :  { %v8519_v7 = vpop.f32.mrf.mxu1  ;;  %8811 = vmatprep.subr.bf16.mxu1 %v9501_v59  ;;  %v9539_v3 = vld [vmem:[%s11789_s1 + $0x11a0] sm:$0xff]  }
 0x20c   :  { %8790 = vmatpush3.bf16.msra.mxu0 %v9502_v62  ;;  %v9535_v62 = vld [vmem:[%s11789_s1 + $0x11a8] sm:$0xff]   ;;  %v9543_v7 = vld [vmem:[%s11789_s1 + $0x1198] sm:$0xff]  }
 0x20d   :  { %8791 = vmatprep.subr.bf16.mxu0 %v9504_v4  ;;  %v9541_v4 = vld [vmem:[%s11789_s1 + $0x11d8] sm:$0xff]  }
 0x20e   :  { %8812 = vmatpush3.bf16.msra.mxu1 %v9503_v1  ;;  %v9538_v1 = vld [vmem:[%s11789_s1 + $0x1120] sm:$0xff]  }
 0x20f   :  { %8813 = vmatprep.subr.bf16.mxu1 %v9505_v6  ;;  %v9544_v6 = vld [vmem:[%s11789_s1 + $0x1150] sm:$0xff]  }
 0x210   :  { %8792 = vmatpush3.bf16.msra.mxu0 %v9506_v8  ;;  %v9545_v8 = vld [vmem:[%s11789_s1 + $0x11d0] sm:$0xff]  }
 0x211   :  { %8793 = vmatprep.subr.bf16.mxu0 %v9508_v10  ;;  %v9548_v10 = vld [vmem:[%s11789_s1 + $0x1148] sm:$0xff]  }
 0x212   :  { %8814 = vmatpush3.bf16.msra.mxu1 %v9507_v9  ;;  %v9546_v9 = vld [vmem:[%s11789_s1 + $0x1110] sm:$0xff]  }
 0x213   :  { %8815 = vmatprep.subr.bf16.mxu1 %v9509_v11  ;;  %v9547_v11 = vld [vmem:[%s11789_s1 + $0x1190] sm:$0xff]  }
 0x214   :  { %8794 = vmatpush3.bf16.msra.mxu0 %v9510_v12  ;;  %v9549_v12 = vld [vmem:[%s11789_s1 + $0x11c8] sm:$0xff]  }
 0x215   :  { %8795 = vmatprep.subr.bf16.mxu0 %v9512_v14  ;;  %v9552_v14 = vld [vmem:[%s11789_s1 + $0x1140] sm:$0xff]  }
 0x216   :  { %8816 = vmatpush3.bf16.msra.mxu1 %v9511_v13  ;;  %v9550_v13 = vld [vmem:[%s11789_s1 + $0x1108] sm:$0xff]  }
 0x217   :  { %8817 = vmatprep.subr.bf16.mxu1 %v9513_v15  ;;  %v9551_v15 = vld [vmem:[%s11789_s1 + $0x1188] sm:$0xff]  }
 0x218   :  { %8796 = vmatpush3.bf16.msra.mxu0 %v9514_v16  ;;  %v9553_v16 = vld [vmem:[%s11789_s1 + $0x11c0] sm:$0xff]  }
 0x219   :  { %8797 = vmatprep.subr.bf16.mxu0 %v9516_v18  ;;  %v1751_v18 = vrot.slane %v11455_v28, %v9783_v41  ;;  %v9563_v28 = vld [vmem:[%s11789_s1 + $0x1230] sm:$0xff]  }
 0x21a   :  { %8818 = vmatpush3.bf16.msra.mxu1 %v9515_v17  ;;  %v9554_v17 = vld [vmem:[%s11789_s1 + $0x1100] sm:$0xff]  }
 0x21b   :  { %8819 = vmatprep.subr.bf16.mxu1 %v9517_v19  ;;  %v9557_v19 = vld [vmem:[%s11789_s1 + $0x1278] sm:$0xff]   ;;  %v1767_v23 = vcombine.high %v1751_v18, %v1751_v18 }
 0x21c   :  { %8798 = vmatpush3.bf16.msra.mxu0 %v9518_v20  ;;  %v9555_v20 = vld [vmem:[%s11789_s1 + $0x1180] sm:$0xff]  }
 0x21d   :  { %8799 = vmatprep.subr.bf16.mxu0 %v9520_v22  ;;  %v9559_v22 = vld [vmem:[%s11789_s1 + $0x1238] sm:$0xff]  }
 0x21e   :  { %8820 = vmatpush3.bf16.msra.mxu1 %v9519_v25  ;;  %v9560_v25 = vld [vmem:[%s11789_s1 + $0x12b8] sm:$0xff]  }
 0x21f   :  { %8821 = vmatprep.subr.bf16.mxu1 %v9521_v26 }
 0x220   :  { %8800 = vmatpush3.bf16.msra.mxu0 %v9522_v29 }
 0x221   :  { %8829 = vmatprep.subr.bf16.mxu0 %v9524_v32 }
 0x222   :  { %8822 = vmatpush3.bf16.msra.mxu1 %v9523_v34 }
 0x223   :  { %v8537_v44 = vpop.f32.mrf.mxu0  ;;  %7052 = vmatmul.mubr.bf16.vlgmr.msra.gmra.mxu0 %v1744_v31  ;;  %8851 = vmatprep.subr.bf16.mxu1 %v9525_v36  ;;  %v9565_v31 = vld [vmem:[%s11789_s1 + $0x1268] sm:$0xff]  }
 0x224   :  { %8830 = vmatpush3.bf16.msra.mxu0 %v9526_v38  ;;  %7131 = vmatprep.mubr.bf16.mxu0 %v1765_v37  ;;  %v9566_v36 = vld [vmem:[%s11789_s1 + $0x12e8] sm:$0xff]  }
 0x225   :  { %v8559_v47 = vpop.f32.mrf.mxu1  ;;  %7092 = vmatmul.mubr.bf16.vlgmr.msra.gmra.mxu1 %v1766_v39  ;;  %v8538_v48 = vpop.f32.mrf.mxu0  ;;  %8831 = vmatprep.subr.bf16.mxu0 %v9528_v40  ;;  %v9567_v39 = vld [vmem:[%s11789_s1 + $0x1228] sm:$0xff]  }
 0x226   :  { %8852 = vmatpush3.bf16.msra.mxu1 %v9527_v42  ;;  %v8539_v50 = vadd.f32 %v8538_v48, %v8537_v44  ;;  %7171 = vmatprep.mubr.bf16.mxu1 %v1769_v43  ;;  %v9569_v43 = vld [vmem:[%s11789_s1 + $0x1260] sm:$0xff]  }
 0x227   :  { %v8560_v52 = vpop.f32.mrf.mxu1  ;;  %v8540_v53 = vpop.f32.mrf.mxu0  ;;  %8853 = vmatprep.subr.bf16.mxu1 %v9529_v45  ;;  %v9568_v45 = vld [vmem:[%s11789_s1 + $0x12a8] sm:$0xff]   ;;  %v9571_v48 = vld [vmem:[%s11789_s1 + $0x1220] sm:$0xff]  }
 0x228   :  { %v6574_v55 = vadd.f32 %v8539_v50, %v11397_v5  ;;  %v8561_v56 = vadd.f32 %v8560_v52, %v8559_v47  ;;  %8832 = vmatpush3.bf16.msra.mxu0 %v9530_v46  ;;  %v9542_v5 = vld [vmem:[%s11789_s1 + $0x1118] sm:$0xff]   ;;  %v9570_v47 = vld [vmem:[%s11789_s1 + $0x12e0] sm:$0xff]   ;;  %v9577_v53 = vld [vmem:[%s11789_s1 + $0x1250] sm:$0xff]  }
 0x229   :  { %v8562_v58 = vpop.f32.mrf.mxu1  ;;  %v8541_v59 = vpop.f32.mrf.mxu0  ;;  %8833 = vmatprep.subr.bf16.mxu0 %v9532_v49  ;;  %v9573_v49 = vld [vmem:[%s11789_s1 + $0x1258] sm:$0xff]   ;;  %v9572_v50 = vld [vmem:[%s11789_s1 + $0x12a0] sm:$0xff]  }
 0x22a   :  { %v11505_v61 = vadd.f32 %v8561_v56, %v6574_v55  ;;  %8854 = vmatpush3.bf16.msra.mxu1 %v9531_v51  ;;  %v9574_v51 = vld [vmem:[%s11789_s1 + $0x12d8] sm:$0xff]   ;;  %v9578_v55 = vld [vmem:[%s11789_s1 + $0x12d0] sm:$0xff]   ;;  %v9582_v59 = vld [vmem:[%s11789_s1 + $0x12c8] sm:$0xff]  }
 0x22b   :  { %v8563_v63 = vpop.f32.mrf.mxu1  ;;  %8855 = vmatprep.subr.bf16.mxu1 %v9533_v54  ;;  %v9575_v52 = vld [vmem:[%s11789_s1 + $0x1218] sm:$0xff]   ;;  %v9579_v56 = vld [vmem:[%s11789_s1 + $0x1210] sm:$0xff]  }
 0x22c   :  { %8834 = vmatpush3.bf16.msra.mxu0 %v9534_v57  ;;  %v9576_v54 = vld [vmem:[%s11789_s1 + $0x1298] sm:$0xff]   ;;  %v9581_v57 = vld [vmem:[%s11789_s1 + $0x1248] sm:$0xff]   ;;  %v9580_v58 = vld [vmem:[%s11789_s1 + $0x1290] sm:$0xff]  }
 0x22d   :  { %8835 = vmatprep.subr.bf16.mxu0 %v9536_v60  ;;  %v9583_v60 = vld [vmem:[%s11789_s1 + $0x1208] sm:$0xff]  }
 0x22e   :  { %8856 = vmatpush3.bf16.msra.mxu1 %v9535_v62  ;;  %v9585_v62 = vld [vmem:[%s11789_s1 + $0x1240] sm:$0xff]  }
 0x22f   :  { %8857 = vmatprep.subr.bf16.mxu1 %v9537_v0 }
 0x230   :  { %8836 = vmatpush3.bf16.msra.mxu0 %v9538_v1  ;;  %v9584_v1 = vld [vmem:[%s11789_s1 + $0x1288] sm:$0xff]  }
 0x231   :  { %8837 = vmatprep.subr.bf16.mxu0 %v9540_v2  ;;  %v9586_v2 = vld [vmem:[%s11789_s1 + $0x12c0] sm:$0xff]  }
 0x232   :  { %8858 = vmatpush3.bf16.msra.mxu1 %v9539_v3 }
 0x233   :  { %8859 = vmatprep.subr.bf16.mxu1 %v9541_v4 }
 0x234   :  { %8838 = vmatpush3.bf16.msra.mxu0 %v9542_v5  ;;  %v9587_v5 = vld [vmem:[%s11789_s1 + $0x1200] sm:$0xff]  }
 0x235   :  { %8839 = vmatprep.subr.bf16.mxu0 %v9544_v6 }
 0x236   :  { %8860 = vmatpush3.bf16.msra.mxu1 %v9543_v7 }
 0x237   :  { %8861 = vmatprep.subr.bf16.mxu1 %v9545_v8  ;;  %v9589_v8 = vld [vmem:[%s11789_s1 + $0x1378] sm:$0xff]  }
 0x238   :  { %8840 = vmatpush3.bf16.msra.mxu0 %v9546_v9 }
 0x239   :  { %8841 = vmatprep.subr.bf16.mxu0 %v9548_v10  ;;  %v9588_v10 = vld [vmem:[%s11789_s1 + $0x1280] sm:$0xff]  }
 0x23a   :  { %8862 = vmatpush3.bf16.msra.mxu1 %v9547_v11 }
 0x23b   :  { %8863 = vmatprep.subr.bf16.mxu1 %v9549_v12  ;;  %v9590_v12 = vld [vmem:[%s11789_s1 + $0x13f8] sm:$0xff]  }
 0x23c   :  { %8842 = vmatpush3.bf16.msra.mxu0 %v9550_v13 }
 0x23d   :  { %8843 = vmatprep.subr.bf16.mxu0 %v9552_v14  ;;  %v9591_v14 = vld [vmem:[%s11789_s1 + $0x1338] sm:$0xff]  }
 0x23e   :  { %8864 = vmatpush3.bf16.msra.mxu1 %v9551_v15 }
 0x23f   :  { %8865 = vmatprep.subr.bf16.mxu1 %v9553_v16  ;;  %v9593_v16 = vld [vmem:[%s11789_s1 + $0x1370] sm:$0xff]  }
 0x240   :  { %8844 = vmatpush3.bf16.msra.mxu0 %v9554_v17  ;;  %v9592_v17 = vld [vmem:[%s11789_s1 + $0x13b8] sm:$0xff]  }
 0x241   :  { %8873 = vmatprep.subr.bf16.mxu0 %v9557_v19 }
 0x242   :  { %8866 = vmatpush3.bf16.msra.mxu1 %v9555_v20  ;;  %v9594_v20 = vld [vmem:[%s11789_s1 + $0x13f0] sm:$0xff]  }
 0x243   :  { %v8581_v26 = vpop.f32.mrf.mxu0  ;;  %7132 = vmatmul.mubr.bf16.vlgmr.msra.gmra.mxu0 %v1751_v18  ;;  %8895 = vmatprep.subr.bf16.mxu1 %v9558_v21  ;;  %v9595_v21 = vld [vmem:[%s11789_s1 + $0x1330] sm:$0xff]  }
 0x244   :  { %8874 = vmatpush3.bf16.msra.mxu0 %v9559_v22 }
 0x245   :  { %v8603_v29 = vpop.f32.mrf.mxu1  ;;  %7172 = vmatmul.mubr.bf16.vlgmr.msra.gmra.mxu1 %v1767_v23  ;;  %v8582_v30 = vpop.f32.mrf.mxu0  ;;  %8875 = vmatprep.subr.bf16.mxu0 %v9561_v24  ;;  %v9597_v24 = vld [vmem:[%s11789_s1 + $0x1368] sm:$0xff]  }
 0x246   :  { %8896 = vmatpush3.bf16.msra.mxu1 %v9560_v25  ;;  %v8583_v32 = vadd.f32 %v8582_v30, %v8581_v26  ;;  %v9596_v26 = vld [vmem:[%s11789_s1 + $0x13b0] sm:$0xff]  }
 0x247   :  { %v8604_v34 = vpop.f32.mrf.mxu1  ;;  %v8584_v35 = vpop.f32.mrf.mxu0  ;;  %8897 = vmatprep.subr.bf16.mxu1 %v9562_v27 }
 0x248   :  { %v6654_v37 = vadd.f32 %v8583_v32, %v11505_v61  ;;  %v8605_v38 = vadd.f32 %v8604_v34, %v8603_v29  ;;  %8876 = vmatpush3.bf16.msra.mxu0 %v9563_v28  ;;  %v31_v61 = vld [vmem:[%s11788_s0 + $0x48] sm:$0xff]  ;;  %v9601_v35 = vld [vmem:[%s11789_s1 + $0x1360] sm:$0xff]  }
 0x249   :  { %v8606_v40 = vpop.f32.mrf.mxu1  ;;  %v8585_v42 = vpop.f32.mrf.mxu0  ;;  %8877 = vmatprep.subr.bf16.mxu0 %v9565_v31  ;;  %v1777_v63 = vrot.slane %v31_v61, %v9783_v41  ;;  %v1770_v0 = vcombine.high %v31_v61, %v31_v61  ;;  %v9598_v29 = vld [vmem:[%s11789_s1 + $0x13e8] sm:$0xff]  }
 0x24a   :  { %v11606_v44 = vadd.f32 %v8605_v38, %v6654_v37  ;;  %8898 = vmatpush3.bf16.msra.mxu1 %v9564_v33  ;;  %v9599_v32 = vld [vmem:[%s11789_s1 + $0x1328] sm:$0xff]   ;;  %v9603_v40 = vld [vmem:[%s11789_s1 + $0x1320] sm:$0xff]   ;;  %v9605_v42 = vld [vmem:[%s11789_s1 + $0x1358] sm:$0xff]  }
 0x24b   :  { %v8607_v46 = vpop.f32.mrf.mxu1  ;;  %8899 = vmatprep.subr.bf16.mxu1 %v9566_v36  ;;  %v1785_v3 = vcombine.high %v1777_v63, %v1777_v63  ;;  %v11667_v4 = vrot.slane %v1770_v0, %v9783_v41  ;;  %v1793_v7 = vrot.slane %v1777_v63, %v9783_v41  ;;  %v9600_v37 = vld [vmem:[%s11789_s1 + $0x13a8] sm:$0xff]  }
 0x24c   :  { %8878 = vmatpush3.bf16.msra.mxu0 %v9567_v39  ;;  %v9602_v39 = vld [vmem:[%s11789_s1 + $0x13e0] sm:$0xff]   ;;  %v9609_v46 = vld [vmem:[%s11789_s1 + $0x1350] sm:$0xff]  }
 0x24d   :  { %8879 = vmatprep.subr.bf16.mxu0 %v9569_v43  ;;  %v1807_v6 = vrot.slane %v1785_v3, %v9783_v41  ;;  %v1786_v9 = vcombine.high %v11667_v4, %v11667_v4  ;;  %v1815_v15 = vcombine.high %v1793_v7, %v1793_v7  ;;  %v9604_v43 = vld [vmem:[%s11789_s1 + $0x13a0] sm:$0xff]  }
 0x24e   :  { %8900 = vmatpush3.bf16.msra.mxu1 %v9568_v45  ;;  %v9607_v45 = vld [vmem:[%s11789_s1 + $0x1318] sm:$0xff]  }
 0x24f   :  { %8901 = vmatprep.subr.bf16.mxu1 %v9570_v47  ;;  %7211 = vmatprep.mubr.bf16.mxu0 %v1807_v6  ;;  %v1817_v11 = vcombine.high %v1807_v6, %v1807_v6  ;;  %v1814_v13 = vrot.slane %v1786_v9, %v9783_v41  ;;  %v9608_v47 = vld [vmem:[%s11789_s1 + $0x1398] sm:$0xff]  }
 0x250   :  { %8880 = vmatpush3.bf16.msra.mxu0 %v9571_v48  ;;  %v9610_v48 = vld [vmem:[%s11789_s1 + $0x13d0] sm:$0xff]  }
 0x251   :  { %8881 = vmatprep.subr.bf16.mxu0 %v9573_v49  ;;  %7251 = vmatprep.mubr.bf16.mxu1 %v1817_v11  ;;  %v1818_v18 = vcombine.high %v1814_v13, %v1814_v13  ;;  %v9611_v49 = vld [vmem:[%s11789_s1 + $0x1310] sm:$0xff]  }
 0x252   :  { %8902 = vmatpush3.bf16.msra.mxu1 %v9572_v50  ;;  %v9613_v50 = vld [vmem:[%s11789_s1 + $0x1348] sm:$0xff]  }
 0x253   :  { %8903 = vmatprep.subr.bf16.mxu1 %v9574_v51  ;;  %v9612_v51 = vld [vmem:[%s11789_s1 + $0x1390] sm:$0xff]  }
 0x254   :  { %8882 = vmatpush3.bf16.msra.mxu0 %v9575_v52  ;;  %v9614_v52 = vld [vmem:[%s11789_s1 + $0x13c8] sm:$0xff]  }
 0x255   :  { %8883 = vmatprep.subr.bf16.mxu0 %v9577_v53  ;;  %v9615_v53 = vld [vmem:[%s11789_s1 + $0x1308] sm:$0xff]  }
 0x256   :  { %8904 = vmatpush3.bf16.msra.mxu1 %v9576_v54 }
 0x257   :  { %8905 = vmatprep.subr.bf16.mxu1 %v9578_v55 }
 0x258   :  { %8884 = vmatpush3.bf16.msra.mxu0 %v9579_v56 }
 0x259   :  { %8885 = vmatprep.subr.bf16.mxu0 %v9581_v57 }
 0x25a   :  { %8906 = vmatpush3.bf16.msra.mxu1 %v9580_v58 }
 0x25b   :  { %8907 = vmatprep.subr.bf16.mxu1 %v9582_v59 }
 0x25c   :  { %8886 = vmatpush3.bf16.msra.mxu0 %v9583_v60 }
 0x25d   :  { %8887 = vmatprep.subr.bf16.mxu0 %v9585_v62 }
 0x25e   :  { %8908 = vmatpush3.bf16.msra.mxu1 %v9584_v1 }
 0x25f   :  { %8909 = vmatprep.subr.bf16.mxu1 %v9586_v2 }
 0x260   :  { %8888 = vmatpush3.bf16.msra.mxu0 %v9587_v5 }
 0x261   :  { %8917 = vmatprep.subr.bf16.mxu0 %v9589_v8 }
 0x262   :  { %8910 = vmatpush3.bf16.msra.mxu1 %v9588_v10 }
 0x263   :  { %v8625_v19 = vpop.f32.mrf.mxu0  ;;  %7212 = vmatmul.mubr.bf16.vlgmr.msra.gmra.mxu0 %v1793_v7  ;;  %8939 = vmatprep.subr.bf16.mxu1 %v9590_v12 }
 0x264   :  { %8918 = vmatpush3.bf16.msra.mxu0 %v9591_v14  ;;  %7291 = vmatprep.mubr.bf16.mxu0 %v1814_v13 }
 0x265   :  { %v8647_v22 = vpop.f32.mrf.mxu1  ;;  %7252 = vmatmul.mubr.bf16.vlgmr.msra.gmra.mxu1 %v1815_v15  ;;  %v8626_v23 = vpop.f32.mrf.mxu0  ;;  %8919 = vmatprep.subr.bf16.mxu0 %v9593_v16 }
 0x266   :  { %8940 = vmatpush3.bf16.msra.mxu1 %v9592_v17  ;;  %v8627_v25 = vadd.f32 %v8626_v23, %v8625_v19  ;;  %7331 = vmatprep.mubr.bf16.mxu1 %v1818_v18 }
 0x267   :  { %v8648_v27 = vpop.f32.mrf.mxu1  ;;  %v8628_v28 = vpop.f32.mrf.mxu0  ;;  %8941 = vmatprep.subr.bf16.mxu1 %v9594_v20 }
 0x268   :  { %v6734_v30 = vadd.f32 %v8627_v25, %v11606_v44  ;;  %v8649_v31 = vadd.f32 %v8648_v27, %v8647_v22  ;;  %8920 = vmatpush3.bf16.msra.mxu0 %v9595_v21  ;;  %v9606_v44 = vld [vmem:[%s11789_s1 + $0x13d8] sm:$0xff]  }
 0x269   :  { %v8650_v33 = vpop.f32.mrf.mxu1  ;;  %v8629_v34 = vpop.f32.mrf.mxu0  ;;  %8921 = vmatprep.subr.bf16.mxu0 %v9597_v24 }
 0x26a   :  { %v6774_v36 = vadd.f32 %v8649_v31, %v6734_v30  ;;  %8942 = vmatpush3.bf16.msra.mxu1 %v9596_v26 }
 0x26b   :  { %v8651_v38 = vpop.f32.mrf.mxu1  ;;  %8943 = vmatprep.subr.bf16.mxu1 %v9598_v29 }
 0x26c   :  { %8922 = vmatpush3.bf16.msra.mxu0 %v9599_v32 }
 0x26d   :  { %8923 = vmatprep.subr.bf16.mxu0 %v9601_v35 }
 0x26e   :  { %8944 = vmatpush3.bf16.msra.mxu1 %v9600_v37 }
 0x26f   :  { %8945 = vmatprep.subr.bf16.mxu1 %v9602_v39 }
 0x270   :  { %8924 = vmatpush3.bf16.msra.mxu0 %v9603_v40 }
 0x271   :  { %8925 = vmatprep.subr.bf16.mxu0 %v9605_v42 }
 0x272   :  { %8946 = vmatpush3.bf16.msra.mxu1 %v9604_v43 }
 0x273   :  { %8947 = vmatprep.subr.bf16.mxu1 %v9606_v44 }
 0x274   :  { %8926 = vmatpush3.bf16.msra.mxu0 %v9607_v45 }
 0x275   :  { %8927 = vmatprep.subr.bf16.mxu0 %v9609_v46 }
 0x276   :  { %8948 = vmatpush3.bf16.msra.mxu1 %v9608_v47 }
 0x277   :  { %8949 = vmatprep.subr.bf16.mxu1 %v9610_v48 }
 0x278   :  { %8928 = vmatpush3.bf16.msra.mxu0 %v9611_v49 }
 0x279   :  { %10 = vsyncpa [#allocation3], 0  ;;  %8929 = vmatprep.subr.bf16.mxu0 %v9613_v50  ;;  %v9617_v54 = vld [vmem:[%s11789_s1 + $0x1340] sm:$0xff]   ;;  %v9616_v55 = vld [vmem:[%s11789_s1 + $0x1388] sm:$0xff]   ;;  %v1800_v58 = vrot.slane %v11667_v4, %v9783_v41  ;;  %v9645_v33 = vmov 0.0   ;;  %vm9646_vm0 = vmmov 0  }
 0x27a   :  { %8950 = vmatpush3.bf16.msra.mxu1 %v9612_v51  ;;  %v9618_v56 = vld [vmem:[%s11789_s1 + $0x13c0] sm:$0xff]   ;;  %vm7348_vm1 = vcmask 64512   ;;  %s9647_s12 = smov [#allocation2]   ;;  %vm7422_vm2 = vcmask 9216  }
 0x27b   :  { %8951 = vmatprep.subr.bf16.mxu1 %v9614_v52  ;;  %v9619_v57 = vld [vmem:[%s11789_s1 + $0x1300] sm:$0xff]   ;;  %v1816_v60 = vcombine.high %v1800_v58, %v1800_v58  ;;  %s7430_s13 = sshll.u32 %s9647_s12, 4  ;;  %s7431_s13 = int_to_ptr.vmem [resolvable:$true] %s7430_s13 }
 0x27c   :  { %8930 = vmatpush3.bf16.msra.mxu0 %v9615_v53  ;;  %v9620_v59 = vld [vmem:[%s11789_s1 + $0x1380] sm:$0xff]   ;;  %s9622_s14 = scalar_lea.vmem %s7431_s13, 32  ;;  %p9627_p1 = scmp.lt.s32.totalorder %s7431_s13, %s7431_s13 }
 0x27d   :  { %8931 = vmatprep.subr.bf16.mxu0 %v9617_v54  ;;  %v7340_v32 = vld [vmem:[%s11791_s3] sm:$0xff]  ;;  %p9623_p0 = scmp.ne.s32.totalorder %s7431_s13, %s9622_s14  ;;  %p9628_p2 = scmp.lt.s32.totalorder %s9622_s14, %s9622_s14 }
 0x27e   :  { %8952 = vmatpush3.bf16.msra.mxu1 %v9616_v55 }
 0x27f   :  { %8953 = vmatprep.subr.bf16.mxu1 %v9618_v56  ;;  %p9629_p3 = por %p9628_p2, %p9627_p1 }
 0x280   :  { %8932 = vmatpush3.bf16.msra.mxu0 %v9619_v57 }
 0x281   :  { %8963 = vmatprep.subr.mxu0 %v9645_v33  ;;  %p9630_p4 = pnand %p9629_p3, %p9623_p0 }
 0x282   :  { %8954 = vmatpush3.bf16.msra.mxu1 %v9620_v59 }
 0x283   :  { %v8669_v61 = vpop.f32.mrf.mxu0  ;;  %7292 = vmatmul.mubr.bf16.vlgmr.msra.gmra.mxu0 %v1800_v58 }
 0x284   :  { %8965 = vmatprep.mubr.msk.f32.mxu0 %vm9646_vm0, %v9645_v33  ;;  %8964 = vmatpush3.msra.mxu0 %v7340_v32 }
 0x285   :  { %v8691_v62 = vpop.f32.mrf.mxu1  ;;  %7332 = vmatmul.mubr.bf16.vlgmr.msra.gmra.mxu1 %v1816_v60  ;;  %v8670_v63 = vpop.f32.mrf.mxu0 }
 0x286   :  { %v8671_v0 = vadd.f32 %v8670_v63, %v8669_v61 }
 0x287   :  { %v8692_v1 = vpop.f32.mrf.mxu1  ;;  %v8672_v2 = vpop.f32.mrf.mxu0 }
 0x288   :  { %v6814_v3 = vadd.f32 %v8671_v0, %v6774_v36  ;;  %v8693_v5 = vadd.f32 %v8692_v1, %v8691_v62 }
 0x289   :  { %v8694_v41 = vpop.f32.mrf.mxu1  ;;  %v8673_v4 = vpop.f32.mrf.mxu0 }
 0x28a   :  { %v6854_v6 = vadd.f32 %v8693_v5, %v6814_v3 }
 0x28b   :  { %v8695_v7 = vpop.f32.mrf.mxu1 }
 0x2a3   :  { %v8713_v8 = vpop.f32.mrf.mxu0 }
 0x2a5   :  { %v8735_v9 = vpop.f32.mrf.mxu1  ;;  %v8714_v10 = vpop.f32.mrf.mxu0 }
 0x2a6   :  { %v8715_v11 = vadd.f32 %v8714_v10, %v8713_v8 }
 0x2a7   :  { %v8736_v12 = vpop.f32.mrf.mxu1  ;;  %v8716_v13 = vpop.f32.mrf.mxu0 }
 0x2a8   :  { %v6894_v14 = vadd.f32 %v8715_v11, %v6854_v6  ;;  %v8737_v15 = vadd.f32 %v8736_v12, %v8735_v9 }
 0x2a9   :  { %v8738_v16 = vpop.f32.mrf.mxu1  ;;  %v8717_v17 = vpop.f32.mrf.mxu0 }
 0x2aa   :  { %v6934_v18 = vadd.f32 %v8737_v15, %v6894_v14 }
 0x2ab   :  { %v8739_v19 = vpop.f32.mrf.mxu1 }
 0x2ac   :  { %v8079_v19 = vld [vmem:[%s11792_s4] ss:$0 sm:$0xff] }
 0x2c3   :  { %v8757_v20 = vpop.f32.mrf.mxu0 }
 0x2c5   :  { %v8779_v21 = vpop.f32.mrf.mxu1  ;;  %v8758_v22 = vpop.f32.mrf.mxu0 }
 0x2c6   :  { %v8759_v23 = vadd.f32 %v8758_v22, %v8757_v20 }
 0x2c7   :  { %v8780_v24 = vpop.f32.mrf.mxu1  ;;  %v8760_v25 = vpop.f32.mrf.mxu0 }
 0x2c8   :  { %v6974_v26 = vadd.f32 %v8759_v23, %v6934_v18  ;;  %v8781_v27 = vadd.f32 %v8780_v24, %v8779_v21 }
 0x2c9   :  { %v8782_v28 = vpop.f32.mrf.mxu1  ;;  %v8761_v29 = vpop.f32.mrf.mxu0 }
 0x2ca   :  { %v7014_v30 = vadd.f32 %v8781_v27, %v6974_v26 }
 0x2cb   :  { %v8783_v31 = vpop.f32.mrf.mxu1 }
 0x2e3   :  { %v8801_v34 = vpop.f32.mrf.mxu0 }
 0x2e5   :  { %v8823_v35 = vpop.f32.mrf.mxu1  ;;  %v8802_v36 = vpop.f32.mrf.mxu0 }
 0x2e6   :  { %v8803_v37 = vadd.f32 %v8802_v36, %v8801_v34 }
 0x2e7   :  { %v8824_v38 = vpop.f32.mrf.mxu1  ;;  %v8804_v39 = vpop.f32.mrf.mxu0 }
 0x2e8   :  { %v7054_v40 = vadd.f32 %v8803_v37, %v7014_v30  ;;  %v8825_v42 = vadd.f32 %v8824_v38, %v8823_v35 }
 0x2e9   :  { %v8826_v43 = vpop.f32.mrf.mxu1  ;;  %v8805_v44 = vpop.f32.mrf.mxu0 }
 0x2ea   :  { %v7094_v45 = vadd.f32 %v8825_v42, %v7054_v40 }
 0x2eb   :  { %v8827_v46 = vpop.f32.mrf.mxu1 }
 0x303   :  { %v8845_v47 = vpop.f32.mrf.mxu0 }
 0x305   :  { %v8867_v48 = vpop.f32.mrf.mxu1  ;;  %v8846_v49 = vpop.f32.mrf.mxu0 }
 0x306   :  { %v8847_v63 = vadd.f32 %v8846_v49, %v8845_v47 }
 0x307   :  { %v8868_v50 = vpop.f32.mrf.mxu1  ;;  %v8848_v51 = vpop.f32.mrf.mxu0 }
 0x308   :  { %v7134_v0 = vadd.f32 %v8847_v63, %v7094_v45  ;;  %v8869_v1 = vadd.f32 %v8868_v50, %v8867_v48 }
 0x309   :  { %v8870_v52 = vpop.f32.mrf.mxu1  ;;  %v8849_v53 = vpop.f32.mrf.mxu0 }
 0x30a   :  { %v7174_v3 = vadd.f32 %v8869_v1, %v7134_v0 }
 0x30b   :  { %v8871_v54 = vpop.f32.mrf.mxu1 }
 0x323   :  { %v8889_v55 = vpop.f32.mrf.mxu0 }
 0x325   :  { %v8911_v56 = vpop.f32.mrf.mxu1  ;;  %v8890_v57 = vpop.f32.mrf.mxu0 }
 0x326   :  { %v8891_v2 = vadd.f32 %v8890_v57, %v8889_v55 }
 0x327   :  { %v8912_v58 = vpop.f32.mrf.mxu1  ;;  %v8892_v59 = vpop.f32.mrf.mxu0 }
 0x328   :  { %v7214_v5 = vadd.f32 %v8891_v2, %v7174_v3  ;;  %v8913_v41 = vadd.f32 %v8912_v58, %v8911_v56 }
 0x329   :  { %v8914_v60 = vpop.f32.mrf.mxu1  ;;  %v8893_v61 = vpop.f32.mrf.mxu0 }
 0x32a   :  { %v7254_v8 = vadd.f32 %v8913_v41, %v7214_v5 }
 0x32b   :  { %v8915_v62 = vpop.f32.mrf.mxu1 }
 0x343   :  { %v8933_v4 = vpop.f32.mrf.mxu0 }
 0x345   :  { %v8955_v6 = vpop.f32.mrf.mxu1  ;;  %v8934_v7 = vpop.f32.mrf.mxu0 }
 0x346   :  { %v8935_v9 = vadd.f32 %v8934_v7, %v8933_v4 }
 0x347   :  { %v8956_v10 = vpop.f32.mrf.mxu1  ;;  %v8936_v11 = vpop.f32.mrf.mxu0 }
 0x348   :  { %v7294_v12 = vadd.f32 %v8935_v9, %v7254_v8  ;;  %v8957_v13 = vadd.f32 %v8956_v10, %v8955_v6 }
 0x349   :  { %v8958_v14 = vpop.f32.mrf.mxu1  ;;  %v8937_v15 = vpop.f32.mrf.mxu0 }
 0x34a   :  { %v7334_v16 = vadd.f32 %v8957_v13, %v7294_v12 }
 0x34b   :  { %v8959_v17 = vpop.f32.mrf.mxu1 }
 0x34c   :  { %v7339_v18 = vmax.f32 %v7334_v16, 0.0 }
 0x34e   :  { %8966 = vmatmul.mubr.msk.f32.vlgmr.msra.gmra.mxu0 %vm7348_vm1, %v7339_v18 }
 0x40e   :  { %v7418_v20 = vpop.f32.mrf.mxu0 }
 0x40f   :  { %v7419_v21 = vadd.f32 %v8079_v19, %v7418_v20 }
 0x410   :  { %v8967_v22 = vpop.f32.mrf.mxu0 }
 0x411   :  { %7423 = vst.msk [vmem:[#allocation2] sm:$0x3] %vm7422_vm2, %v7419_v21 }
 0x412   :  { %9633 = shalt.err (!%p9630_p4)
}
 0x413   :  { %7433 = dma.vmem_to_hbm [thread:$0]  %s7431_s13, 32, %s11793_s5, [#allocation3]  }
 0x414   :  { %9642 = dma.done.wait [#allocation3], 32  }
 0x415   :  { %9643 = vsyncadd [#allocation3], 4294967264 }
 0x416   :  { %7437 = vsyncpa [#allocation3], 1 }

</bundles_post_ra>
